<compile_context>
chip_gen: v7x
topology: tpu7x:2x2x1
jax: 0.10.0
libtpu: 0.0.40
codegen_flags: <defaults>
</compile_context>

<pallas_src>
import functools

import numpy as np
import jax
import jax.numpy as jnp
from jax import lax
from jax.experimental import pallas as pl
from jax.experimental.pallas import tpu as pltpu

DIMWRAP = 4
DIMHEAD = 16
DIMGROUP = 4
EPS = 1e-5  # PyTorch default eps for GroupNorm


# ---------------------------------------------------------------------------
# In-kernel math helpers
# ---------------------------------------------------------------------------
def _gelu_tanh(x):
    # tanh-form GELU (tanh runs on the EUP slot). Max deviation from the exact
    # erf GELU is ~1e-3 pre-scaling; after the 3x3x3 conv, GroupNorm and the
    # ReZero scale it contributes <<3e-3 to the block output.
    c = 0.7978845608028654  # sqrt(2/pi)
    return 0.5 * x * (1.0 + jnp.tanh(c * (x + 0.044715 * x * x * x)))


# ---------------------------------------------------------------------------
# Fused Pallas kernel: whole residual block for one sample per grid step
# ---------------------------------------------------------------------------
def _fused_resconv_kernel(x_ref, gm_ref, msk_ref,
                          g1w_ref, g1b_ref, w1_ref, b1_ref,
                          g2w_ref, g2b_ref, w2_ref, b2_ref, rz_ref,
                          o_ref, *, offsets, nhead, cin_g, cout_g):
    C, V = x_ref.shape
    x = x_ref[...]                       # (C, V) f32
    gm = gm_ref[...]                     # (C, C): 1/(group_size*V) on same-group entries

    def group_norm_gelu(h, w, b):
        # Lane-reduce first (XLU), then a tiny (C,C)@(C,1) membership matmul to
        # broadcast group statistics to channels. One-pass E[x], E[x^2]; stats
        # stay f32 (bf16 here would cost ~1e-3 on the normalized values).
        s1 = jnp.sum(h, axis=-1, keepdims=True)            # (C, 1)
        s2 = jnp.sum(h * h, axis=-1, keepdims=True)        # (C, 1)
        mean = jnp.dot(gm, s1, preferred_element_type=jnp.float32)
        mean_sq = jnp.dot(gm, s2, preferred_element_type=jnp.float32)
        var = mean_sq - mean * mean
        return _gelu_tanh((h - mean) * lax.rsqrt(var + EPS) * w + b)

    # ---- Stage 1: GroupNorm + GELU ---------------------------------------
    h1 = group_norm_gelu(x, g1w_ref[...], g1b_ref[...])    # (C, V) f32

    # ---- Stage 2: grouped Conv3d(k=3, p=1) as 27 roll-and-accumulate taps --
    # tap_t[v] = h1[v + off_t] (boundary mask zeroes 3-D wrap-arounds), so
    #   conv[g-out] = sum_t W[t, g] (cout_g, cin_g) @ tap_t[g-in] (cin_g, V)
    # No im2col scratch, no zero-padded block-diagonal weight.
    accs = [jnp.zeros((cout_g, V), jnp.float32) for _ in range(nhead)]
    for t, off in enumerate(offsets):
        sh = (-off) % V
        rolled = h1 if sh == 0 else pltpu.roll(h1, shift=sh, axis=1)
        tap = rolled if off == 0 else rolled * msk_ref[t:t + 1, :]
        tap = tap.astype(jnp.bfloat16)                      # MXU operand
        for g in range(nhead):
            wg = w1_ref[t * C + g * cout_g:t * C + (g + 1) * cout_g, :]  # (cout_g, cin_g) bf16
            accs[g] = accs[g] + jnp.dot(
                wg, tap[g * cin_g:(g + 1) * cin_g, :],
                preferred_element_type=jnp.float32)
    conv = jnp.concatenate(accs, axis=0) + b1_ref[...]      # (C, V) f32

    # ---- Stage 3: GroupNorm + GELU ---------------------------------------
    h2 = group_norm_gelu(conv, g2w_ref[...], g2b_ref[...])

    # ---- Stage 4: 1x1x1 Conv3d + ReZero scale + residual ------------------
    y = jnp.dot(w2_ref[...], h2.astype(jnp.bfloat16),
                preferred_element_type=jnp.float32) + b2_ref[...]
    o_ref[...] = x + rz_ref[...] * y


# ---------------------------------------------------------------------------
# Host-side wrapper (only layout plumbing; all compute lives in the kernel)
# ---------------------------------------------------------------------------
@jax.jit
def res_conv_block_forward(x, params):
    N, C, S, _, _ = x.shape
    V = S * S * S
    chid = min(max(C // 4, DIMWRAP), DIMHEAD)
    nhead = C // chid                    # conv groups
    cin_g = C // nhead
    cout_g = C // nhead
    f32 = jnp.float32
    bf16 = jnp.bfloat16

    # GroupNorm group-mean matrix (groups of DIMGROUP consecutive channels).
    ch = np.arange(C)
    same = (ch[:, None] // DIMGROUP) == (ch[None, :] // DIMGROUP)
    gmat = jnp.asarray(same.astype(np.float32) / (DIMGROUP * V))

    # Tap lane-offsets and 0/1 boundary masks for the 3x3x3 / pad=1 conv.
    idx = np.arange(V)
    zi, yi, xi = idx // (S * S), (idx // S) % S, idx % S
    offsets, masks = [], []
    for dz in (-1, 0, 1):
        for dy in (-1, 0, 1):
            for dx in (-1, 0, 1):
                offsets.append(dz * S * S + dy * S + dx)
                ok = ((zi + dz >= 0) & (zi + dz < S) &
                      (yi + dy >= 0) & (yi + dy < S) &
                      (xi + dx >= 0) & (xi + dx < S))
                masks.append(ok.astype(np.float32))
    mask27 = jnp.asarray(np.stack(masks))                        # (27, V)

    # Per-tap, per-group conv weight (no zero padding), rows tap-major:
    #   w1t[t*C + co, ci_local] = w1[co, ci_local, kz, ky, kx],  t = kz*9+ky*3+kx
    w1 = params["w1"].astype(f32)                                # (C, cin_g, 3,3,3)
    w1t = jnp.transpose(w1.reshape(C, cin_g, 27), (2, 0, 1)).reshape(27 * C, cin_g)
    w1t = w1t.astype(bf16)

    rz = jnp.repeat(params["rz_w"].reshape(-1), DIMGROUP).reshape(C, 1).astype(f32)

    args = (
        x.reshape(N, C, V).astype(f32),
        gmat, mask27,
        params["gn1_w"].reshape(C, 1).astype(f32),
        params["gn1_b"].reshape(C, 1).astype(f32),
        w1t,
        params["b1"].reshape(C, 1).astype(f32),
        params["gn2_w"].reshape(C, 1).astype(f32),
        params["gn2_b"].reshape(C, 1).astype(f32),
        params["w2"].reshape(C, C).astype(bf16),
        params["b2"].reshape(C, 1).astype(f32),
        rz,
    )

    kernel = functools.partial(
        _fused_resconv_kernel,
        offsets=tuple(int(o) for o in offsets),
        nhead=int(nhead), cin_g=int(cin_g), cout_g=int(cout_g))

    const2 = lambda n: (0, 0)
    out = pl.pallas_call(
        kernel,
        out_shape=jax.ShapeDtypeStruct((N, C, V), f32),
        grid=(N,),
        in_specs=[
            pl.BlockSpec((None, C, V), lambda n: (n, 0, 0)),   # x (per-sample)
            pl.BlockSpec((C, C), const2),                      # group-mean matrix
            pl.BlockSpec((27, V), const2),                     # tap boundary masks
            pl.BlockSpec((C, 1), const2),                      # gn1 weight
            pl.BlockSpec((C, 1), const2),                      # gn1 bias
            pl.BlockSpec((27 * C, cin_g), const2),             # per-tap/group conv weight (bf16)
            pl.BlockSpec((C, 1), const2),                      # conv bias
            pl.BlockSpec((C, 1), const2),                      # gn2 weight
            pl.BlockSpec((C, 1), const2),                      # gn2 bias
            pl.BlockSpec((C, C), const2),                      # 1x1 conv weight (bf16)
            pl.BlockSpec((C, 1), const2),                      # 1x1 conv bias
            pl.BlockSpec((C, 1), const2),                      # ReZero per-channel scale
        ],
        out_specs=pl.BlockSpec((None, C, V), lambda n: (n, 0, 0)),
        compiler_params=pltpu.CompilerParams(
            dimension_semantics=("parallel",),
            vmem_limit_bytes=32 * 1024 * 1024),
    )(*args)
    return out.reshape(N, C, S, S, S)


# ---------------------------------------------------------------------------
# Pure-JAX reference (correctness check only)
# ---------------------------------------------------------------------------
def reference_forward(x, params):
    N, C, S, _, _ = x.shape
    G = C // DIMGROUP
    chid = min(max(C // 4, DIMWRAP), DIMHEAD)
    nhead = C // chid

    def gn(h, w, b):
        hg = h.reshape(N, G, DIMGROUP, S, S, S)
        m = hg.mean(axis=(2, 3, 4, 5), keepdims=True)
        v = ((hg - m) ** 2).mean(axis=(2, 3, 4, 5), keepdims=True)
        hn = ((hg - m) / jnp.sqrt(v + EPS)).reshape(N, C, S, S, S)
        return hn * w.reshape(1, C, 1, 1, 1) + b.reshape(1, C, 1, 1, 1)

    h = jax.nn.gelu(gn(x, params["gn1_w"], params["gn1_b"]), approximate=False)
    h = lax.conv_general_dilated(
        h, params["w1"], (1, 1, 1), ((1, 1), (1, 1), (1, 1)),
        dimension_numbers=("NCDHW", "OIDHW", "NCDHW"),
        feature_group_count=nhead, precision=lax.Precision.HIGHEST)
    h = h + params["b1"].reshape(1, -1, 1, 1, 1)
    h = jax.nn.gelu(gn(h, params["gn2_w"], params["gn2_b"]), approximate=False)
    h = lax.conv_general_dilated(
        h, params["w2"], (1, 1, 1), ((0, 0), (0, 0), (0, 0)),
        dimension_numbers=("NCDHW", "OIDHW", "NCDHW"),
        precision=lax.Precision.HIGHEST)
    h = h + params["b2"].reshape(1, -1, 1, 1, 1)
    rz = jnp.repeat(params["rz_w"].reshape(-1), DIMGROUP).reshape(1, C, 1, 1, 1)
    return x + h * rz


# ---------------------------------------------------------------------------
if __name__ == "__main__":
    N, C, S = 2, 8, 8          # V = 512 (multiple of 128 -> lane-dense tiles)
    chid = min(max(C // 4, DIMWRAP), DIMHEAD)
    NHEAD = C // chid

    key = jax.random.PRNGKey(0)
    ks = jax.random.split(key, 10)
    params = {
        "gn1_w": 1.0 + 0.1 * jax.random.normal(ks[0], (C,), jnp.float32),
        "gn1_b": 0.1 * jax.random.normal(ks[1], (C,), jnp.float32),
        "w1": 0.1 * jax.random.normal(ks[2], (C, C // NHEAD, 3, 3, 3), jnp.float32),
        "b1": 0.1 * jax.random.normal(ks[3], (C,), jnp.float32),
        "gn2_w": 1.0 + 0.1 * jax.random.normal(ks[4], (C,), jnp.float32),
        "gn2_b": 0.1 * jax.random.normal(ks[5], (C,), jnp.float32),
        "w2": 0.1 * jax.random.normal(ks[6], (C, C, 1, 1, 1), jnp.float32),
        "b2": 0.1 * jax.random.normal(ks[7], (C,), jnp.float32),
        # ReZero initializes its weight to zeros; random values here so the test
        # exercises the whole block instead of just the residual path.
        "rz_w": 0.1 * jax.random.normal(ks[8], (C // DIMGROUP, 1), jnp.float32),
    }
    x = jax.random.normal(ks[9], (N, C, S, S, S), jnp.float32)

    out = jax.block_until_ready(res_conv_block_forward(x, params))
    ref = jax.block_until_ready(reference_forward(x, params))

    assert out.shape == (N, C, S, S, S), out.shape
    max_err = float(jnp.max(jnp.abs(out - ref)))
    if max_err > 3e-3:
        raise AssertionError(f"kernel/reference mismatch, max abs err = {max_err}")
    print("KERNEL_OK")
</pallas_src>

<mosaic_0001>
module attributes {stable_mosaic.version = 11 : i64} {
  func.func @_fused_resconv_kernel(%arg0: i32, %arg1: memref<1x8x512xf32, #tpu.memory_space<vmem>>, %arg2: memref<8x8xf32, #tpu.memory_space<vmem>>, %arg3: memref<27x512xf32, #tpu.memory_space<vmem>>, %arg4: memref<8x1xf32, #tpu.memory_space<vmem>>, %arg5: memref<8x1xf32, #tpu.memory_space<vmem>>, %arg6: memref<216x4xbf16, #tpu.memory_space<vmem>>, %arg7: memref<8x1xf32, #tpu.memory_space<vmem>>, %arg8: memref<8x1xf32, #tpu.memory_space<vmem>>, %arg9: memref<8x1xf32, #tpu.memory_space<vmem>>, %arg10: memref<8x8xbf16, #tpu.memory_space<vmem>>, %arg11: memref<8x1xf32, #tpu.memory_space<vmem>>, %arg12: memref<8x1xf32, #tpu.memory_space<vmem>>, %arg13: memref<1x8x512xf32, #tpu.memory_space<vmem>>) attributes {dimension_semantics = [#tpu.dimension_semantics<parallel>], iteration_bounds = array<i64: 2>, scalar_prefetch = 0 : i64, scratch_operands = 0 : i64, tpu.core_type = #tpu.core_type<tc>, window_params = [{transform_indices = @transform_0, window_bounds = array<i64: 1, 8, 512>}, {pipeline_mode = #tpu.pipeline_mode<synchronous>, transform_indices = @transform_1, window_bounds = array<i64: 8, 8>}, {pipeline_mode = #tpu.pipeline_mode<synchronous>, transform_indices = @transform_2, window_bounds = array<i64: 27, 512>}, {pipeline_mode = #tpu.pipeline_mode<synchronous>, transform_indices = @transform_3, window_bounds = array<i64: 8, 1>}, {pipeline_mode = #tpu.pipeline_mode<synchronous>, transform_indices = @transform_4, window_bounds = array<i64: 8, 1>}, {pipeline_mode = #tpu.pipeline_mode<synchronous>, transform_indices = @transform_5, window_bounds = array<i64: 216, 4>}, {pipeline_mode = #tpu.pipeline_mode<synchronous>, transform_indices = @transform_6, window_bounds = array<i64: 8, 1>}, {pipeline_mode = #tpu.pipeline_mode<synchronous>, transform_indices = @transform_7, window_bounds = array<i64: 8, 1>}, {pipeline_mode = #tpu.pipeline_mode<synchronous>, transform_indices = @transform_8, window_bounds = array<i64: 8, 1>}, {pipeline_mode = #tpu.pipeline_mode<synchronous>, transform_indices = @transform_9, window_bounds = array<i64: 8, 8>}, {pipeline_mode = #tpu.pipeline_mode<synchronous>, transform_indices = @transform_10, window_bounds = array<i64: 8, 1>}, {pipeline_mode = #tpu.pipeline_mode<synchronous>, transform_indices = @transform_11, window_bounds = array<i64: 8, 1>}, {transform_indices = @transform_12, window_bounds = array<i64: 1, 8, 512>}]} {
    %c0 = arith.constant 0 : index
    %c0_0 = arith.constant 0 : index
    %c0_1 = arith.constant 0 : index
    %0 = vector.load %arg1[%c0, %c0_0, %c0_1] : memref<1x8x512xf32, #tpu.memory_space<vmem>>, vector<1x8x512xf32>
    %1 = vector.shape_cast %0 : vector<1x8x512xf32> to vector<8x512xf32>
    %c0_2 = arith.constant 0 : index
    %c0_3 = arith.constant 0 : index
    %2 = vector.load %arg2[%c0_2, %c0_3] : memref<8x8xf32, #tpu.memory_space<vmem>>, vector<8x8xf32>
    %c0_4 = arith.constant 0 : index
    %c0_5 = arith.constant 0 : index
    %3 = vector.load %arg4[%c0_4, %c0_5] : memref<8x1xf32, #tpu.memory_space<vmem>>, vector<8x1xf32>
    %c0_6 = arith.constant 0 : index
    %c0_7 = arith.constant 0 : index
    %4 = vector.load %arg5[%c0_6, %c0_7] : memref<8x1xf32, #tpu.memory_space<vmem>>, vector<8x1xf32>
    %cst = arith.constant dense<0.000000e+00> : vector<8xf32>
    %5 = vector.multi_reduction <add>, %1, %cst [1] : vector<8x512xf32> to vector<8xf32>
    %6 = vector.shape_cast %5 : vector<8xf32> to vector<8x1xf32>
    %7 = arith.mulf %1, %1 : vector<8x512xf32>
    %cst_8 = arith.constant dense<0.000000e+00> : vector<8xf32>
    %8 = vector.multi_reduction <add>, %7, %cst_8 [1] : vector<8x512xf32> to vector<8xf32>
    %9 = vector.shape_cast %8 : vector<8xf32> to vector<8x1xf32>
    %cst_9 = arith.constant dense<0.000000e+00> : vector<8x1xf32>
    %10 = tpu.matmul %2, %6, %cst_9 {dimension_numbers = #tpu.dot_dimension_numbers<[1], [0], [0], [1], [0, 0, 1, 1], [], []>} : vector<8x8xf32>, vector<8x1xf32>, vector<8x1xf32> -> vector<8x1xf32>
    %cst_10 = arith.constant dense<0.000000e+00> : vector<8x1xf32>
    %11 = tpu.matmul %2, %9, %cst_10 {dimension_numbers = #tpu.dot_dimension_numbers<[1], [0], [0], [1], [0, 0, 1, 1], [], []>} : vector<8x8xf32>, vector<8x1xf32>, vector<8x1xf32> -> vector<8x1xf32>
    %12 = arith.mulf %10, %10 : vector<8x1xf32>
    %13 = arith.subf %11, %12 : vector<8x1xf32>
    %14 = vector.broadcast %10 : vector<8x1xf32> to vector<8x512xf32>
    %15 = arith.subf %1, %14 : vector<8x512xf32>
    %cst_11 = arith.constant 9.99999974E-6 : f32
    %16 = vector.broadcast %cst_11 : f32 to vector<8x1xf32>
    %17 = arith.addf %13, %16 : vector<8x1xf32>
    %18 = math.rsqrt %17 : vector<8x1xf32>
    %19 = vector.broadcast %18 : vector<8x1xf32> to vector<8x512xf32>
    %20 = arith.mulf %15, %19 : vector<8x512xf32>
    %21 = vector.broadcast %3 : vector<8x1xf32> to vector<8x512xf32>
    %22 = arith.mulf %20, %21 : vector<8x512xf32>
    %23 = vector.broadcast %4 : vector<8x1xf32> to vector<8x512xf32>
    %24 = arith.addf %22, %23 : vector<8x512xf32>
    %cst_12 = arith.constant 5.000000e-01 : f32
    %25 = vector.broadcast %cst_12 : f32 to vector<8x512xf32>
    %26 = arith.mulf %25, %24 : vector<8x512xf32>
    %cst_13 = arith.constant 4.471500e-02 : f32
    %27 = vector.broadcast %cst_13 : f32 to vector<8x512xf32>
    %28 = arith.mulf %27, %24 : vector<8x512xf32>
    %29 = arith.mulf %28, %24 : vector<8x512xf32>
    %30 = arith.mulf %29, %24 : vector<8x512xf32>
    %31 = arith.addf %24, %30 : vector<8x512xf32>
    %cst_14 = arith.constant 0.797884583 : f32
    %32 = vector.broadcast %cst_14 : f32 to vector<8x512xf32>
    %33 = arith.mulf %32, %31 : vector<8x512xf32>
    %34 = math.tanh %33 : vector<8x512xf32>
    %cst_15 = arith.constant 1.000000e+00 : f32
    %35 = vector.broadcast %cst_15 : f32 to vector<8x512xf32>
    %36 = arith.addf %35, %34 : vector<8x512xf32>
    %37 = arith.mulf %26, %36 : vector<8x512xf32>
    %cst_16 = arith.constant 0.000000e+00 : f32
    %38 = vector.broadcast %cst_16 : f32 to vector<4x512xf32>
    %cst_17 = arith.constant 0.000000e+00 : f32
    %39 = vector.broadcast %cst_17 : f32 to vector<4x512xf32>
    %c73_i32 = arith.constant 73 : i32
    %40 = tpu.dynamic_rotate %37 by %c73_i32 dim 1 : vector<8x512xf32>, i32 -> vector<8x512xf32>
    %c0_18 = arith.constant 0 : index
    %c0_19 = arith.constant 0 : index
    %41 = vector.load %arg3[%c0_18, %c0_19] : memref<27x512xf32, #tpu.memory_space<vmem>>, vector<1x512xf32>
    %42 = vector.broadcast %41 : vector<1x512xf32> to vector<8x512xf32>
    %43 = arith.mulf %40, %42 : vector<8x512xf32>
    %44 = arith.truncf %43 : vector<8x512xf32> to vector<8x512xbf16>
    %c0_20 = arith.constant 0 : index
    %c0_21 = arith.constant 0 : index
    %45 = vector.load %arg6[%c0_20, %c0_21] : memref<216x4xbf16, #tpu.memory_space<vmem>>, vector<4x4xbf16>
    %46 = vector.extract_strided_slice %44 {offsets = [0, 0], sizes = [4, 512], strides = [1, 1]} : vector<8x512xbf16> to vector<4x512xbf16>
    %cst_22 = arith.constant dense<0.000000e+00> : vector<4x512xf32>
    %47 = tpu.matmul %45, %46, %cst_22 {dimension_numbers = #tpu.dot_dimension_numbers<[1], [0], [0], [1], [0, 0, 1, 1], [], []>} : vector<4x4xbf16>, vector<4x512xbf16>, vector<4x512xf32> -> vector<4x512xf32>
    %48 = arith.addf %38, %47 : vector<4x512xf32>
    %c4 = arith.constant 4 : index
    %c0_23 = arith.constant 0 : index
    %49 = vector.load %arg6[%c4, %c0_23] : memref<216x4xbf16, #tpu.memory_space<vmem>>, vector<4x4xbf16>
    %50 = vector.extract_strided_slice %44 {offsets = [4, 0], sizes = [4, 512], strides = [1, 1]} : vector<8x512xbf16> to vector<4x512xbf16>
    %cst_24 = arith.constant dense<0.000000e+00> : vector<4x512xf32>
    %51 = tpu.matmul %49, %50, %cst_24 {dimension_numbers = #tpu.dot_dimension_numbers<[1], [0], [0], [1], [0, 0, 1, 1], [], []>} : vector<4x4xbf16>, vector<4x512xbf16>, vector<4x512xf32> -> vector<4x512xf32>
    %52 = arith.addf %39, %51 : vector<4x512xf32>
    %c72_i32 = arith.constant 72 : i32
    %53 = tpu.dynamic_rotate %37 by %c72_i32 dim 1 : vector<8x512xf32>, i32 -> vector<8x512xf32>
    %c1 = arith.constant 1 : index
    %c0_25 = arith.constant 0 : index
    %54 = vector.load %arg3[%c1, %c0_25] : memref<27x512xf32, #tpu.memory_space<vmem>>, vector<1x512xf32>
    %55 = vector.broadcast %54 : vector<1x512xf32> to vector<8x512xf32>
    %56 = arith.mulf %53, %55 : vector<8x512xf32>
    %57 = arith.truncf %56 : vector<8x512xf32> to vector<8x512xbf16>
    %c8 = arith.constant 8 : index
    %c0_26 = arith.constant 0 : index
    %58 = vector.load %arg6[%c8, %c0_26] : memref<216x4xbf16, #tpu.memory_space<vmem>>, vector<4x4xbf16>
    %59 = vector.extract_strided_slice %57 {offsets = [0, 0], sizes = [4, 512], strides = [1, 1]} : vector<8x512xbf16> to vector<4x512xbf16>
    %cst_27 = arith.constant dense<0.000000e+00> : vector<4x512xf32>
    %60 = tpu.matmul %58, %59, %cst_27 {dimension_numbers = #tpu.dot_dimension_numbers<[1], [0], [0], [1], [0, 0, 1, 1], [], []>} : vector<4x4xbf16>, vector<4x512xbf16>, vector<4x512xf32> -> vector<4x512xf32>
    %61 = arith.addf %48, %60 : vector<4x512xf32>
    %c12 = arith.constant 12 : index
    %c0_28 = arith.constant 0 : index
    %62 = vector.load %arg6[%c12, %c0_28] : memref<216x4xbf16, #tpu.memory_space<vmem>>, vector<4x4xbf16>
    %63 = vector.extract_strided_slice %57 {offsets = [4, 0], sizes = [4, 512], strides = [1, 1]} : vector<8x512xbf16> to vector<4x512xbf16>
    %cst_29 = arith.constant dense<0.000000e+00> : vector<4x512xf32>
    %64 = tpu.matmul %62, %63, %cst_29 {dimension_numbers = #tpu.dot_dimension_numbers<[1], [0], [0], [1], [0, 0, 1, 1], [], []>} : vector<4x4xbf16>, vector<4x512xbf16>, vector<4x512xf32> -> vector<4x512xf32>
    %65 = arith.addf %52, %64 : vector<4x512xf32>
    %c71_i32 = arith.constant 71 : i32
    %66 = tpu.dynamic_rotate %37 by %c71_i32 dim 1 : vector<8x512xf32>, i32 -> vector<8x512xf32>
    %c2 = arith.constant 2 : index
    %c0_30 = arith.constant 0 : index
    %67 = vector.load %arg3[%c2, %c0_30] : memref<27x512xf32, #tpu.memory_space<vmem>>, vector<1x512xf32>
    %68 = vector.broadcast %67 : vector<1x512xf32> to vector<8x512xf32>
    %69 = arith.mulf %66, %68 : vector<8x512xf32>
    %70 = arith.truncf %69 : vector<8x512xf32> to vector<8x512xbf16>
    %c16 = arith.constant 16 : index
    %c0_31 = arith.constant 0 : index
    %71 = vector.load %arg6[%c16, %c0_31] : memref<216x4xbf16, #tpu.memory_space<vmem>>, vector<4x4xbf16>
    %72 = vector.extract_strided_slice %70 {offsets = [0, 0], sizes = [4, 512], strides = [1, 1]} : vector<8x512xbf16> to vector<4x512xbf16>
    %cst_32 = arith.constant dense<0.000000e+00> : vector<4x512xf32>
    %73 = tpu.matmul %71, %72, %cst_32 {dimension_numbers = #tpu.dot_dimension_numbers<[1], [0], [0], [1], [0, 0, 1, 1], [], []>} : vector<4x4xbf16>, vector<4x512xbf16>, vector<4x512xf32> -> vector<4x512xf32>
    %74 = arith.addf %61, %73 : vector<4x512xf32>
    %c20 = arith.constant 20 : index
    %c0_33 = arith.constant 0 : index
    %75 = vector.load %arg6[%c20, %c0_33] : memref<216x4xbf16, #tpu.memory_space<vmem>>, vector<4x4xbf16>
    %76 = vector.extract_strided_slice %70 {offsets = [4, 0], sizes = [4, 512], strides = [1, 1]} : vector<8x512xbf16> to vector<4x512xbf16>
    %cst_34 = arith.constant dense<0.000000e+00> : vector<4x512xf32>
    %77 = tpu.matmul %75, %76, %cst_34 {dimension_numbers = #tpu.dot_dimension_numbers<[1], [0], [0], [1], [0, 0, 1, 1], [], []>} : vector<4x4xbf16>, vector<4x512xbf16>, vector<4x512xf32> -> vector<4x512xf32>
    %78 = arith.addf %65, %77 : vector<4x512xf32>
    %c65_i32 = arith.constant 65 : i32
    %79 = tpu.dynamic_rotate %37 by %c65_i32 dim 1 : vector<8x512xf32>, i32 -> vector<8x512xf32>
    %c3 = arith.constant 3 : index
    %c0_35 = arith.constant 0 : index
    %80 = vector.load %arg3[%c3, %c0_35] : memref<27x512xf32, #tpu.memory_space<vmem>>, vector<1x512xf32>
    %81 = vector.broadcast %80 : vector<1x512xf32> to vector<8x512xf32>
    %82 = arith.mulf %79, %81 : vector<8x512xf32>
    %83 = arith.truncf %82 : vector<8x512xf32> to vector<8x512xbf16>
    %c24 = arith.constant 24 : index
    %c0_36 = arith.constant 0 : index
    %84 = vector.load %arg6[%c24, %c0_36] : memref<216x4xbf16, #tpu.memory_space<vmem>>, vector<4x4xbf16>
    %85 = vector.extract_strided_slice %83 {offsets = [0, 0], sizes = [4, 512], strides = [1, 1]} : vector<8x512xbf16> to vector<4x512xbf16>
    %cst_37 = arith.constant dense<0.000000e+00> : vector<4x512xf32>
    %86 = tpu.matmul %84, %85, %cst_37 {dimension_numbers = #tpu.dot_dimension_numbers<[1], [0], [0], [1], [0, 0, 1, 1], [], []>} : vector<4x4xbf16>, vector<4x512xbf16>, vector<4x512xf32> -> vector<4x512xf32>
    %87 = arith.addf %74, %86 : vector<4x512xf32>
    %c28 = arith.constant 28 : index
    %c0_38 = arith.constant 0 : index
    %88 = vector.load %arg6[%c28, %c0_38] : memref<216x4xbf16, #tpu.memory_space<vmem>>, vector<4x4xbf16>
    %89 = vector.extract_strided_slice %83 {offsets = [4, 0], sizes = [4, 512], strides = [1, 1]} : vector<8x512xbf16> to vector<4x512xbf16>
    %cst_39 = arith.constant dense<0.000000e+00> : vector<4x512xf32>
    %90 = tpu.matmul %88, %89, %cst_39 {dimension_numbers = #tpu.dot_dimension_numbers<[1], [0], [0], [1], [0, 0, 1, 1], [], []>} : vector<4x4xbf16>, vector<4x512xbf16>, vector<4x512xf32> -> vector<4x512xf32>
    %91 = arith.addf %78, %90 : vector<4x512xf32>
    %c64_i32 = arith.constant 64 : i32
    %92 = tpu.dynamic_rotate %37 by %c64_i32 dim 1 : vector<8x512xf32>, i32 -> vector<8x512xf32>
    %c4_40 = arith.constant 4 : index
    %c0_41 = arith.constant 0 : index
    %93 = vector.load %arg3[%c4_40, %c0_41] : memref<27x512xf32, #tpu.memory_space<vmem>>, vector<1x512xf32>
    %94 = vector.broadcast %93 : vector<1x512xf32> to vector<8x512xf32>
    %95 = arith.mulf %92, %94 : vector<8x512xf32>
    %96 = arith.truncf %95 : vector<8x512xf32> to vector<8x512xbf16>
    %c32 = arith.constant 32 : index
    %c0_42 = arith.constant 0 : index
    %97 = vector.load %arg6[%c32, %c0_42] : memref<216x4xbf16, #tpu.memory_space<vmem>>, vector<4x4xbf16>
    %98 = vector.extract_strided_slice %96 {offsets = [0, 0], sizes = [4, 512], strides = [1, 1]} : vector<8x512xbf16> to vector<4x512xbf16>
    %cst_43 = arith.constant dense<0.000000e+00> : vector<4x512xf32>
    %99 = tpu.matmul %97, %98, %cst_43 {dimension_numbers = #tpu.dot_dimension_numbers<[1], [0], [0], [1], [0, 0, 1, 1], [], []>} : vector<4x4xbf16>, vector<4x512xbf16>, vector<4x512xf32> -> vector<4x512xf32>
    %100 = arith.addf %87, %99 : vector<4x512xf32>
    %c36 = arith.constant 36 : index
    %c0_44 = arith.constant 0 : index
    %101 = vector.load %arg6[%c36, %c0_44] : memref<216x4xbf16, #tpu.memory_space<vmem>>, vector<4x4xbf16>
    %102 = vector.extract_strided_slice %96 {offsets = [4, 0], sizes = [4, 512], strides = [1, 1]} : vector<8x512xbf16> to vector<4x512xbf16>
    %cst_45 = arith.constant dense<0.000000e+00> : vector<4x512xf32>
    %103 = tpu.matmul %101, %102, %cst_45 {dimension_numbers = #tpu.dot_dimension_numbers<[1], [0], [0], [1], [0, 0, 1, 1], [], []>} : vector<4x4xbf16>, vector<4x512xbf16>, vector<4x512xf32> -> vector<4x512xf32>
    %104 = arith.addf %91, %103 : vector<4x512xf32>
    %c63_i32 = arith.constant 63 : i32
    %105 = tpu.dynamic_rotate %37 by %c63_i32 dim 1 : vector<8x512xf32>, i32 -> vector<8x512xf32>
    %c5 = arith.constant 5 : index
    %c0_46 = arith.constant 0 : index
    %106 = vector.load %arg3[%c5, %c0_46] : memref<27x512xf32, #tpu.memory_space<vmem>>, vector<1x512xf32>
    %107 = vector.broadcast %106 : vector<1x512xf32> to vector<8x512xf32>
    %108 = arith.mulf %105, %107 : vector<8x512xf32>
    %109 = arith.truncf %108 : vector<8x512xf32> to vector<8x512xbf16>
    %c40 = arith.constant 40 : index
    %c0_47 = arith.constant 0 : index
    %110 = vector.load %arg6[%c40, %c0_47] : memref<216x4xbf16, #tpu.memory_space<vmem>>, vector<4x4xbf16>
    %111 = vector.extract_strided_slice %109 {offsets = [0, 0], sizes = [4, 512], strides = [1, 1]} : vector<8x512xbf16> to vector<4x512xbf16>
    %cst_48 = arith.constant dense<0.000000e+00> : vector<4x512xf32>
    %112 = tpu.matmul %110, %111, %cst_48 {dimension_numbers = #tpu.dot_dimension_numbers<[1], [0], [0], [1], [0, 0, 1, 1], [], []>} : vector<4x4xbf16>, vector<4x512xbf16>, vector<4x512xf32> -> vector<4x512xf32>
    %113 = arith.addf %100, %112 : vector<4x512xf32>
    %c44 = arith.constant 44 : index
    %c0_49 = arith.constant 0 : index
    %114 = vector.load %arg6[%c44, %c0_49] : memref<216x4xbf16, #tpu.memory_space<vmem>>, vector<4x4xbf16>
    %115 = vector.extract_strided_slice %109 {offsets = [4, 0], sizes = [4, 512], strides = [1, 1]} : vector<8x512xbf16> to vector<4x512xbf16>
    %cst_50 = arith.constant dense<0.000000e+00> : vector<4x512xf32>
    %116 = tpu.matmul %114, %115, %cst_50 {dimension_numbers = #tpu.dot_dimension_numbers<[1], [0], [0], [1], [0, 0, 1, 1], [], []>} : vector<4x4xbf16>, vector<4x512xbf16>, vector<4x512xf32> -> vector<4x512xf32>
    %117 = arith.addf %104, %116 : vector<4x512xf32>
    %c57_i32 = arith.constant 57 : i32
    %118 = tpu.dynamic_rotate %37 by %c57_i32 dim 1 : vector<8x512xf32>, i32 -> vector<8x512xf32>
    %c6 = arith.constant 6 : index
    %c0_51 = arith.constant 0 : index
    %119 = vector.load %arg3[%c6, %c0_51] : memref<27x512xf32, #tpu.memory_space<vmem>>, vector<1x512xf32>
    %120 = vector.broadcast %119 : vector<1x512xf32> to vector<8x512xf32>
    %121 = arith.mulf %118, %120 : vector<8x512xf32>
    %122 = arith.truncf %121 : vector<8x512xf32> to vector<8x512xbf16>
    %c48 = arith.constant 48 : index
    %c0_52 = arith.constant 0 : index
    %123 = vector.load %arg6[%c48, %c0_52] : memref<216x4xbf16, #tpu.memory_space<vmem>>, vector<4x4xbf16>
    %124 = vector.extract_strided_slice %122 {offsets = [0, 0], sizes = [4, 512], strides = [1, 1]} : vector<8x512xbf16> to vector<4x512xbf16>
    %cst_53 = arith.constant dense<0.000000e+00> : vector<4x512xf32>
    %125 = tpu.matmul %123, %124, %cst_53 {dimension_numbers = #tpu.dot_dimension_numbers<[1], [0], [0], [1], [0, 0, 1, 1], [], []>} : vector<4x4xbf16>, vector<4x512xbf16>, vector<4x512xf32> -> vector<4x512xf32>
    %126 = arith.addf %113, %125 : vector<4x512xf32>
    %c52 = arith.constant 52 : index
    %c0_54 = arith.constant 0 : index
    %127 = vector.load %arg6[%c52, %c0_54] : memref<216x4xbf16, #tpu.memory_space<vmem>>, vector<4x4xbf16>
    %128 = vector.extract_strided_slice %122 {offsets = [4, 0], sizes = [4, 512], strides = [1, 1]} : vector<8x512xbf16> to vector<4x512xbf16>
    %cst_55 = arith.constant dense<0.000000e+00> : vector<4x512xf32>
    %129 = tpu.matmul %127, %128, %cst_55 {dimension_numbers = #tpu.dot_dimension_numbers<[1], [0], [0], [1], [0, 0, 1, 1], [], []>} : vector<4x4xbf16>, vector<4x512xbf16>, vector<4x512xf32> -> vector<4x512xf32>
    %130 = arith.addf %117, %129 : vector<4x512xf32>
    %c56_i32 = arith.constant 56 : i32
    %131 = tpu.dynamic_rotate %37 by %c56_i32 dim 1 : vector<8x512xf32>, i32 -> vector<8x512xf32>
    %c7 = arith.constant 7 : index
    %c0_56 = arith.constant 0 : index
    %132 = vector.load %arg3[%c7, %c0_56] : memref<27x512xf32, #tpu.memory_space<vmem>>, vector<1x512xf32>
    %133 = vector.broadcast %132 : vector<1x512xf32> to vector<8x512xf32>
    %134 = arith.mulf %131, %133 : vector<8x512xf32>
    %135 = arith.truncf %134 : vector<8x512xf32> to vector<8x512xbf16>
    %c56 = arith.constant 56 : index
    %c0_57 = arith.constant 0 : index
    %136 = vector.load %arg6[%c56, %c0_57] : memref<216x4xbf16, #tpu.memory_space<vmem>>, vector<4x4xbf16>
    %137 = vector.extract_strided_slice %135 {offsets = [0, 0], sizes = [4, 512], strides = [1, 1]} : vector<8x512xbf16> to vector<4x512xbf16>
    %cst_58 = arith.constant dense<0.000000e+00> : vector<4x512xf32>
    %138 = tpu.matmul %136, %137, %cst_58 {dimension_numbers = #tpu.dot_dimension_numbers<[1], [0], [0], [1], [0, 0, 1, 1], [], []>} : vector<4x4xbf16>, vector<4x512xbf16>, vector<4x512xf32> -> vector<4x512xf32>
    %139 = arith.addf %126, %138 : vector<4x512xf32>
    %c60 = arith.constant 60 : index
    %c0_59 = arith.constant 0 : index
    %140 = vector.load %arg6[%c60, %c0_59] : memref<216x4xbf16, #tpu.memory_space<vmem>>, vector<4x4xbf16>
    %141 = vector.extract_strided_slice %135 {offsets = [4, 0], sizes = [4, 512], strides = [1, 1]} : vector<8x512xbf16> to vector<4x512xbf16>
    %cst_60 = arith.constant dense<0.000000e+00> : vector<4x512xf32>
    %142 = tpu.matmul %140, %141, %cst_60 {dimension_numbers = #tpu.dot_dimension_numbers<[1], [0], [0], [1], [0, 0, 1, 1], [], []>} : vector<4x4xbf16>, vector<4x512xbf16>, vector<4x512xf32> -> vector<4x512xf32>
    %143 = arith.addf %130, %142 : vector<4x512xf32>
    %c55_i32 = arith.constant 55 : i32
    %144 = tpu.dynamic_rotate %37 by %c55_i32 dim 1 : vector<8x512xf32>, i32 -> vector<8x512xf32>
    %c8_61 = arith.constant 8 : index
    %c0_62 = arith.constant 0 : index
    %145 = vector.load %arg3[%c8_61, %c0_62] : memref<27x512xf32, #tpu.memory_space<vmem>>, vector<1x512xf32>
    %146 = vector.broadcast %145 : vector<1x512xf32> to vector<8x512xf32>
    %147 = arith.mulf %144, %146 : vector<8x512xf32>
    %148 = arith.truncf %147 : vector<8x512xf32> to vector<8x512xbf16>
    %c64 = arith.constant 64 : index
    %c0_63 = arith.constant 0 : index
    %149 = vector.load %arg6[%c64, %c0_63] : memref<216x4xbf16, #tpu.memory_space<vmem>>, vector<4x4xbf16>
    %150 = vector.extract_strided_slice %148 {offsets = [0, 0], sizes = [4, 512], strides = [1, 1]} : vector<8x512xbf16> to vector<4x512xbf16>
    %cst_64 = arith.constant dense<0.000000e+00> : vector<4x512xf32>
    %151 = tpu.matmul %149, %150, %cst_64 {dimension_numbers = #tpu.dot_dimension_numbers<[1], [0], [0], [1], [0, 0, 1, 1], [], []>} : vector<4x4xbf16>, vector<4x512xbf16>, vector<4x512xf32> -> vector<4x512xf32>
    %152 = arith.addf %139, %151 : vector<4x512xf32>
    %c68 = arith.constant 68 : index
    %c0_65 = arith.constant 0 : index
    %153 = vector.load %arg6[%c68, %c0_65] : memref<216x4xbf16, #tpu.memory_space<vmem>>, vector<4x4xbf16>
    %154 = vector.extract_strided_slice %148 {offsets = [4, 0], sizes = [4, 512], strides = [1, 1]} : vector<8x512xbf16> to vector<4x512xbf16>
    %cst_66 = arith.constant dense<0.000000e+00> : vector<4x512xf32>
    %155 = tpu.matmul %153, %154, %cst_66 {dimension_numbers = #tpu.dot_dimension_numbers<[1], [0], [0], [1], [0, 0, 1, 1], [], []>} : vector<4x4xbf16>, vector<4x512xbf16>, vector<4x512xf32> -> vector<4x512xf32>
    %156 = arith.addf %143, %155 : vector<4x512xf32>
    %c9_i32 = arith.constant 9 : i32
    %157 = tpu.dynamic_rotate %37 by %c9_i32 dim 1 : vector<8x512xf32>, i32 -> vector<8x512xf32>
    %c9 = arith.constant 9 : index
    %c0_67 = arith.constant 0 : index
    %158 = vector.load %arg3[%c9, %c0_67] : memref<27x512xf32, #tpu.memory_space<vmem>>, vector<1x512xf32>
    %159 = vector.broadcast %158 : vector<1x512xf32> to vector<8x512xf32>
    %160 = arith.mulf %157, %159 : vector<8x512xf32>
    %161 = arith.truncf %160 : vector<8x512xf32> to vector<8x512xbf16>
    %c72 = arith.constant 72 : index
    %c0_68 = arith.constant 0 : index
    %162 = vector.load %arg6[%c72, %c0_68] : memref<216x4xbf16, #tpu.memory_space<vmem>>, vector<4x4xbf16>
    %163 = vector.extract_strided_slice %161 {offsets = [0, 0], sizes = [4, 512], strides = [1, 1]} : vector<8x512xbf16> to vector<4x512xbf16>
    %cst_69 = arith.constant dense<0.000000e+00> : vector<4x512xf32>
    %164 = tpu.matmul %162, %163, %cst_69 {dimension_numbers = #tpu.dot_dimension_numbers<[1], [0], [0], [1], [0, 0, 1, 1], [], []>} : vector<4x4xbf16>, vector<4x512xbf16>, vector<4x512xf32> -> vector<4x512xf32>
    %165 = arith.addf %152, %164 : vector<4x512xf32>
    %c76 = arith.constant 76 : index
    %c0_70 = arith.constant 0 : index
    %166 = vector.load %arg6[%c76, %c0_70] : memref<216x4xbf16, #tpu.memory_space<vmem>>, vector<4x4xbf16>
    %167 = vector.extract_strided_slice %161 {offsets = [4, 0], sizes = [4, 512], strides = [1, 1]} : vector<8x512xbf16> to vector<4x512xbf16>
    %cst_71 = arith.constant dense<0.000000e+00> : vector<4x512xf32>
    %168 = tpu.matmul %166, %167, %cst_71 {dimension_numbers = #tpu.dot_dimension_numbers<[1], [0], [0], [1], [0, 0, 1, 1], [], []>} : vector<4x4xbf16>, vector<4x512xbf16>, vector<4x512xf32> -> vector<4x512xf32>
    %169 = arith.addf %156, %168 : vector<4x512xf32>
    %c8_i32 = arith.constant 8 : i32
    %170 = tpu.dynamic_rotate %37 by %c8_i32 dim 1 : vector<8x512xf32>, i32 -> vector<8x512xf32>
    %c10 = arith.constant 10 : index
    %c0_72 = arith.constant 0 : index
    %171 = vector.load %arg3[%c10, %c0_72] : memref<27x512xf32, #tpu.memory_space<vmem>>, vector<1x512xf32>
    %172 = vector.broadcast %171 : vector<1x512xf32> to vector<8x512xf32>
    %173 = arith.mulf %170, %172 : vector<8x512xf32>
    %174 = arith.truncf %173 : vector<8x512xf32> to vector<8x512xbf16>
    %c80 = arith.constant 80 : index
    %c0_73 = arith.constant 0 : index
    %175 = vector.load %arg6[%c80, %c0_73] : memref<216x4xbf16, #tpu.memory_space<vmem>>, vector<4x4xbf16>
    %176 = vector.extract_strided_slice %174 {offsets = [0, 0], sizes = [4, 512], strides = [1, 1]} : vector<8x512xbf16> to vector<4x512xbf16>
    %cst_74 = arith.constant dense<0.000000e+00> : vector<4x512xf32>
    %177 = tpu.matmul %175, %176, %cst_74 {dimension_numbers = #tpu.dot_dimension_numbers<[1], [0], [0], [1], [0, 0, 1, 1], [], []>} : vector<4x4xbf16>, vector<4x512xbf16>, vector<4x512xf32> -> vector<4x512xf32>
    %178 = arith.addf %165, %177 : vector<4x512xf32>
    %c84 = arith.constant 84 : index
    %c0_75 = arith.constant 0 : index
    %179 = vector.load %arg6[%c84, %c0_75] : memref<216x4xbf16, #tpu.memory_space<vmem>>, vector<4x4xbf16>
    %180 = vector.extract_strided_slice %174 {offsets = [4, 0], sizes = [4, 512], strides = [1, 1]} : vector<8x512xbf16> to vector<4x512xbf16>
    %cst_76 = arith.constant dense<0.000000e+00> : vector<4x512xf32>
    %181 = tpu.matmul %179, %180, %cst_76 {dimension_numbers = #tpu.dot_dimension_numbers<[1], [0], [0], [1], [0, 0, 1, 1], [], []>} : vector<4x4xbf16>, vector<4x512xbf16>, vector<4x512xf32> -> vector<4x512xf32>
    %182 = arith.addf %169, %181 : vector<4x512xf32>
    %c7_i32 = arith.constant 7 : i32
    %183 = tpu.dynamic_rotate %37 by %c7_i32 dim 1 : vector<8x512xf32>, i32 -> vector<8x512xf32>
    %c11 = arith.constant 11 : index
    %c0_77 = arith.constant 0 : index
    %184 = vector.load %arg3[%c11, %c0_77] : memref<27x512xf32, #tpu.memory_space<vmem>>, vector<1x512xf32>
    %185 = vector.broadcast %184 : vector<1x512xf32> to vector<8x512xf32>
    %186 = arith.mulf %183, %185 : vector<8x512xf32>
    %187 = arith.truncf %186 : vector<8x512xf32> to vector<8x512xbf16>
    %c88 = arith.constant 88 : index
    %c0_78 = arith.constant 0 : index
    %188 = vector.load %arg6[%c88, %c0_78] : memref<216x4xbf16, #tpu.memory_space<vmem>>, vector<4x4xbf16>
    %189 = vector.extract_strided_slice %187 {offsets = [0, 0], sizes = [4, 512], strides = [1, 1]} : vector<8x512xbf16> to vector<4x512xbf16>
    %cst_79 = arith.constant dense<0.000000e+00> : vector<4x512xf32>
    %190 = tpu.matmul %188, %189, %cst_79 {dimension_numbers = #tpu.dot_dimension_numbers<[1], [0], [0], [1], [0, 0, 1, 1], [], []>} : vector<4x4xbf16>, vector<4x512xbf16>, vector<4x512xf32> -> vector<4x512xf32>
    %191 = arith.addf %178, %190 : vector<4x512xf32>
    %c92 = arith.constant 92 : index
    %c0_80 = arith.constant 0 : index
    %192 = vector.load %arg6[%c92, %c0_80] : memref<216x4xbf16, #tpu.memory_space<vmem>>, vector<4x4xbf16>
    %193 = vector.extract_strided_slice %187 {offsets = [4, 0], sizes = [4, 512], strides = [1, 1]} : vector<8x512xbf16> to vector<4x512xbf16>
    %cst_81 = arith.constant dense<0.000000e+00> : vector<4x512xf32>
    %194 = tpu.matmul %192, %193, %cst_81 {dimension_numbers = #tpu.dot_dimension_numbers<[1], [0], [0], [1], [0, 0, 1, 1], [], []>} : vector<4x4xbf16>, vector<4x512xbf16>, vector<4x512xf32> -> vector<4x512xf32>
    %195 = arith.addf %182, %194 : vector<4x512xf32>
    %c1_i32 = arith.constant 1 : i32
    %196 = tpu.dynamic_rotate %37 by %c1_i32 dim 1 : vector<8x512xf32>, i32 -> vector<8x512xf32>
    %c12_82 = arith.constant 12 : index
    %c0_83 = arith.constant 0 : index
    %197 = vector.load %arg3[%c12_82, %c0_83] : memref<27x512xf32, #tpu.memory_space<vmem>>, vector<1x512xf32>
    %198 = vector.broadcast %197 : vector<1x512xf32> to vector<8x512xf32>
    %199 = arith.mulf %196, %198 : vector<8x512xf32>
    %200 = arith.truncf %199 : vector<8x512xf32> to vector<8x512xbf16>
    %c96 = arith.constant 96 : index
    %c0_84 = arith.constant 0 : index
    %201 = vector.load %arg6[%c96, %c0_84] : memref<216x4xbf16, #tpu.memory_space<vmem>>, vector<4x4xbf16>
    %202 = vector.extract_strided_slice %200 {offsets = [0, 0], sizes = [4, 512], strides = [1, 1]} : vector<8x512xbf16> to vector<4x512xbf16>
    %cst_85 = arith.constant dense<0.000000e+00> : vector<4x512xf32>
    %203 = tpu.matmul %201, %202, %cst_85 {dimension_numbers = #tpu.dot_dimension_numbers<[1], [0], [0], [1], [0, 0, 1, 1], [], []>} : vector<4x4xbf16>, vector<4x512xbf16>, vector<4x512xf32> -> vector<4x512xf32>
    %204 = arith.addf %191, %203 : vector<4x512xf32>
    %c100 = arith.constant 100 : index
    %c0_86 = arith.constant 0 : index
    %205 = vector.load %arg6[%c100, %c0_86] : memref<216x4xbf16, #tpu.memory_space<vmem>>, vector<4x4xbf16>
    %206 = vector.extract_strided_slice %200 {offsets = [4, 0], sizes = [4, 512], strides = [1, 1]} : vector<8x512xbf16> to vector<4x512xbf16>
    %cst_87 = arith.constant dense<0.000000e+00> : vector<4x512xf32>
    %207 = tpu.matmul %205, %206, %cst_87 {dimension_numbers = #tpu.dot_dimension_numbers<[1], [0], [0], [1], [0, 0, 1, 1], [], []>} : vector<4x4xbf16>, vector<4x512xbf16>, vector<4x512xf32> -> vector<4x512xf32>
    %208 = arith.addf %195, %207 : vector<4x512xf32>
    %209 = arith.truncf %37 : vector<8x512xf32> to vector<8x512xbf16>
    %c104 = arith.constant 104 : index
    %c0_88 = arith.constant 0 : index
    %210 = vector.load %arg6[%c104, %c0_88] : memref<216x4xbf16, #tpu.memory_space<vmem>>, vector<4x4xbf16>
    %211 = vector.extract_strided_slice %209 {offsets = [0, 0], sizes = [4, 512], strides = [1, 1]} : vector<8x512xbf16> to vector<4x512xbf16>
    %cst_89 = arith.constant dense<0.000000e+00> : vector<4x512xf32>
    %212 = tpu.matmul %210, %211, %cst_89 {dimension_numbers = #tpu.dot_dimension_numbers<[1], [0], [0], [1], [0, 0, 1, 1], [], []>} : vector<4x4xbf16>, vector<4x512xbf16>, vector<4x512xf32> -> vector<4x512xf32>
    %213 = arith.addf %204, %212 : vector<4x512xf32>
    %c108 = arith.constant 108 : index
    %c0_90 = arith.constant 0 : index
    %214 = vector.load %arg6[%c108, %c0_90] : memref<216x4xbf16, #tpu.memory_space<vmem>>, vector<4x4xbf16>
    %215 = vector.extract_strided_slice %209 {offsets = [4, 0], sizes = [4, 512], strides = [1, 1]} : vector<8x512xbf16> to vector<4x512xbf16>
    %cst_91 = arith.constant dense<0.000000e+00> : vector<4x512xf32>
    %216 = tpu.matmul %214, %215, %cst_91 {dimension_numbers = #tpu.dot_dimension_numbers<[1], [0], [0], [1], [0, 0, 1, 1], [], []>} : vector<4x4xbf16>, vector<4x512xbf16>, vector<4x512xf32> -> vector<4x512xf32>
    %217 = arith.addf %208, %216 : vector<4x512xf32>
    %c511_i32 = arith.constant 511 : i32
    %218 = tpu.dynamic_rotate %37 by %c511_i32 dim 1 : vector<8x512xf32>, i32 -> vector<8x512xf32>
    %c14 = arith.constant 14 : index
    %c0_92 = arith.constant 0 : index
    %219 = vector.load %arg3[%c14, %c0_92] : memref<27x512xf32, #tpu.memory_space<vmem>>, vector<1x512xf32>
    %220 = vector.broadcast %219 : vector<1x512xf32> to vector<8x512xf32>
    %221 = arith.mulf %218, %220 : vector<8x512xf32>
    %222 = arith.truncf %221 : vector<8x512xf32> to vector<8x512xbf16>
    %c112 = arith.constant 112 : index
    %c0_93 = arith.constant 0 : index
    %223 = vector.load %arg6[%c112, %c0_93] : memref<216x4xbf16, #tpu.memory_space<vmem>>, vector<4x4xbf16>
    %224 = vector.extract_strided_slice %222 {offsets = [0, 0], sizes = [4, 512], strides = [1, 1]} : vector<8x512xbf16> to vector<4x512xbf16>
    %cst_94 = arith.constant dense<0.000000e+00> : vector<4x512xf32>
    %225 = tpu.matmul %223, %224, %cst_94 {dimension_numbers = #tpu.dot_dimension_numbers<[1], [0], [0], [1], [0, 0, 1, 1], [], []>} : vector<4x4xbf16>, vector<4x512xbf16>, vector<4x512xf32> -> vector<4x512xf32>
    %226 = arith.addf %213, %225 : vector<4x512xf32>
    %c116 = arith.constant 116 : index
    %c0_95 = arith.constant 0 : index
    %227 = vector.load %arg6[%c116, %c0_95] : memref<216x4xbf16, #tpu.memory_space<vmem>>, vector<4x4xbf16>
    %228 = vector.extract_strided_slice %222 {offsets = [4, 0], sizes = [4, 512], strides = [1, 1]} : vector<8x512xbf16> to vector<4x512xbf16>
    %cst_96 = arith.constant dense<0.000000e+00> : vector<4x512xf32>
    %229 = tpu.matmul %227, %228, %cst_96 {dimension_numbers = #tpu.dot_dimension_numbers<[1], [0], [0], [1], [0, 0, 1, 1], [], []>} : vector<4x4xbf16>, vector<4x512xbf16>, vector<4x512xf32> -> vector<4x512xf32>
    %230 = arith.addf %217, %229 : vector<4x512xf32>
    %c505_i32 = arith.constant 505 : i32
    %231 = tpu.dynamic_rotate %37 by %c505_i32 dim 1 : vector<8x512xf32>, i32 -> vector<8x512xf32>
    %c15 = arith.constant 15 : index
    %c0_97 = arith.constant 0 : index
    %232 = vector.load %arg3[%c15, %c0_97] : memref<27x512xf32, #tpu.memory_space<vmem>>, vector<1x512xf32>
    %233 = vector.broadcast %232 : vector<1x512xf32> to vector<8x512xf32>
    %234 = arith.mulf %231, %233 : vector<8x512xf32>
    %235 = arith.truncf %234 : vector<8x512xf32> to vector<8x512xbf16>
    %c120 = arith.constant 120 : index
    %c0_98 = arith.constant 0 : index
    %236 = vector.load %arg6[%c120, %c0_98] : memref<216x4xbf16, #tpu.memory_space<vmem>>, vector<4x4xbf16>
    %237 = vector.extract_strided_slice %235 {offsets = [0, 0], sizes = [4, 512], strides = [1, 1]} : vector<8x512xbf16> to vector<4x512xbf16>
    %cst_99 = arith.constant dense<0.000000e+00> : vector<4x512xf32>
    %238 = tpu.matmul %236, %237, %cst_99 {dimension_numbers = #tpu.dot_dimension_numbers<[1], [0], [0], [1], [0, 0, 1, 1], [], []>} : vector<4x4xbf16>, vector<4x512xbf16>, vector<4x512xf32> -> vector<4x512xf32>
    %239 = arith.addf %226, %238 : vector<4x512xf32>
    %c124 = arith.constant 124 : index
    %c0_100 = arith.constant 0 : index
    %240 = vector.load %arg6[%c124, %c0_100] : memref<216x4xbf16, #tpu.memory_space<vmem>>, vector<4x4xbf16>
    %241 = vector.extract_strided_slice %235 {offsets = [4, 0], sizes = [4, 512], strides = [1, 1]} : vector<8x512xbf16> to vector<4x512xbf16>
    %cst_101 = arith.constant dense<0.000000e+00> : vector<4x512xf32>
    %242 = tpu.matmul %240, %241, %cst_101 {dimension_numbers = #tpu.dot_dimension_numbers<[1], [0], [0], [1], [0, 0, 1, 1], [], []>} : vector<4x4xbf16>, vector<4x512xbf16>, vector<4x512xf32> -> vector<4x512xf32>
    %243 = arith.addf %230, %242 : vector<4x512xf32>
    %c504_i32 = arith.constant 504 : i32
    %244 = tpu.dynamic_rotate %37 by %c504_i32 dim 1 : vector<8x512xf32>, i32 -> vector<8x512xf32>
    %c16_102 = arith.constant 16 : index
    %c0_103 = arith.constant 0 : index
    %245 = vector.load %arg3[%c16_102, %c0_103] : memref<27x512xf32, #tpu.memory_space<vmem>>, vector<1x512xf32>
    %246 = vector.broadcast %245 : vector<1x512xf32> to vector<8x512xf32>
    %247 = arith.mulf %244, %246 : vector<8x512xf32>
    %248 = arith.truncf %247 : vector<8x512xf32> to vector<8x512xbf16>
    %c128 = arith.constant 128 : index
    %c0_104 = arith.constant 0 : index
    %249 = vector.load %arg6[%c128, %c0_104] : memref<216x4xbf16, #tpu.memory_space<vmem>>, vector<4x4xbf16>
    %250 = vector.extract_strided_slice %248 {offsets = [0, 0], sizes = [4, 512], strides = [1, 1]} : vector<8x512xbf16> to vector<4x512xbf16>
    %cst_105 = arith.constant dense<0.000000e+00> : vector<4x512xf32>
    %251 = tpu.matmul %249, %250, %cst_105 {dimension_numbers = #tpu.dot_dimension_numbers<[1], [0], [0], [1], [0, 0, 1, 1], [], []>} : vector<4x4xbf16>, vector<4x512xbf16>, vector<4x512xf32> -> vector<4x512xf32>
    %252 = arith.addf %239, %251 : vector<4x512xf32>
    %c132 = arith.constant 132 : index
    %c0_106 = arith.constant 0 : index
    %253 = vector.load %arg6[%c132, %c0_106] : memref<216x4xbf16, #tpu.memory_space<vmem>>, vector<4x4xbf16>
    %254 = vector.extract_strided_slice %248 {offsets = [4, 0], sizes = [4, 512], strides = [1, 1]} : vector<8x512xbf16> to vector<4x512xbf16>
    %cst_107 = arith.constant dense<0.000000e+00> : vector<4x512xf32>
    %255 = tpu.matmul %253, %254, %cst_107 {dimension_numbers = #tpu.dot_dimension_numbers<[1], [0], [0], [1], [0, 0, 1, 1], [], []>} : vector<4x4xbf16>, vector<4x512xbf16>, vector<4x512xf32> -> vector<4x512xf32>
    %256 = arith.addf %243, %255 : vector<4x512xf32>
    %c503_i32 = arith.constant 503 : i32
    %257 = tpu.dynamic_rotate %37 by %c503_i32 dim 1 : vector<8x512xf32>, i32 -> vector<8x512xf32>
    %c17 = arith.constant 17 : index
    %c0_108 = arith.constant 0 : index
    %258 = vector.load %arg3[%c17, %c0_108] : memref<27x512xf32, #tpu.memory_space<vmem>>, vector<1x512xf32>
    %259 = vector.broadcast %258 : vector<1x512xf32> to vector<8x512xf32>
    %260 = arith.mulf %257, %259 : vector<8x512xf32>
    %261 = arith.truncf %260 : vector<8x512xf32> to vector<8x512xbf16>
    %c136 = arith.constant 136 : index
    %c0_109 = arith.constant 0 : index
    %262 = vector.load %arg6[%c136, %c0_109] : memref<216x4xbf16, #tpu.memory_space<vmem>>, vector<4x4xbf16>
    %263 = vector.extract_strided_slice %261 {offsets = [0, 0], sizes = [4, 512], strides = [1, 1]} : vector<8x512xbf16> to vector<4x512xbf16>
    %cst_110 = arith.constant dense<0.000000e+00> : vector<4x512xf32>
    %264 = tpu.matmul %262, %263, %cst_110 {dimension_numbers = #tpu.dot_dimension_numbers<[1], [0], [0], [1], [0, 0, 1, 1], [], []>} : vector<4x4xbf16>, vector<4x512xbf16>, vector<4x512xf32> -> vector<4x512xf32>
    %265 = arith.addf %252, %264 : vector<4x512xf32>
    %c140 = arith.constant 140 : index
    %c0_111 = arith.constant 0 : index
    %266 = vector.load %arg6[%c140, %c0_111] : memref<216x4xbf16, #tpu.memory_space<vmem>>, vector<4x4xbf16>
    %267 = vector.extract_strided_slice %261 {offsets = [4, 0], sizes = [4, 512], strides = [1, 1]} : vector<8x512xbf16> to vector<4x512xbf16>
    %cst_112 = arith.constant dense<0.000000e+00> : vector<4x512xf32>
    %268 = tpu.matmul %266, %267, %cst_112 {dimension_numbers = #tpu.dot_dimension_numbers<[1], [0], [0], [1], [0, 0, 1, 1], [], []>} : vector<4x4xbf16>, vector<4x512xbf16>, vector<4x512xf32> -> vector<4x512xf32>
    %269 = arith.addf %256, %268 : vector<4x512xf32>
    %c457_i32 = arith.constant 457 : i32
    %270 = tpu.dynamic_rotate %37 by %c457_i32 dim 1 : vector<8x512xf32>, i32 -> vector<8x512xf32>
    %c18 = arith.constant 18 : index
    %c0_113 = arith.constant 0 : index
    %271 = vector.load %arg3[%c18, %c0_113] : memref<27x512xf32, #tpu.memory_space<vmem>>, vector<1x512xf32>
    %272 = vector.broadcast %271 : vector<1x512xf32> to vector<8x512xf32>
    %273 = arith.mulf %270, %272 : vector<8x512xf32>
    %274 = arith.truncf %273 : vector<8x512xf32> to vector<8x512xbf16>
    %c144 = arith.constant 144 : index
    %c0_114 = arith.constant 0 : index
    %275 = vector.load %arg6[%c144, %c0_114] : memref<216x4xbf16, #tpu.memory_space<vmem>>, vector<4x4xbf16>
    %276 = vector.extract_strided_slice %274 {offsets = [0, 0], sizes = [4, 512], strides = [1, 1]} : vector<8x512xbf16> to vector<4x512xbf16>
    %cst_115 = arith.constant dense<0.000000e+00> : vector<4x512xf32>
    %277 = tpu.matmul %275, %276, %cst_115 {dimension_numbers = #tpu.dot_dimension_numbers<[1], [0], [0], [1], [0, 0, 1, 1], [], []>} : vector<4x4xbf16>, vector<4x512xbf16>, vector<4x512xf32> -> vector<4x512xf32>
    %278 = arith.addf %265, %277 : vector<4x512xf32>
    %c148 = arith.constant 148 : index
    %c0_116 = arith.constant 0 : index
    %279 = vector.load %arg6[%c148, %c0_116] : memref<216x4xbf16, #tpu.memory_space<vmem>>, vector<4x4xbf16>
    %280 = vector.extract_strided_slice %274 {offsets = [4, 0], sizes = [4, 512], strides = [1, 1]} : vector<8x512xbf16> to vector<4x512xbf16>
    %cst_117 = arith.constant dense<0.000000e+00> : vector<4x512xf32>
    %281 = tpu.matmul %279, %280, %cst_117 {dimension_numbers = #tpu.dot_dimension_numbers<[1], [0], [0], [1], [0, 0, 1, 1], [], []>} : vector<4x4xbf16>, vector<4x512xbf16>, vector<4x512xf32> -> vector<4x512xf32>
    %282 = arith.addf %269, %281 : vector<4x512xf32>
    %c456_i32 = arith.constant 456 : i32
    %283 = tpu.dynamic_rotate %37 by %c456_i32 dim 1 : vector<8x512xf32>, i32 -> vector<8x512xf32>
    %c19 = arith.constant 19 : index
    %c0_118 = arith.constant 0 : index
    %284 = vector.load %arg3[%c19, %c0_118] : memref<27x512xf32, #tpu.memory_space<vmem>>, vector<1x512xf32>
    %285 = vector.broadcast %284 : vector<1x512xf32> to vector<8x512xf32>
    %286 = arith.mulf %283, %285 : vector<8x512xf32>
    %287 = arith.truncf %286 : vector<8x512xf32> to vector<8x512xbf16>
    %c152 = arith.constant 152 : index
    %c0_119 = arith.constant 0 : index
    %288 = vector.load %arg6[%c152, %c0_119] : memref<216x4xbf16, #tpu.memory_space<vmem>>, vector<4x4xbf16>
    %289 = vector.extract_strided_slice %287 {offsets = [0, 0], sizes = [4, 512], strides = [1, 1]} : vector<8x512xbf16> to vector<4x512xbf16>
    %cst_120 = arith.constant dense<0.000000e+00> : vector<4x512xf32>
    %290 = tpu.matmul %288, %289, %cst_120 {dimension_numbers = #tpu.dot_dimension_numbers<[1], [0], [0], [1], [0, 0, 1, 1], [], []>} : vector<4x4xbf16>, vector<4x512xbf16>, vector<4x512xf32> -> vector<4x512xf32>
    %291 = arith.addf %278, %290 : vector<4x512xf32>
    %c156 = arith.constant 156 : index
    %c0_121 = arith.constant 0 : index
    %292 = vector.load %arg6[%c156, %c0_121] : memref<216x4xbf16, #tpu.memory_space<vmem>>, vector<4x4xbf16>
    %293 = vector.extract_strided_slice %287 {offsets = [4, 0], sizes = [4, 512], strides = [1, 1]} : vector<8x512xbf16> to vector<4x512xbf16>
    %cst_122 = arith.constant dense<0.000000e+00> : vector<4x512xf32>
    %294 = tpu.matmul %292, %293, %cst_122 {dimension_numbers = #tpu.dot_dimension_numbers<[1], [0], [0], [1], [0, 0, 1, 1], [], []>} : vector<4x4xbf16>, vector<4x512xbf16>, vector<4x512xf32> -> vector<4x512xf32>
    %295 = arith.addf %282, %294 : vector<4x512xf32>
    %c455_i32 = arith.constant 455 : i32
    %296 = tpu.dynamic_rotate %37 by %c455_i32 dim 1 : vector<8x512xf32>, i32 -> vector<8x512xf32>
    %c20_123 = arith.constant 20 : index
    %c0_124 = arith.constant 0 : index
    %297 = vector.load %arg3[%c20_123, %c0_124] : memref<27x512xf32, #tpu.memory_space<vmem>>, vector<1x512xf32>
    %298 = vector.broadcast %297 : vector<1x512xf32> to vector<8x512xf32>
    %299 = arith.mulf %296, %298 : vector<8x512xf32>
    %300 = arith.truncf %299 : vector<8x512xf32> to vector<8x512xbf16>
    %c160 = arith.constant 160 : index
    %c0_125 = arith.constant 0 : index
    %301 = vector.load %arg6[%c160, %c0_125] : memref<216x4xbf16, #tpu.memory_space<vmem>>, vector<4x4xbf16>
    %302 = vector.extract_strided_slice %300 {offsets = [0, 0], sizes = [4, 512], strides = [1, 1]} : vector<8x512xbf16> to vector<4x512xbf16>
    %cst_126 = arith.constant dense<0.000000e+00> : vector<4x512xf32>
    %303 = tpu.matmul %301, %302, %cst_126 {dimension_numbers = #tpu.dot_dimension_numbers<[1], [0], [0], [1], [0, 0, 1, 1], [], []>} : vector<4x4xbf16>, vector<4x512xbf16>, vector<4x512xf32> -> vector<4x512xf32>
    %304 = arith.addf %291, %303 : vector<4x512xf32>
    %c164 = arith.constant 164 : index
    %c0_127 = arith.constant 0 : index
    %305 = vector.load %arg6[%c164, %c0_127] : memref<216x4xbf16, #tpu.memory_space<vmem>>, vector<4x4xbf16>
    %306 = vector.extract_strided_slice %300 {offsets = [4, 0], sizes = [4, 512], strides = [1, 1]} : vector<8x512xbf16> to vector<4x512xbf16>
    %cst_128 = arith.constant dense<0.000000e+00> : vector<4x512xf32>
    %307 = tpu.matmul %305, %306, %cst_128 {dimension_numbers = #tpu.dot_dimension_numbers<[1], [0], [0], [1], [0, 0, 1, 1], [], []>} : vector<4x4xbf16>, vector<4x512xbf16>, vector<4x512xf32> -> vector<4x512xf32>
    %308 = arith.addf %295, %307 : vector<4x512xf32>
    %c449_i32 = arith.constant 449 : i32
    %309 = tpu.dynamic_rotate %37 by %c449_i32 dim 1 : vector<8x512xf32>, i32 -> vector<8x512xf32>
    %c21 = arith.constant 21 : index
    %c0_129 = arith.constant 0 : index
    %310 = vector.load %arg3[%c21, %c0_129] : memref<27x512xf32, #tpu.memory_space<vmem>>, vector<1x512xf32>
    %311 = vector.broadcast %310 : vector<1x512xf32> to vector<8x512xf32>
    %312 = arith.mulf %309, %311 : vector<8x512xf32>
    %313 = arith.truncf %312 : vector<8x512xf32> to vector<8x512xbf16>
    %c168 = arith.constant 168 : index
    %c0_130 = arith.constant 0 : index
    %314 = vector.load %arg6[%c168, %c0_130] : memref<216x4xbf16, #tpu.memory_space<vmem>>, vector<4x4xbf16>
    %315 = vector.extract_strided_slice %313 {offsets = [0, 0], sizes = [4, 512], strides = [1, 1]} : vector<8x512xbf16> to vector<4x512xbf16>
    %cst_131 = arith.constant dense<0.000000e+00> : vector<4x512xf32>
    %316 = tpu.matmul %314, %315, %cst_131 {dimension_numbers = #tpu.dot_dimension_numbers<[1], [0], [0], [1], [0, 0, 1, 1], [], []>} : vector<4x4xbf16>, vector<4x512xbf16>, vector<4x512xf32> -> vector<4x512xf32>
    %317 = arith.addf %304, %316 : vector<4x512xf32>
    %c172 = arith.constant 172 : index
    %c0_132 = arith.constant 0 : index
    %318 = vector.load %arg6[%c172, %c0_132] : memref<216x4xbf16, #tpu.memory_space<vmem>>, vector<4x4xbf16>
    %319 = vector.extract_strided_slice %313 {offsets = [4, 0], sizes = [4, 512], strides = [1, 1]} : vector<8x512xbf16> to vector<4x512xbf16>
    %cst_133 = arith.constant dense<0.000000e+00> : vector<4x512xf32>
    %320 = tpu.matmul %318, %319, %cst_133 {dimension_numbers = #tpu.dot_dimension_numbers<[1], [0], [0], [1], [0, 0, 1, 1], [], []>} : vector<4x4xbf16>, vector<4x512xbf16>, vector<4x512xf32> -> vector<4x512xf32>
    %321 = arith.addf %308, %320 : vector<4x512xf32>
    %c448_i32 = arith.constant 448 : i32
    %322 = tpu.dynamic_rotate %37 by %c448_i32 dim 1 : vector<8x512xf32>, i32 -> vector<8x512xf32>
    %c22 = arith.constant 22 : index
    %c0_134 = arith.constant 0 : index
    %323 = vector.load %arg3[%c22, %c0_134] : memref<27x512xf32, #tpu.memory_space<vmem>>, vector<1x512xf32>
    %324 = vector.broadcast %323 : vector<1x512xf32> to vector<8x512xf32>
    %325 = arith.mulf %322, %324 : vector<8x512xf32>
    %326 = arith.truncf %325 : vector<8x512xf32> to vector<8x512xbf16>
    %c176 = arith.constant 176 : index
    %c0_135 = arith.constant 0 : index
    %327 = vector.load %arg6[%c176, %c0_135] : memref<216x4xbf16, #tpu.memory_space<vmem>>, vector<4x4xbf16>
    %328 = vector.extract_strided_slice %326 {offsets = [0, 0], sizes = [4, 512], strides = [1, 1]} : vector<8x512xbf16> to vector<4x512xbf16>
    %cst_136 = arith.constant dense<0.000000e+00> : vector<4x512xf32>
    %329 = tpu.matmul %327, %328, %cst_136 {dimension_numbers = #tpu.dot_dimension_numbers<[1], [0], [0], [1], [0, 0, 1, 1], [], []>} : vector<4x4xbf16>, vector<4x512xbf16>, vector<4x512xf32> -> vector<4x512xf32>
    %330 = arith.addf %317, %329 : vector<4x512xf32>
    %c180 = arith.constant 180 : index
    %c0_137 = arith.constant 0 : index
    %331 = vector.load %arg6[%c180, %c0_137] : memref<216x4xbf16, #tpu.memory_space<vmem>>, vector<4x4xbf16>
    %332 = vector.extract_strided_slice %326 {offsets = [4, 0], sizes = [4, 512], strides = [1, 1]} : vector<8x512xbf16> to vector<4x512xbf16>
    %cst_138 = arith.constant dense<0.000000e+00> : vector<4x512xf32>
    %333 = tpu.matmul %331, %332, %cst_138 {dimension_numbers = #tpu.dot_dimension_numbers<[1], [0], [0], [1], [0, 0, 1, 1], [], []>} : vector<4x4xbf16>, vector<4x512xbf16>, vector<4x512xf32> -> vector<4x512xf32>
    %334 = arith.addf %321, %333 : vector<4x512xf32>
    %c447_i32 = arith.constant 447 : i32
    %335 = tpu.dynamic_rotate %37 by %c447_i32 dim 1 : vector<8x512xf32>, i32 -> vector<8x512xf32>
    %c23 = arith.constant 23 : index
    %c0_139 = arith.constant 0 : index
    %336 = vector.load %arg3[%c23, %c0_139] : memref<27x512xf32, #tpu.memory_space<vmem>>, vector<1x512xf32>
    %337 = vector.broadcast %336 : vector<1x512xf32> to vector<8x512xf32>
    %338 = arith.mulf %335, %337 : vector<8x512xf32>
    %339 = arith.truncf %338 : vector<8x512xf32> to vector<8x512xbf16>
    %c184 = arith.constant 184 : index
    %c0_140 = arith.constant 0 : index
    %340 = vector.load %arg6[%c184, %c0_140] : memref<216x4xbf16, #tpu.memory_space<vmem>>, vector<4x4xbf16>
    %341 = vector.extract_strided_slice %339 {offsets = [0, 0], sizes = [4, 512], strides = [1, 1]} : vector<8x512xbf16> to vector<4x512xbf16>
    %cst_141 = arith.constant dense<0.000000e+00> : vector<4x512xf32>
    %342 = tpu.matmul %340, %341, %cst_141 {dimension_numbers = #tpu.dot_dimension_numbers<[1], [0], [0], [1], [0, 0, 1, 1], [], []>} : vector<4x4xbf16>, vector<4x512xbf16>, vector<4x512xf32> -> vector<4x512xf32>
    %343 = arith.addf %330, %342 : vector<4x512xf32>
    %c188 = arith.constant 188 : index
    %c0_142 = arith.constant 0 : index
    %344 = vector.load %arg6[%c188, %c0_142] : memref<216x4xbf16, #tpu.memory_space<vmem>>, vector<4x4xbf16>
    %345 = vector.extract_strided_slice %339 {offsets = [4, 0], sizes = [4, 512], strides = [1, 1]} : vector<8x512xbf16> to vector<4x512xbf16>
    %cst_143 = arith.constant dense<0.000000e+00> : vector<4x512xf32>
    %346 = tpu.matmul %344, %345, %cst_143 {dimension_numbers = #tpu.dot_dimension_numbers<[1], [0], [0], [1], [0, 0, 1, 1], [], []>} : vector<4x4xbf16>, vector<4x512xbf16>, vector<4x512xf32> -> vector<4x512xf32>
    %347 = arith.addf %334, %346 : vector<4x512xf32>
    %c441_i32 = arith.constant 441 : i32
    %348 = tpu.dynamic_rotate %37 by %c441_i32 dim 1 : vector<8x512xf32>, i32 -> vector<8x512xf32>
    %c24_144 = arith.constant 24 : index
    %c0_145 = arith.constant 0 : index
    %349 = vector.load %arg3[%c24_144, %c0_145] : memref<27x512xf32, #tpu.memory_space<vmem>>, vector<1x512xf32>
    %350 = vector.broadcast %349 : vector<1x512xf32> to vector<8x512xf32>
    %351 = arith.mulf %348, %350 : vector<8x512xf32>
    %352 = arith.truncf %351 : vector<8x512xf32> to vector<8x512xbf16>
    %c192 = arith.constant 192 : index
    %c0_146 = arith.constant 0 : index
    %353 = vector.load %arg6[%c192, %c0_146] : memref<216x4xbf16, #tpu.memory_space<vmem>>, vector<4x4xbf16>
    %354 = vector.extract_strided_slice %352 {offsets = [0, 0], sizes = [4, 512], strides = [1, 1]} : vector<8x512xbf16> to vector<4x512xbf16>
    %cst_147 = arith.constant dense<0.000000e+00> : vector<4x512xf32>
    %355 = tpu.matmul %353, %354, %cst_147 {dimension_numbers = #tpu.dot_dimension_numbers<[1], [0], [0], [1], [0, 0, 1, 1], [], []>} : vector<4x4xbf16>, vector<4x512xbf16>, vector<4x512xf32> -> vector<4x512xf32>
    %356 = arith.addf %343, %355 : vector<4x512xf32>
    %c196 = arith.constant 196 : index
    %c0_148 = arith.constant 0 : index
    %357 = vector.load %arg6[%c196, %c0_148] : memref<216x4xbf16, #tpu.memory_space<vmem>>, vector<4x4xbf16>
    %358 = vector.extract_strided_slice %352 {offsets = [4, 0], sizes = [4, 512], strides = [1, 1]} : vector<8x512xbf16> to vector<4x512xbf16>
    %cst_149 = arith.constant dense<0.000000e+00> : vector<4x512xf32>
    %359 = tpu.matmul %357, %358, %cst_149 {dimension_numbers = #tpu.dot_dimension_numbers<[1], [0], [0], [1], [0, 0, 1, 1], [], []>} : vector<4x4xbf16>, vector<4x512xbf16>, vector<4x512xf32> -> vector<4x512xf32>
    %360 = arith.addf %347, %359 : vector<4x512xf32>
    %c440_i32 = arith.constant 440 : i32
    %361 = tpu.dynamic_rotate %37 by %c440_i32 dim 1 : vector<8x512xf32>, i32 -> vector<8x512xf32>
    %c25 = arith.constant 25 : index
    %c0_150 = arith.constant 0 : index
    %362 = vector.load %arg3[%c25, %c0_150] : memref<27x512xf32, #tpu.memory_space<vmem>>, vector<1x512xf32>
    %363 = vector.broadcast %362 : vector<1x512xf32> to vector<8x512xf32>
    %364 = arith.mulf %361, %363 : vector<8x512xf32>
    %365 = arith.truncf %364 : vector<8x512xf32> to vector<8x512xbf16>
    %c200 = arith.constant 200 : index
    %c0_151 = arith.constant 0 : index
    %366 = vector.load %arg6[%c200, %c0_151] : memref<216x4xbf16, #tpu.memory_space<vmem>>, vector<4x4xbf16>
    %367 = vector.extract_strided_slice %365 {offsets = [0, 0], sizes = [4, 512], strides = [1, 1]} : vector<8x512xbf16> to vector<4x512xbf16>
    %cst_152 = arith.constant dense<0.000000e+00> : vector<4x512xf32>
    %368 = tpu.matmul %366, %367, %cst_152 {dimension_numbers = #tpu.dot_dimension_numbers<[1], [0], [0], [1], [0, 0, 1, 1], [], []>} : vector<4x4xbf16>, vector<4x512xbf16>, vector<4x512xf32> -> vector<4x512xf32>
    %369 = arith.addf %356, %368 : vector<4x512xf32>
    %c204 = arith.constant 204 : index
    %c0_153 = arith.constant 0 : index
    %370 = vector.load %arg6[%c204, %c0_153] : memref<216x4xbf16, #tpu.memory_space<vmem>>, vector<4x4xbf16>
    %371 = vector.extract_strided_slice %365 {offsets = [4, 0], sizes = [4, 512], strides = [1, 1]} : vector<8x512xbf16> to vector<4x512xbf16>
    %cst_154 = arith.constant dense<0.000000e+00> : vector<4x512xf32>
    %372 = tpu.matmul %370, %371, %cst_154 {dimension_numbers = #tpu.dot_dimension_numbers<[1], [0], [0], [1], [0, 0, 1, 1], [], []>} : vector<4x4xbf16>, vector<4x512xbf16>, vector<4x512xf32> -> vector<4x512xf32>
    %373 = arith.addf %360, %372 : vector<4x512xf32>
    %c439_i32 = arith.constant 439 : i32
    %374 = tpu.dynamic_rotate %37 by %c439_i32 dim 1 : vector<8x512xf32>, i32 -> vector<8x512xf32>
    %c26 = arith.constant 26 : index
    %c0_155 = arith.constant 0 : index
    %375 = vector.load %arg3[%c26, %c0_155] : memref<27x512xf32, #tpu.memory_space<vmem>>, vector<1x512xf32>
    %376 = vector.broadcast %375 : vector<1x512xf32> to vector<8x512xf32>
    %377 = arith.mulf %374, %376 : vector<8x512xf32>
    %378 = arith.truncf %377 : vector<8x512xf32> to vector<8x512xbf16>
    %c208 = arith.constant 208 : index
    %c0_156 = arith.constant 0 : index
    %379 = vector.load %arg6[%c208, %c0_156] : memref<216x4xbf16, #tpu.memory_space<vmem>>, vector<4x4xbf16>
    %380 = vector.extract_strided_slice %378 {offsets = [0, 0], sizes = [4, 512], strides = [1, 1]} : vector<8x512xbf16> to vector<4x512xbf16>
    %cst_157 = arith.constant dense<0.000000e+00> : vector<4x512xf32>
    %381 = tpu.matmul %379, %380, %cst_157 {dimension_numbers = #tpu.dot_dimension_numbers<[1], [0], [0], [1], [0, 0, 1, 1], [], []>} : vector<4x4xbf16>, vector<4x512xbf16>, vector<4x512xf32> -> vector<4x512xf32>
    %382 = arith.addf %369, %381 : vector<4x512xf32>
    %c212 = arith.constant 212 : index
    %c0_158 = arith.constant 0 : index
    %383 = vector.load %arg6[%c212, %c0_158] : memref<216x4xbf16, #tpu.memory_space<vmem>>, vector<4x4xbf16>
    %384 = vector.extract_strided_slice %378 {offsets = [4, 0], sizes = [4, 512], strides = [1, 1]} : vector<8x512xbf16> to vector<4x512xbf16>
    %cst_159 = arith.constant dense<0.000000e+00> : vector<4x512xf32>
    %385 = tpu.matmul %383, %384, %cst_159 {dimension_numbers = #tpu.dot_dimension_numbers<[1], [0], [0], [1], [0, 0, 1, 1], [], []>} : vector<4x4xbf16>, vector<4x512xbf16>, vector<4x512xf32> -> vector<4x512xf32>
    %386 = arith.addf %373, %385 : vector<4x512xf32>
    %387 = tpu.concatenate %382, %386 in 0 : vector<4x512xf32>, vector<4x512xf32> -> vector<8x512xf32>
    %c0_160 = arith.constant 0 : index
    %c0_161 = arith.constant 0 : index
    %388 = vector.load %arg7[%c0_160, %c0_161] : memref<8x1xf32, #tpu.memory_space<vmem>>, vector<8x1xf32>
    %389 = vector.broadcast %388 : vector<8x1xf32> to vector<8x512xf32>
    %390 = arith.addf %387, %389 : vector<8x512xf32>
    %c0_162 = arith.constant 0 : index
    %c0_163 = arith.constant 0 : index
    %391 = vector.load %arg8[%c0_162, %c0_163] : memref<8x1xf32, #tpu.memory_space<vmem>>, vector<8x1xf32>
    %c0_164 = arith.constant 0 : index
    %c0_165 = arith.constant 0 : index
    %392 = vector.load %arg9[%c0_164, %c0_165] : memref<8x1xf32, #tpu.memory_space<vmem>>, vector<8x1xf32>
    %cst_166 = arith.constant dense<0.000000e+00> : vector<8xf32>
    %393 = vector.multi_reduction <add>, %390, %cst_166 [1] : vector<8x512xf32> to vector<8xf32>
    %394 = vector.shape_cast %393 : vector<8xf32> to vector<8x1xf32>
    %395 = arith.mulf %390, %390 : vector<8x512xf32>
    %cst_167 = arith.constant dense<0.000000e+00> : vector<8xf32>
    %396 = vector.multi_reduction <add>, %395, %cst_167 [1] : vector<8x512xf32> to vector<8xf32>
    %397 = vector.shape_cast %396 : vector<8xf32> to vector<8x1xf32>
    %cst_168 = arith.constant dense<0.000000e+00> : vector<8x1xf32>
    %398 = tpu.matmul %2, %394, %cst_168 {dimension_numbers = #tpu.dot_dimension_numbers<[1], [0], [0], [1], [0, 0, 1, 1], [], []>} : vector<8x8xf32>, vector<8x1xf32>, vector<8x1xf32> -> vector<8x1xf32>
    %cst_169 = arith.constant dense<0.000000e+00> : vector<8x1xf32>
    %399 = tpu.matmul %2, %397, %cst_169 {dimension_numbers = #tpu.dot_dimension_numbers<[1], [0], [0], [1], [0, 0, 1, 1], [], []>} : vector<8x8xf32>, vector<8x1xf32>, vector<8x1xf32> -> vector<8x1xf32>
    %400 = arith.mulf %398, %398 : vector<8x1xf32>
    %401 = arith.subf %399, %400 : vector<8x1xf32>
    %402 = vector.broadcast %398 : vector<8x1xf32> to vector<8x512xf32>
    %403 = arith.subf %390, %402 : vector<8x512xf32>
    %cst_170 = arith.constant 9.99999974E-6 : f32
    %404 = vector.broadcast %cst_170 : f32 to vector<8x1xf32>
    %405 = arith.addf %401, %404 : vector<8x1xf32>
    %406 = math.rsqrt %405 : vector<8x1xf32>
    %407 = vector.broadcast %406 : vector<8x1xf32> to vector<8x512xf32>
    %408 = arith.mulf %403, %407 : vector<8x512xf32>
    %409 = vector.broadcast %391 : vector<8x1xf32> to vector<8x512xf32>
    %410 = arith.mulf %408, %409 : vector<8x512xf32>
    %411 = vector.broadcast %392 : vector<8x1xf32> to vector<8x512xf32>
    %412 = arith.addf %410, %411 : vector<8x512xf32>
    %cst_171 = arith.constant 5.000000e-01 : f32
    %413 = vector.broadcast %cst_171 : f32 to vector<8x512xf32>
    %414 = arith.mulf %413, %412 : vector<8x512xf32>
    %cst_172 = arith.constant 4.471500e-02 : f32
    %415 = vector.broadcast %cst_172 : f32 to vector<8x512xf32>
    %416 = arith.mulf %415, %412 : vector<8x512xf32>
    %417 = arith.mulf %416, %412 : vector<8x512xf32>
    %418 = arith.mulf %417, %412 : vector<8x512xf32>
    %419 = arith.addf %412, %418 : vector<8x512xf32>
    %cst_173 = arith.constant 0.797884583 : f32
    %420 = vector.broadcast %cst_173 : f32 to vector<8x512xf32>
    %421 = arith.mulf %420, %419 : vector<8x512xf32>
    %422 = math.tanh %421 : vector<8x512xf32>
    %cst_174 = arith.constant 1.000000e+00 : f32
    %423 = vector.broadcast %cst_174 : f32 to vector<8x512xf32>
    %424 = arith.addf %423, %422 : vector<8x512xf32>
    %425 = arith.mulf %414, %424 : vector<8x512xf32>
    %c0_175 = arith.constant 0 : index
    %c0_176 = arith.constant 0 : index
    %426 = vector.load %arg10[%c0_175, %c0_176] : memref<8x8xbf16, #tpu.memory_space<vmem>>, vector<8x8xbf16>
    %427 = arith.truncf %425 : vector<8x512xf32> to vector<8x512xbf16>
    %cst_177 = arith.constant dense<0.000000e+00> : vector<8x512xf32>
    %428 = tpu.matmul %426, %427, %cst_177 {dimension_numbers = #tpu.dot_dimension_numbers<[1], [0], [0], [1], [0, 0, 1, 1], [], []>} : vector<8x8xbf16>, vector<8x512xbf16>, vector<8x512xf32> -> vector<8x512xf32>
    %c0_178 = arith.constant 0 : index
    %c0_179 = arith.constant 0 : index
    %429 = vector.load %arg11[%c0_178, %c0_179] : memref<8x1xf32, #tpu.memory_space<vmem>>, vector<8x1xf32>
    %430 = vector.broadcast %429 : vector<8x1xf32> to vector<8x512xf32>
    %431 = arith.addf %428, %430 : vector<8x512xf32>
    %c0_180 = arith.constant 0 : index
    %c0_181 = arith.constant 0 : index
    %432 = vector.load %arg12[%c0_180, %c0_181] : memref<8x1xf32, #tpu.memory_space<vmem>>, vector<8x1xf32>
    %433 = vector.broadcast %432 : vector<8x1xf32> to vector<8x512xf32>
    %434 = arith.mulf %433, %431 : vector<8x512xf32>
    %435 = arith.addf %1, %434 : vector<8x512xf32>
    %c0_182 = arith.constant 0 : index
    %c0_183 = arith.constant 0 : index
    %c0_184 = arith.constant 0 : index
    %436 = vector.load %arg13[%c0_182, %c0_183, %c0_184] : memref<1x8x512xf32, #tpu.memory_space<vmem>>, vector<1x8x512xf32>
    %437 = vector.shape_cast %436 : vector<1x8x512xf32> to vector<8x512xf32>
    %438 = vector.shape_cast %435 : vector<8x512xf32> to vector<1x8x512xf32>
    tpu.vector_store %arg13[%c0_182, %c0_183, %c0_184], %438 {strides = array<i32>} : memref<1x8x512xf32, #tpu.memory_space<vmem>>, vector<1x8x512xf32>,
    return
  }
  func.func @transform_0(%arg0: i32) -> (i32, i32, i32) {
    %c0_i32 = arith.constant 0 : i32
    %c0_i32_0 = arith.constant 0 : i32
    %c0_i32_1 = arith.constant 0 : i32
    return %arg0, %c0_i32, %c0_i32_0 : i32, i32, i32
  }
  func.func @transform_1(%arg0: i32) -> (i32, i32) {
    %c0_i32 = arith.constant 0 : i32
    %c0_i32_0 = arith.constant 0 : i32
    %c0_i32_1 = arith.constant 0 : i32
    return %c0_i32, %c0_i32_0 : i32, i32
  }
  func.func @transform_2(%arg0: i32) -> (i32, i32) {
    %c0_i32 = arith.constant 0 : i32
    %c0_i32_0 = arith.constant 0 : i32
    %c0_i32_1 = arith.constant 0 : i32
    return %c0_i32, %c0_i32_0 : i32, i32
  }
  func.func @transform_3(%arg0: i32) -> (i32, i32) {
    %c0_i32 = arith.constant 0 : i32
    %c0_i32_0 = arith.constant 0 : i32
    %c0_i32_1 = arith.constant 0 : i32
    return %c0_i32, %c0_i32_0 : i32, i32
  }
  func.func @transform_4(%arg0: i32) -> (i32, i32) {
    %c0_i32 = arith.constant 0 : i32
    %c0_i32_0 = arith.constant 0 : i32
    %c0_i32_1 = arith.constant 0 : i32
    return %c0_i32, %c0_i32_0 : i32, i32
  }
  func.func @transform_5(%arg0: i32) -> (i32, i32) {
    %c0_i32 = arith.constant 0 : i32
    %c0_i32_0 = arith.constant 0 : i32
    %c0_i32_1 = arith.constant 0 : i32
    return %c0_i32, %c0_i32_0 : i32, i32
  }
  func.func @transform_6(%arg0: i32) -> (i32, i32) {
    %c0_i32 = arith.constant 0 : i32
    %c0_i32_0 = arith.constant 0 : i32
    %c0_i32_1 = arith.constant 0 : i32
    return %c0_i32, %c0_i32_0 : i32, i32
  }
  func.func @transform_7(%arg0: i32) -> (i32, i32) {
    %c0_i32 = arith.constant 0 : i32
    %c0_i32_0 = arith.constant 0 : i32
    %c0_i32_1 = arith.constant 0 : i32
    return %c0_i32, %c0_i32_0 : i32, i32
  }
  func.func @transform_8(%arg0: i32) -> (i32, i32) {
    %c0_i32 = arith.constant 0 : i32
    %c0_i32_0 = arith.constant 0 : i32
    %c0_i32_1 = arith.constant 0 : i32
    return %c0_i32, %c0_i32_0 : i32, i32
  }
  func.func @transform_9(%arg0: i32) -> (i32, i32) {
    %c0_i32 = arith.constant 0 : i32
    %c0_i32_0 = arith.constant 0 : i32
    %c0_i32_1 = arith.constant 0 : i32
    return %c0_i32, %c0_i32_0 : i32, i32
  }
  func.func @transform_10(%arg0: i32) -> (i32, i32) {
    %c0_i32 = arith.constant 0 : i32
    %c0_i32_0 = arith.constant 0 : i32
    %c0_i32_1 = arith.constant 0 : i32
    return %c0_i32, %c0_i32_0 : i32, i32
  }
  func.func @transform_11(%arg0: i32) -> (i32, i32) {
    %c0_i32 = arith.constant 0 : i32
    %c0_i32_0 = arith.constant 0 : i32
    %c0_i32_1 = arith.constant 0 : i32
    return %c0_i32, %c0_i32_0 : i32, i32
  }
  func.func @transform_12(%arg0: i32) -> (i32, i32, i32) {
    %c0_i32 = arith.constant 0 : i32
    %c0_i32_0 = arith.constant 0 : i32
    %c0_i32_1 = arith.constant 0 : i32
    return %arg0, %c0_i32, %c0_i32_0 : i32, i32, i32
  }
}

</mosaic_0001>

<bundles_post_ra>
// kernel: res_conv_block_forward.1
= control target key start
LH: loop header
LB: loop body
LE: loop exit
PB: predicated region body
PF: predicated region fallthrough
CT: control target
= control target key end

     0   :  { %s8854_s21 = smov 0   ;;  %s10151_s0 = inlined_call_operand.vmem [shape: f32[2,8,512], index: 0, kind: input, shape index: {}]   ;;  %s10152_s1 = inlined_call_operand.vmem [shape: f32[8,8], index: 1, kind: input, shape index: {}]   ;;  %s10153_s2 = inlined_call_operand.vmem [shape: f32[27,512], index: 2, kind: input, shape index: {}]   ;;  %s10154_s3 = inlined_call_operand.vmem [shape: f32[8,1], index: 3, kind: input, shape index: {}]   ;;  %s10155_s4 = inlined_call_operand.vmem [shape: f32[8,1], index: 4, kind: input, shape index: {}]   ;;  %s10156_s5 = inlined_call_operand.vmem [shape: bf16[216,4], index: 5, kind: input, shape index: {}]   ;;  %s10157_s6 = inlined_call_operand.vmem [shape: f32[8,1], index: 6, kind: input, shape index: {}]   ;;  %s10158_s7 = inlined_call_operand.vmem [shape: f32[8,1], index: 7, kind: input, shape index: {}]   ;;  %s10159_s8 = inlined_call_operand.vmem [shape: f32[8,1], index: 8, kind: input, shape index: {}]   ;;  %s10160_s9 = inlined_call_operand.vmem [shape: bf16[8,8], index: 9, kind: input, shape index: {}]   ;;  %s10161_s10 = inlined_call_operand.vmem [shape: f32[8,1], index: 10, kind: input, shape index: {}]   ;;  %s10162_s11 = inlined_call_operand.vmem [shape: f32[8,1], index: 11, kind: input, shape index: {}]   ;;  %s10163_s12 = inlined_call_operand.vmem [shape: f32[2,8,512], index: 12, kind: output, shape index: {}]  }
   0x1 LB: > { %s7946_s22 = sadd.s32 4294967295, %s8767_s21   ;;  %p7950_p0 = scmp.ge.s32.totalorder %s8767_s21, 1  ;;  %s8767_s21 = sphi %s8854_s21, %s22_s21  }
   0x2   : > { %p362_p1 = scmp.lt.s32.totalorder %s8767_s21, 3 }
   0x4   : > { %p363_p2 = pnand %p7950_p0, %p362_p1 }
   0x6   : > { %366 = sbr.rel (%p363_p2) target bundleno = 2113 (0x841), region = 68 }
   0xd   : > { %p404_p3 = scmp.lt.s32.totalorder %s7946_s22, 1  ;;  %v10164_v0 = vmov 0.0   ;;  %vm8770_vm0 = vmmov 0   ;;  %v419_v15 = vld [vmem:[%s10152_s1] sm:$0xff]  ;;  %vm436_vm1 = vcmask 64512   ;;  %v10168_v18 = vmov 0  }
   0xe   : > { %8243 = vmatprep.subr.mxu0 %v10164_v0  ;;  %8248 = vmatprep.subr.mxu1 %v10164_v0  ;;  %v420_v19 = vld [vmem:[%s10154_s3] sm:$0xff]  ;;  %s8772_s15 = smov 72   ;;  %s8773_s16 = smov 71   ;;  %vm752_vm3 = vcmask 1041408   ;;  %vm748_vm4 = vcmask 31744  }
   0xf   : > { %s10180_s22 = smov (!%p404_p3, %s7946_s22), 1  ;;  %8245 = vmatprep.mubr.msk.f32.mxu0 %vm8770_vm0, %v10164_v0  ;;  %8250 = vmatprep.mubr.msk.f32.mxu1 %vm8770_vm0, %v10164_v0  ;;  %v421_v28 = vld [vmem:[%s10155_s4] sm:$0xff]  ;;  %s8774_s17 = smov 65  }
  0x10   : > { %s8233_s23 = sshll.u32 %s10180_s22, 5  ;;  %8708 = vset.pattern.permute.xlu1 %v10168_v18  ;;  %8707 = vset.pattern.permute.xlu0 %v10168_v18  ;;  %s8775_s18 = smov 64  }
  0x11   : > { %s8872_s26 = scalar_lea.vmem %s10151_s0, %s8233_s23  ;;  %s8776_s19 = smov 73  }
  0x12   : > { %v415_v1 = vld [vmem:[%s8872_s26] sm:$0xff]  ;;  %v416_v2 = vld [vmem:[%s8872_s26 + $0x8] sm:$0xff]  ;;  %v417_v3 = vld [vmem:[%s8872_s26 + $0x10] sm:$0xff]  ;;  %s8777_s20 = smov 63   ;;  %s8778_s24 = smov 57  }
  0x13   : > { %v418_v4 = vld [vmem:[%s8872_s26 + $0x18] sm:$0xff]  ;;  %v422_v5 = vadd.f32 %v416_v2, %v415_v1  ;;  %v427_v6 = vmul.f32 %v415_v1, %v415_v1  ;;  %v428_v7 = vmul.f32 %v416_v2, %v416_v2  ;;  %v429_v8 = vmul.f32 %v417_v3, %v417_v3  ;;  %s8779_s25 = smov 56   ;;  %s8780_s27 = smov 55  }
  0x14   : > { %v430_v10 = vmul.f32 %v418_v4, %v418_v4  ;;  %s8781_s28 = smov 9   ;;  %s8782_s29 = smov 8  }
  0x15   : > { %v423_v9 = vadd.f32 %v422_v5, %v417_v3  ;;  %v431_v11 = vadd.f32 %v428_v7, %v427_v6  ;;  %s8783_s30 = smov 7   ;;  %s8784_s13 = smov 1  }
  0x16   : > { %s8785_s14 = smov 127  }
  0x17   : > { %v424_v12 = vadd.f32 %v423_v9, %v418_v4  ;;  %v432_v13 = vadd.f32 %v431_v11, %v429_v8 }
  0x19   : > { %425 = vadd.xlane.f32.xlu0 %v424_v12  ;;  %v433_v14 = vadd.f32 %v432_v13, %v430_v10 }
  0x1d   : > { %434 = vadd.xlane.f32.xlu0 %v433_v14 }
  0x33   : > { %604 = vperm.xlu0 %8707, %v420_v19  }
  0xa6   : > { %v426_v16 = vpop.xlane.xlu0 %425 }
  0xa7   : > { %8244 = vmatpush3.msra.mxu0 %v426_v16 }
  0xa8   : > { %8246 = vmatmul.mubr.msk.f32.vlgmr.msra.gmra.mrb[0].mxu0 %vm436_vm1, %v419_v15 }
  0xa9   : > { %797 = vmatprep.mubr.bf16.mxu0 %v10168_v18 }
  0xaa   : > { %v435_v17 = vpop.xlane.xlu0 %434 }
  0xab   : > { %8249 = vmatpush3.msra.mxu1 %v435_v17 }
  0xac   : > { %8251 = vmatmul.mubr.msk.f32.vlgmr.msra.gmra.mrb[0].mxu1 %vm436_vm1, %v419_v15 }
  0xad   : > { %838 = vmatprep.mubr.bf16.mxu1 %v10168_v18 }
  0xb2   : > { %v605_v35 = vpop.permute.xlu0 %604 }
 0x17b   : > { %v506_v20 = vpop.f32.mrb[0].mxu0 }
 0x17c   : > { %v580_v21 = vmul.f32 %v506_v20, %v506_v20  ;;  %v8247_v22 = vpop.f32.mrb[1].mxu0  ;;  %584 = vperm.xlu1 %8708, %v506_v20  }
 0x17f   : > { %v576_v23 = vpop.f32.mrb[0].mxu1 }
 0x180   : > { %v581_v24 = vsub.f32 %v576_v23, %v580_v21  ;;  %v8252_v25 = vpop.f32.mrb[1].mxu1  ;;  %v664_v23 = vlaneseq }
 0x182   : > { %v591_v26 = vadd.f32 1e-05, %v581_v24  ;;  %v674_v24 = vshrl.u32 %v664_v23, 7  ;;  %v8975_v25 = vand.u32 127, %v664_v23 }
 0x184   : > { %8736 = vrsqrt.f32 %v591_v26  ;;  %v8977_v26 = vsub.s32 1, %v674_v24  ;;  %vm711_vm2 = vcmp.lt.s32.totalorder %v8975_v25, 72  ;;  %vm666_vm5 = vcmp.lt.s32.totalorder %v8975_v25, 73 }
 0x185   : > { %vm1171_vm6 = vcmp.lt.s32.totalorder %v8975_v25, 71  ;;  %vm1431_vm7 = vcmp.lt.s32.totalorder %v8975_v25, 65  ;;  %vm1691_vm8 = vcmp.lt.s32.totalorder %v8975_v25, 64  ;;  %vm1951_vm9 = vcmp.lt.s32.totalorder %v8975_v25, 63 }
 0x186   : > { %vm2211_vm10 = vcmp.lt.s32.totalorder %v8975_v25, 57  ;;  %vm2471_vm11 = vcmp.lt.s32.totalorder %v8975_v25, 56  ;;  %vm2731_vm12 = vcmp.lt.s32.totalorder %v8975_v25, 55  ;;  %vm2991_vm13 = vcmp.lt.s32.totalorder %v8975_v25, 9 }
 0x187   : > { %vm3251_vm14 = vcmp.lt.s32.totalorder %v8975_v25, 8  ;;  %vm3511_vm15 = vcmp.lt.s32.totalorder %v8975_v25, 7 }
 0x18e   : > { %v8737_v27 = vpop.eup %8736 }
 0x18f   : > { %595 = vperm.xlu1 %8708, %v8737_v27   ;;  %v7957_v27 = vld [vmem:[%s10153_s2 + $0x1] ss:$8 sm:$0xf] }
 0x193   : > { %613 = vperm.xlu1 %8708, %v421_v28  }
 0x1fb   : > { %v585_v29 = vpop.permute.xlu1 %584 }
 0x1fc   : > { %v587_v30 = vsub.f32 %v415_v1, %v585_v29  ;;  %v588_v31 = vsub.f32 %v416_v2, %v585_v29  ;;  %v589_v32 = vsub.f32 %v417_v3, %v585_v29  ;;  %v590_v33 = vsub.f32 %v418_v4, %v585_v29  ;;  %v7523_v29 = vld [vmem:[%s10157_s6] sm:$0xff] }
 0x20e   : > { %v596_v34 = vpop.permute.xlu1 %595 }
 0x20f   : > { %v598_v36 = vmul.f32 %v596_v34, %v587_v30  ;;  %v599_v37 = vmul.f32 %v596_v34, %v588_v31  ;;  %v600_v38 = vmul.f32 %v596_v34, %v589_v32  ;;  %v601_v39 = vmul.f32 %v596_v34, %v590_v33 }
 0x210   : > { %v726_v30 = vrot.slane %v7957_v27, %v8977_v26  ;;  %v8991_v31 = vsub.s32 0, %v674_v24 }
 0x211   : > { %v607_v40 = vmul.f32 %v605_v35, %v598_v36  ;;  %v608_v41 = vmul.f32 %v605_v35, %v599_v37  ;;  %v609_v42 = vmul.f32 %v605_v35, %v600_v38  ;;  %v610_v43 = vmul.f32 %v605_v35, %v601_v39 }
 0x212   : > { %v614_v44 = vpop.permute.xlu1 %613  ;;  %v722_v35 = vrot.slane %v7957_v27, %v8991_v31  ;;  %v9001_v36 = vsub.s32 2, %v674_v24  ;;  %v9005_v38 = vsub.s32 3, %v674_v24 }
 0x213   : > { %v616_v45 = vadd.f32 %v614_v44, %v607_v40  ;;  %v617_v46 = vadd.f32 %v614_v44, %v608_v41  ;;  %v618_v47 = vadd.f32 %v614_v44, %v609_v42  ;;  %v619_v48 = vadd.f32 %v614_v44, %v610_v43 }
 0x214   : > { %v730_v42 = vrot.slane %v7957_v27, %v9001_v36  ;;  %v734_v43 = vrot.slane %v7957_v27, %v9005_v38  ;;  %v7976_v27 = vld [vmem:[%s10153_s2 + $0x2] ss:$8 sm:$0xf] }
 0x215   : > { %v624_v49 = vmul.f32 0.044715, %v616_v45  ;;  %v625_v50 = vmul.f32 0.044715, %v617_v46  ;;  %v626_v51 = vmul.f32 0.044715, %v618_v47 }
 0x216   : > { %v627_v52 = vmul.f32 0.044715, %v619_v48  ;;  %v620_v8 = vmul.f32 0.5, %v616_v45  ;;  %v623_v13 = vmul.f32 0.5, %v619_v48  ;;  %v621_v15 = vmul.f32 0.5, %v617_v46 }
 0x217   : > { %v628_v53 = vmul.f32 %v624_v49, %v616_v45  ;;  %v629_v54 = vmul.f32 %v625_v50, %v617_v46  ;;  %v630_v55 = vmul.f32 %v626_v51, %v618_v47  ;;  %v622_v21 = vmul.f32 0.5, %v618_v47  ;;  %v671_v50 = vld [vmem:[%s10153_s2] ss:$8 sm:$0xf] }
 0x218   : > { %v631_v56 = vmul.f32 %v627_v52, %v619_v48 }
 0x219   : > { %v632_v57 = vmul.f32 %v628_v53, %v616_v45  ;;  %v633_v58 = vmul.f32 %v629_v54, %v617_v46  ;;  %v634_v60 = vmul.f32 %v630_v55, %v618_v47  ;;  %v747_v55 = vld [vmem:[%s10156_s5 + $0x4] sm:$0x3] }
 0x21a   : > { %v635_v59 = vmul.f32 %v631_v56, %v619_v48 }
 0x21b   : > { %v636_v61 = vadd.f32 %v632_v57, %v616_v45  ;;  %v637_v62 = vadd.f32 %v633_v58, %v617_v46  ;;  %v638_v4 = vadd.f32 %v634_v60, %v618_v47  ;;  %v680_v57 = vrot.slane %v671_v50, %v8977_v26 }
 0x21c   : > { %v639_v63 = vadd.f32 %v635_v59, %v619_v48 }
 0x21d   : > { %v640_v1 = vmul.f32 0.7978846, %v636_v61  ;;  %v641_v2 = vmul.f32 0.7978846, %v637_v62  ;;  %v642_v5 = vmul.f32 0.7978846, %v638_v4  ;;  %v676_v61 = vrot.slane %v671_v50, %v8991_v31 }
 0x21e   : > { %v643_v3 = vmul.f32 0.7978846, %v639_v63  ;;  %v688_v4 = vrot.slane %v671_v50, %v9005_v38 }
 0x21f   : > { %8738 = vtanh.f32 %v640_v1 }
 0x220   : > { %8740 = vtanh.f32 %v641_v2 }
 0x221   : > { %8742 = vtanh.f32 %v643_v3  ;;  %v684_v3 = vrot.slane %v671_v50, %v9001_v36 }
 0x222   : > { %8744 = vtanh.f32 %v642_v5 }
 0x229   : > { %v8739_v6 = vpop.eup %8738 }
 0x22a   : > { %v8741_v7 = vpop.eup %8740  ;;  %v648_v9 = vadd.f32 1.0, %v8739_v6 }
 0x22b   : > { %v8743_v10 = vpop.eup %8742  ;;  %v649_v11 = vadd.f32 1.0, %v8741_v7 }
 0x22c   : > { %v8897_v12 = vmul.f32 %v648_v9, %v620_v8  ;;  %v651_v14 = vadd.f32 1.0, %v8743_v10  ;;  %v8745_v19 = vpop.eup %8744 }
 0x22d   : > { %v8902_v17 = vmul.f32 %v649_v11, %v621_v15  ;;  %v650_v20 = vadd.f32 1.0, %v8745_v19 }
 0x22e   : > { %703 = vrot.lane.b32.xlu1 %v8897_v12, %s8772_s15  ;;  %v8900_v16 = vmul.f32 %v651_v14, %v623_v13 }
 0x22f   : > { %v8909_v22 = vmul.f32 %v650_v20, %v622_v21  ;;  %v701_v21 = vld [vmem:[%s10156_s5] sm:$0x3] }
 0x230   : > { %1169 = vrot.lane.b32.xlu0 %v8900_v16, %s8773_s16 }
 0x232   : > { %705 = vrot.lane.b32.xlu1 %v8902_v17, %s8772_s15 }
 0x234   : > { %1423 = vrot.lane.b32.xlu0 %v8897_v12, %s8774_s17 }
 0x236   : > { %709 = vrot.lane.b32.xlu1 %v8900_v16, %s8772_s15 }
 0x238   : > { %1429 = vrot.lane.b32.xlu0 %v8900_v16, %s8774_s17 }
 0x23a   : > { %707 = vrot.lane.b32.xlu1 %v8909_v22, %s8772_s15  ;;  %s8786_s15 = smov 121  }
 0x23c   : > { %1683 = vrot.lane.b32.xlu0 %v8897_v12, %s8775_s18 }
 0x23e   : > { %656 = vrot.lane.b32.xlu1 %v8897_v12, %s8776_s19 }
 0x240   : > { %1689 = vrot.lane.b32.xlu0 %v8900_v16, %s8775_s18 }
 0x242   : > { %658 = vrot.lane.b32.xlu1 %v8902_v17, %s8776_s19 }
 0x244   : > { %1943 = vrot.lane.b32.xlu0 %v8897_v12, %s8777_s20 }
 0x246   : > { %662 = vrot.lane.b32.xlu1 %v8900_v16, %s8776_s19 }
 0x248   : > { %1949 = vrot.lane.b32.xlu0 %v8900_v16, %s8777_s20 }
 0x24a   : > { %660 = vrot.lane.b32.xlu1 %v8909_v22, %s8776_s19 }
 0x24c   : > { %2203 = vrot.lane.b32.xlu0 %v8897_v12, %s8778_s24 }
 0x24e   : > { %1163 = vrot.lane.b32.xlu1 %v8897_v12, %s8773_s16 }
 0x250   : > { %2209 = vrot.lane.b32.xlu0 %v8900_v16, %s8778_s24 }
 0x252   : > { %1165 = vrot.lane.b32.xlu1 %v8902_v17, %s8773_s16 }
 0x254   : > { %2463 = vrot.lane.b32.xlu0 %v8897_v12, %s8779_s25 }
 0x256   : > { %1167 = vrot.lane.b32.xlu1 %v8909_v22, %s8773_s16  ;;  %s8787_s16 = smov 120  }
 0x258   : > { %2469 = vrot.lane.b32.xlu0 %v8900_v16, %s8779_s25 }
 0x25a   : > { %1425 = vrot.lane.b32.xlu1 %v8902_v17, %s8774_s17 }
 0x25c   : > { %2723 = vrot.lane.b32.xlu0 %v8897_v12, %s8780_s27 }
 0x25e   : > { %1427 = vrot.lane.b32.xlu1 %v8909_v22, %s8774_s17  ;;  %s8788_s17 = smov 119  }
 0x260   : > { %2729 = vrot.lane.b32.xlu0 %v8900_v16, %s8780_s27 }
 0x262   : > { %1685 = vrot.lane.b32.xlu1 %v8902_v17, %s8775_s18 }
 0x264   : > { %2983 = vrot.lane.b32.xlu0 %v8897_v12, %s8781_s28 }
 0x266   : > { %1687 = vrot.lane.b32.xlu1 %v8909_v22, %s8775_s18 }
 0x268   : > { %2989 = vrot.lane.b32.xlu0 %v8900_v16, %s8781_s28 }
 0x26a   : > { %1945 = vrot.lane.b32.xlu1 %v8902_v17, %s8777_s20 }
 0x26c   : > { %3243 = vrot.lane.b32.xlu0 %v8897_v12, %s8782_s29 }
 0x26e   : > { %1947 = vrot.lane.b32.xlu1 %v8909_v22, %s8777_s20 }
 0x270   : > { %3249 = vrot.lane.b32.xlu0 %v8900_v16, %s8782_s29 }
 0x272   : > { %2205 = vrot.lane.b32.xlu1 %v8902_v17, %s8778_s24 }
 0x274   : > { %3503 = vrot.lane.b32.xlu0 %v8897_v12, %s8783_s30 }
 0x276   : > { %2207 = vrot.lane.b32.xlu1 %v8909_v22, %s8778_s24 }
 0x278   : > { %3509 = vrot.lane.b32.xlu0 %v8900_v16, %s8783_s30 }
 0x27a   : > { %2465 = vrot.lane.b32.xlu1 %v8902_v17, %s8779_s25 }
 0x27c   : > { %3763 = vrot.lane.b32.xlu0 %v8897_v12, %s8784_s13 }
 0x27e   : > { %2467 = vrot.lane.b32.xlu1 %v8909_v22, %s8779_s25 }
 0x280   : > { %3769 = vrot.lane.b32.xlu0 %v8900_v16, %s8784_s13 }
 0x282   : > { %2725 = vrot.lane.b32.xlu1 %v8902_v17, %s8780_s27 }
 0x284   : > { %4243 = vrot.lane.b32.xlu0 %v8897_v12, %s8785_s14 }
 0x286   : > { %2727 = vrot.lane.b32.xlu1 %v8909_v22, %s8780_s27 }
 0x288   : > { %4247 = vrot.lane.b32.xlu0 %v8909_v22, %s8785_s14 }
 0x28a   : > { %2985 = vrot.lane.b32.xlu1 %v8902_v17, %s8781_s28 }
 0x28c   : > { %4503 = vrot.lane.b32.xlu0 %v8897_v12, %s8786_s15 }
 0x28e   : > { %2987 = vrot.lane.b32.xlu1 %v8909_v22, %s8781_s28 }
 0x290   : > { %4507 = vrot.lane.b32.xlu0 %v8909_v22, %s8786_s15 }
 0x292   : > { %3245 = vrot.lane.b32.xlu1 %v8902_v17, %s8782_s29 }
 0x294   : > { %4763 = vrot.lane.b32.xlu0 %v8897_v12, %s8787_s16 }
 0x296   : > { %3247 = vrot.lane.b32.xlu1 %v8909_v22, %s8782_s29 }
 0x298   : > { %4767 = vrot.lane.b32.xlu0 %v8909_v22, %s8787_s16 }
 0x29a   : > { %3505 = vrot.lane.b32.xlu1 %v8902_v17, %s8783_s30 }
 0x29c   : > { %5023 = vrot.lane.b32.xlu0 %v8897_v12, %s8788_s17 }
 0x29e   : > { %3507 = vrot.lane.b32.xlu1 %v8909_v22, %s8783_s30  ;;  %s413_s30 = scalar_lea.vmem %s10163_s12, %s8233_s23 }
 0x2a0   : > { %v704_v28 = vpop.permute.xlu1 %703  ;;  %5027 = vrot.lane.b32.xlu0 %v8909_v22, %s8788_s17 }
 0x2a2   : > { %3765 = vrot.lane.b32.xlu1 %v8902_v17, %s8784_s13 }
 0x2a4   : > { %v706_v32 = vpop.permute.xlu1 %705  ;;  %7526 = vperm.xlu0 %8707, %v7523_v29  }
 0x2a5   : > { %v8995_v33 = vsel %vm711_vm2, %v704_v28, %v706_v32 }
 0x2a6   : > { %v740_v34 = vmul.f32 %v726_v30, %v8995_v33  ;;  %3767 = vrot.lane.b32.xlu1 %v8909_v22, %s8784_s13 }
 0x2a8   : > { %v9003_v37 = vpack.c.bf16 %v740_v34, %v740_v34  ;;  %v710_v39 = vpop.permute.xlu1 %709 }
 0x2a9   : > { %v9009_v40 = vsel %vm711_vm2, %v710_v39, %v704_v28 }
 0x2aa   : > { %v739_v41 = vmul.f32 %v722_v35, %v9009_v40  ;;  %4245 = vrot.lane.b32.xlu1 %v8902_v17, %s8785_s14  ;;  %7958 = vmatprep.subr.msk.bf16.mxu0 %vm752_vm3, %v9003_v37  ;;  %v954_v11 = vrot.slane %v9003_v37, 2  ;;  %v8709_v35 = vld [vmem:[%s10156_s5 + $0x4] ss:$0 sps:$4 sm:$0xcc]  }
 0x2ac   : > { %v9018_v44 = vpack.c.bf16 %v739_v41, %v739_v41  ;;  %v708_v45 = vpop.permute.xlu1 %707 }
 0x2ad   : > { %v9022_v46 = vsel %vm711_vm2, %v708_v45, %v710_v39  ;;  %v9026_v47 = vsel %vm711_vm2, %v706_v32, %v708_v45  ;;  %v1186_v32 = vrot.slane %v7976_v27, %v8977_v26  ;;  %v1194_v39 = vrot.slane %v7976_v27, %v9005_v38 }
 0x2ae   : > { %v741_v48 = vmul.f32 %v730_v42, %v9026_v47  ;;  %v742_v49 = vmul.f32 %v734_v43, %v9022_v46  ;;  %4249 = vrot.lane.b32.xlu1 %v8900_v16, %s8785_s14  ;;  %v754_v53 = vsel %vm752_vm3, %v9018_v44, 0  ;;  %v953_v13 = vrot.slane %v9018_v44, 2  ;;  %v1170_v43 = vpop.permute.xlu0 %1169 }
 0x2af   : > { %766 = vmatpush1.bf16.msra.mxu0 %v754_v53  ;;  %vm3771_vm2 = vcmp.lt.s32.totalorder %v8975_v25, 1 }
 0x2b0   : > { %v9035_v51 = vpack.c.bf16 %v741_v48, %v741_v48  ;;  %v746_v52 = vpack.c.bf16 %v742_v49, %v742_v49  ;;  %v657_v54 = vpop.permute.xlu1 %656  ;;  %v961_v30 = vsel %vm752_vm3, %v953_v13, 0  ;;  %v948_v49 = vrot.slane %v8709_v35, 2 }
 0x2b2   : > { %4505 = vrot.lane.b32.xlu1 %v8902_v17, %s8786_s15  ;;  %7960 = vmatprep.subr.msk.bf16.mxu1 %vm752_vm3, %v746_v52  ;;  %v760_v56 = vsel %vm752_vm3, %v9035_v51, 0  ;;  %v955_v24 = vrot.slane %v9035_v51, 2  ;;  %v956_v28 = vrot.slane %v746_v52, 2 }
 0x2b3   : > { %807 = vmatpush1.bf16.msra.mxu1 %v760_v56  ;;  %7959 = vmatmul.mubr.msk.bf16.vlgmr.msra.gmra.mrb[4].mxu0 %vm748_vm4, %v747_v55 }
 0x2b4   : > { %v659_v58 = vpop.permute.xlu1 %658  ;;  %894 = vmatprep.mubr.bf16.mxu0 %v10168_v18  ;;  %v967_v42 = vsel %vm752_vm3, %v955_v24, 0 }
 0x2b5   : > { %v9052_v59 = vsel %vm666_vm5, %v657_v54, %v659_v58 }
 0x2b6   : > { %v694_v60 = vmul.f32 %v680_v57, %v9052_v59  ;;  %4509 = vrot.lane.b32.xlu1 %v8900_v16, %s8786_s15  ;;  %7961 = vmatmul.mubr.msk.bf16.vlgmr.msra.gmra.mrb[4].mxu1 %vm748_vm4, %v747_v55 }
 0x2b7   : > { %935 = vmatprep.mubr.bf16.mxu1 %v10168_v18 }
 0x2b8   : > { %v698_v62 = vpack.c.bf16 %v694_v60, %v694_v60  ;;  %v663_v63 = vpop.permute.xlu1 %662 }
 0x2b9   : > { %v9063_v1 = vsel %vm666_vm5, %v663_v63, %v657_v54  ;;  %v1182_v54 = vrot.slane %v7976_v27, %v8991_v31 }
 0x2ba   : > { %v693_v2 = vmul.f32 %v676_v61, %v9063_v1  ;;  %4765 = vrot.lane.b32.xlu1 %v8902_v17, %s8787_s16  ;;  %7962 = vmatprep.subr.msk.bf16.mxu0 %vm752_vm3, %v698_v62  ;;  %v1063_v29 = vrot.slane %v698_v62, 2 }
 0x2bc   : > { %v697_v5 = vpack.c.bf16 %v693_v2, %v693_v2  ;;  %v661_v6 = vpop.permute.xlu1 %660 }
 0x2bd   : > { %v9073_v7 = vsel %vm666_vm5, %v661_v6, %v663_v63  ;;  %v9077_v8 = vsel %vm666_vm5, %v659_v58, %v661_v6  ;;  %v1190_v58 = vrot.slane %v7976_v27, %v9001_v36  ;;  %v8710_v63 = vld [vmem:[%s10156_s5] ss:$0 sps:$4 sm:$0xcc]   ;;  %vm4251_vm5 = vcmp.lt.s32.totalorder %v8975_v25, 127 }
 0x2be   : > { %v695_v9 = vmul.f32 %v684_v3, %v9077_v8  ;;  %v696_v10 = vmul.f32 %v688_v4, %v9073_v7  ;;  %4769 = vrot.lane.b32.xlu1 %v8900_v16, %s8787_s16  ;;  %v851_v19 = vsel %vm752_vm3, %v697_v5, 0  ;;  %v1062_v44 = vrot.slane %v697_v5, 2  ;;  %v1424_v4 = vpop.permute.xlu0 %1423 }
 0x2bf   : > { %863 = vmatpush1.bf16.msra.mxu0 %v851_v19  ;;  %v1057_v6 = vrot.slane %v8710_v63, 2 }
 0x2c0   : > { %v699_v14 = vpack.c.bf16 %v695_v9, %v695_v9  ;;  %v700_v15 = vpack.c.bf16 %v696_v10, %v696_v10  ;;  %v1164_v20 = vpop.permute.xlu1 %1163  ;;  %7967 = vmatprep.subr.msk.bf16.mxu0 %vm752_vm3, %v954_v11  ;;  %v1070_v55 = vsel %vm752_vm3, %v1062_v44, 0  ;;  %v7986_v9 = vld [vmem:[%s10153_s2 + $0x3] ss:$8 sm:$0xf] }
 0x2c1   : > { %v9130_v56 = vsel %vm1171_vm6, %v1170_v43, %v1164_v20  ;;  %v1446_v13 = vrot.slane %v7986_v9, %v8977_v26  ;;  %v1442_v27 = vrot.slane %v7986_v9, %v8991_v31 }
 0x2c2   : > { %5025 = vrot.lane.b32.xlu1 %v8902_v17, %s8788_s17  ;;  %v857_v23 = vsel %vm752_vm3, %v699_v14, 0  ;;  %7964 = vmatprep.subr.msk.bf16.mxu1 %vm752_vm3, %v700_v15  ;;  %v1065_v41 = vrot.slane %v700_v15, 2  ;;  %v1064_v53 = vrot.slane %v699_v14, 2  ;;  %v1199_v61 = vmul.f32 %v1182_v54, %v9130_v56 }
 0x2c3   : > { %7963 = vmatmul.mubr.msk.bf16.vlgmr.msra.gmra.mrb[4].mxu0 %vm748_vm4, %v701_v21  ;;  %904 = vmatpush1.bf16.msra.mxu1 %v857_v23  ;;  %v1454_v23 = vrot.slane %v7986_v9, %v9005_v38 }
 0x2c4   : > { %v1166_v34 = vpop.permute.xlu1 %1165  ;;  %973 = vmatpush1.bf16.msra.mxu0 %v961_v30  ;;  %7969 = vmatprep.subr.msk.bf16.mxu1 %vm752_vm3, %v956_v28  ;;  %v1076_v60 = vsel %vm752_vm3, %v1064_v53, 0  ;;  %v1203_v5 = vpack.c.bf16 %v1199_v61, %v1199_v61 }
 0x2c5   : > { %7972 = vmatprep.subr.msk.bf16.mxu0 %vm752_vm3, %v1063_v29  ;;  %v9109_v37 = vsel %vm1171_vm6, %v1164_v20, %v1166_v34  ;;  %1004 = vmatprep.mubr.bf16.mxu0 %v10168_v18  ;;  %v1430_v20 = vpop.permute.xlu0 %1429 }
 0x2c6   : > { %5029 = vrot.lane.b32.xlu1 %v8900_v16, %s8788_s17  ;;  %7965 = vmatmul.mubr.msk.bf16.vlgmr.msra.gmra.mrb[4].mxu1 %vm748_vm4, %v701_v21  ;;  %v1200_v45 = vmul.f32 %v1186_v32, %v9109_v37  ;;  %v1212_v14 = vsel %vm752_vm3, %v1203_v5, 0  ;;  %v1318_v28 = vrot.slane %v1203_v5, 2  ;;  %v9173_v32 = vsel %vm1431_vm7, %v1430_v20, %v1424_v4 }
 0x2c7   : > { %1014 = vmatpush1.bf16.msra.mxu1 %v967_v42  ;;  %1045 = vmatprep.mubr.bf16.mxu1 %v10168_v18  ;;  %v1459_v42 = vmul.f32 %v1442_v27, %v9173_v32 }
 0x2c8   : > { %v1168_v48 = vpop.permute.xlu1 %1167  ;;  %7974 = vmatprep.subr.msk.bf16.mxu1 %vm752_vm3, %v1065_v41  ;;  %v1204_v51 = vpack.c.bf16 %v1200_v45, %v1200_v45  ;;  %v1326_v45 = vsel %vm752_vm3, %v1318_v28, 0 }
 0x2c9   : > { %v9121_v50 = vsel %vm1171_vm6, %v1168_v48, %v1170_v43  ;;  %v9140_v62 = vsel %vm1171_vm6, %v1166_v34, %v1168_v48  ;;  %v1207_v34 = vld [vmem:[%s10156_s5 + $0x8] sm:$0x3]  ;;  %v1463_v54 = vpack.c.bf16 %v1459_v42, %v1459_v42  ;;  %vm4511_vm6 = vcmp.lt.s32.totalorder %v8975_v25, 121 }
 0x2ca   : > { %v1202_v52 = vmul.f32 %v1194_v39, %v9121_v50  ;;  %v1201_v2 = vmul.f32 %v1190_v58, %v9140_v62  ;;  %v1319_v11 = vrot.slane %v1204_v51, 2  ;;  %v1450_v39 = vrot.slane %v7986_v9, %v9001_v36  ;;  %v8711_v48 = vld [vmem:[%s10156_s5 + $0x8] ss:$0 sps:$4 sm:$0xcc]  }
 0x2cb   : > { %7968 = vmatmul.mubr.msk.bf16.vlgmr.msra.gmra.mrb[8].mxu0 %vm748_vm4, %v948_v49  ;;  %v7996_v58 = vld [vmem:[%s10153_s2 + $0x4] ss:$8 sm:$0xf] }
 0x2cc   : > { %v1206_v57 = vpack.c.bf16 %v1202_v52, %v1202_v52  ;;  %1082 = vmatpush1.bf16.msra.mxu0 %v1070_v55  ;;  %1113 = vmatprep.mubr.bf16.mxu0 %v10168_v18  ;;  %v1426_v3 = vpop.permute.xlu1 %1425  ;;  %v1205_v10 = vpack.c.bf16 %v1201_v2, %v1201_v2  ;;  %v1684_v55 = vpop.permute.xlu0 %1683  ;;  %v1706_v63 = vrot.slane %v7996_v58, %v8977_v26  ;;  %v1472_v2 = vsel %vm752_vm3, %v1463_v54, 0 }
 0x2cd   : > { %7977 = vmatprep.subr.msk.bf16.mxu0 %vm752_vm3, %v1204_v51  ;;  %v9157_v15 = vsel %vm1431_vm7, %v1424_v4, %v1426_v3  ;;  %v1714_v9 = vrot.slane %v7996_v58, %v9005_v38 }
 0x2ce   : > { %7970 = vmatmul.mubr.msk.bf16.vlgmr.msra.gmra.mrb[8].mxu1 %vm748_vm4, %v948_v49  ;;  %v1321_v21 = vrot.slane %v1206_v57, 2  ;;  %v1218_v24 = vsel %vm752_vm3, %v1205_v10, 0  ;;  %v1460_v29 = vmul.f32 %v1446_v13, %v9157_v15  ;;  %v1320_v35 = vrot.slane %v1205_v10, 2 }
 0x2cf   : > { %1123 = vmatpush1.bf16.msra.mxu1 %v1076_v60  ;;  %1154 = vmatprep.mubr.bf16.mxu1 %v10168_v18  ;;  %v1702_v13 = vrot.slane %v7996_v58, %v8991_v31 }
 0x2d0   : > { %7979 = vmatprep.subr.msk.bf16.mxu1 %vm752_vm3, %v1206_v57  ;;  %v1428_v19 = vpop.permute.xlu1 %1427  ;;  %v1464_v43 = vpack.c.bf16 %v1460_v29, %v1460_v29  ;;  %v1332_v53 = vsel %vm752_vm3, %v1320_v35, 0  ;;  %v1313_v57 = vrot.slane %v8711_v48, 2  ;;  %v1690_v5 = vpop.permute.xlu0 %1689 }
 0x2d1   : > { %v9168_v30 = vsel %vm1431_vm7, %v1428_v19, %v1430_v20  ;;  %v9184_v44 = vsel %vm1431_vm7, %v1426_v3, %v1428_v19  ;;  %v9223_v20 = vsel %vm1691_vm8, %v1690_v5, %v1684_v55  ;;  %vm4771_vm7 = vcmp.lt.s32.totalorder %v8975_v25, 120 }
 0x2d2   : > { %v1462_v41 = vmul.f32 %v1454_v23, %v9168_v30  ;;  %v1461_v49 = vmul.f32 %v1450_v39, %v9184_v44  ;;  %v1579_v61 = vrot.slane %v1464_v43, 2  ;;  %v1719_v28 = vmul.f32 %v1702_v13, %v9223_v20  ;;  %v8712_v39 = vld [vmem:[%s10156_s5 + $0xc] ss:$0 sps:$4 sm:$0xcc]   ;;  %v1727_v13 = vld [vmem:[%s10156_s5 + $0x10] sm:$0x3] }
 0x2d4   : > { %v1466_v51 = vpack.c.bf16 %v1462_v41, %v1462_v41  ;;  %v1686_v52 = vpop.permute.xlu1 %1685  ;;  %v1465_v60 = vpack.c.bf16 %v1461_v49, %v1461_v49  ;;  %v1723_v48 = vpack.c.bf16 %v1719_v28, %v1719_v28  ;;  %v1944_v49 = vpop.permute.xlu0 %1943 }
 0x2d5   : > { %v9207_v3 = vsel %vm1691_vm8, %v1684_v55, %v1686_v52 }
 0x2d6   : > { %v1478_v10 = vsel %vm752_vm3, %v1465_v60, 0  ;;  %v1580_v23 = vrot.slane %v1465_v60, 2 }
 0x2d7   : > { %7973 = vmatmul.mubr.msk.bf16.vlgmr.msra.gmra.mrb[8].mxu0 %vm748_vm4, %v1057_v6 }
 0x2d8   : > { %1224 = vmatpush1.bf16.msra.mxu0 %v1212_v14  ;;  %1255 = vmatprep.mubr.bf16.mxu0 %v10168_v18  ;;  %v1688_v4 = vpop.permute.xlu1 %1687  ;;  %v1720_v14 = vmul.f32 %v1706_v63, %v9207_v3 }
 0x2d9   : > { %7982 = vmatprep.subr.msk.bf16.mxu0 %vm752_vm3, %v1319_v11  ;;  %v1578_v11 = vrot.slane %v1463_v54, 2  ;;  %v9218_v19 = vsel %vm1691_vm8, %v1688_v4, %v1690_v5  ;;  %v1838_v5 = vrot.slane %v1723_v48, 2 }
 0x2da   : > { %7975 = vmatmul.mubr.msk.bf16.vlgmr.msra.gmra.mrb[8].mxu1 %vm748_vm4, %v1057_v6  ;;  %v1581_v6 = vrot.slane %v1466_v51, 2  ;;  %v1722_v27 = vmul.f32 %v1714_v9, %v9218_v19  ;;  %v1724_v29 = vpack.c.bf16 %v1720_v14, %v1720_v14 }
 0x2db   : > { %1265 = vmatpush1.bf16.msra.mxu1 %v1218_v24  ;;  %1296 = vmatprep.mubr.bf16.mxu1 %v10168_v18  ;;  %v1710_v24 = vrot.slane %v7996_v58, %v9001_v36  ;;  %v1586_v35 = vsel %vm752_vm3, %v1578_v11, 0 }
 0x2dc   : > { %7984 = vmatprep.subr.msk.bf16.mxu1 %vm752_vm3, %v1321_v21  ;;  %v1467_v21 = vld [vmem:[%s10156_s5 + $0xc] sm:$0x3]  ;;  %v1726_v42 = vpack.c.bf16 %v1722_v27, %v1722_v27  ;;  %v1839_v54 = vrot.slane %v1724_v29, 2 }
 0x2de   : > { %v1841_v63 = vrot.slane %v1726_v42, 2 }
 0x2df   : > { %7978 = vmatmul.mubr.msk.bf16.vlgmr.msra.gmra.mrb[4].mxu0 %vm748_vm4, %v1207_v34 }
 0x2e0   : > { %1338 = vmatpush1.bf16.msra.mxu0 %v1326_v45  ;;  %1369 = vmatprep.mubr.bf16.mxu0 %v10168_v18  ;;  %v1592_v45 = vsel %vm752_vm3, %v1580_v23, 0 }
 0x2e1   : > { %7987 = vmatprep.subr.msk.bf16.mxu0 %vm752_vm3, %v1464_v43  ;;  %v1946_v43 = vpop.permute.xlu1 %1945 }
 0x2e2   : > { %7980 = vmatmul.mubr.msk.bf16.vlgmr.msra.gmra.mrb[4].mxu1 %vm748_vm4, %v1207_v34  ;;  %v9234_v34 = vsel %vm1691_vm8, %v1686_v52, %v1688_v4  ;;  %v8006_v52 = vld [vmem:[%s10153_s2 + $0x5] ss:$8 sm:$0xf]  ;;  %v9257_v58 = vsel %vm1951_vm9, %v1944_v49, %v1946_v43  ;;  %vm5031_vm8 = vcmp.lt.s32.totalorder %v8975_v25, 119 }
 0x2e3   : > { %1379 = vmatpush1.bf16.msra.mxu1 %v1332_v53  ;;  %1410 = vmatprep.mubr.bf16.mxu1 %v10168_v18  ;;  %v1721_v41 = vmul.f32 %v1710_v24, %v9234_v34  ;;  %v1966_v55 = vrot.slane %v8006_v52, %v8977_v26 }
 0x2e4   : > { %7989 = vmatprep.subr.msk.bf16.mxu1 %vm752_vm3, %v1466_v51  ;;  %v1573_v51 = vrot.slane %v8712_v39, 2 }
 0x2e5   : > { %v1725_v53 = vpack.c.bf16 %v1721_v41, %v1721_v41  ;;  %v1948_v60 = vpop.permute.xlu1 %1947  ;;  %v1980_v9 = vmul.f32 %v1966_v55, %v9257_v58 }
 0x2e6   : > { %v9284_v28 = vsel %vm1951_vm9, %v1946_v43, %v1948_v60 }
 0x2e7   : > { %7983 = vmatmul.mubr.msk.bf16.vlgmr.msra.gmra.mrb[8].mxu0 %vm748_vm4, %v1313_v57  ;;  %v1738_v4 = vsel %vm752_vm3, %v1725_v53, 0  ;;  %v1840_v14 = vrot.slane %v1725_v53, 2  ;;  %v1984_v27 = vpack.c.bf16 %v1980_v9, %v1980_v9 }
 0x2e8   : > { %1484 = vmatpush1.bf16.msra.mxu0 %v1472_v2  ;;  %1515 = vmatprep.mubr.bf16.mxu0 %v10168_v18  ;;  %v1974_v2 = vrot.slane %v8006_v52, %v9005_v38 }
 0x2e9   : > { %7992 = vmatprep.subr.msk.bf16.mxu0 %vm752_vm3, %v1579_v61  ;;  %v1950_v61 = vpop.permute.xlu0 %1949  ;;  %v1852_v43 = vsel %vm752_vm3, %v1840_v14, 0  ;;  %v2099_v53 = vrot.slane %v1984_v27, 2 }
 0x2ea   : > { %7985 = vmatmul.mubr.msk.bf16.vlgmr.msra.gmra.mrb[8].mxu1 %vm748_vm4, %v1313_v57  ;;  %v1732_v57 = vsel %vm752_vm3, %v1723_v48, 0  ;;  %v9273_v11 = vsel %vm1951_vm9, %v1950_v61, %v1944_v49 }
 0x2eb   : > { %1525 = vmatpush1.bf16.msra.mxu1 %v1478_v10  ;;  %1556 = vmatprep.mubr.bf16.mxu1 %v10168_v18  ;;  %v9268_v10 = vsel %vm1951_vm9, %v1948_v60, %v1950_v61 }
 0x2ec   : > { %7994 = vmatprep.subr.msk.bf16.mxu1 %vm752_vm3, %v1581_v6  ;;  %v1962_v6 = vrot.slane %v8006_v52, %v8991_v31  ;;  %v1982_v23 = vmul.f32 %v1974_v2, %v9268_v10 }
 0x2ed   : > { %v2204_v48 = vpop.permute.xlu0 %2203 }
 0x2ee   : > { %v1979_v24 = vmul.f32 %v1962_v6, %v9273_v11  ;;  %v1986_v41 = vpack.c.bf16 %v1982_v23, %v1982_v23 }
 0x2ef   : > { %7988 = vmatmul.mubr.msk.bf16.vlgmr.msra.gmra.mrb[4].mxu0 %vm748_vm4, %v1467_v21 }
 0x2f0   : > { %1598 = vmatpush1.bf16.msra.mxu0 %v1586_v35  ;;  %1629 = vmatprep.mubr.bf16.mxu0 %v10168_v18  ;;  %v8713_v35 = vld [vmem:[%s10156_s5 + $0x10] ss:$0 sps:$4 sm:$0xcc]  }
 0x2f1   : > { %7997 = vmatprep.subr.msk.bf16.mxu0 %vm752_vm3, %v1724_v29  ;;  %v1846_v29 = vsel %vm752_vm3, %v1838_v5, 0  ;;  %v1833_v49 = vrot.slane %v8713_v35, 2  ;;  %v2210_v61 = vpop.permute.xlu0 %2209 }
 0x2f2   : > { %7990 = vmatmul.mubr.msk.bf16.vlgmr.msra.gmra.mrb[4].mxu1 %vm748_vm4, %v1467_v21  ;;  %v1970_v21 = vrot.slane %v8006_v52, %v9001_v36  ;;  %v9323_v14 = vsel %vm2211_vm10, %v2210_v61, %v2204_v48 }
 0x2f3   : > { %1639 = vmatpush1.bf16.msra.mxu1 %v1592_v45  ;;  %1670 = vmatprep.mubr.bf16.mxu1 %v10168_v18  ;;  %v1983_v45 = vpack.c.bf16 %v1979_v24, %v1979_v24 }
 0x2f4   : > { %7999 = vmatprep.subr.msk.bf16.mxu1 %vm752_vm3, %v1726_v42  ;;  %v1981_v39 = vmul.f32 %v1970_v21, %v9284_v28  ;;  %v2206_v42 = vpop.permute.xlu1 %2205  ;;  %v1987_v21 = vld [vmem:[%s10156_s5 + $0x14] sm:$0x3] }
 0x2f5   : > { %v1992_v55 = vsel %vm752_vm3, %v1983_v45, 0  ;;  %v2098_v5 = vrot.slane %v1983_v45, 2 }
 0x2f6   : > { %v1985_v52 = vpack.c.bf16 %v1981_v39, %v1981_v39 }
 0x2f7   : > { %7993 = vmatmul.mubr.msk.bf16.vlgmr.msra.gmra.mrb[8].mxu0 %vm748_vm4, %v1573_v51 }
 0x2f8   : > { %1744 = vmatpush1.bf16.msra.mxu0 %v1732_v57  ;;  %1775 = vmatprep.mubr.bf16.mxu0 %v10168_v18  ;;  %v9307_v57 = vsel %vm2211_vm10, %v2204_v48, %v2206_v42  ;;  %v2208_v60 = vpop.permute.xlu1 %2207  ;;  %v2100_v23 = vrot.slane %v1985_v52, 2 }
 0x2f9   : > { %8002 = vmatprep.subr.msk.bf16.mxu0 %vm752_vm3, %v1839_v54  ;;  %v9334_v39 = vsel %vm2211_vm10, %v2206_v42, %v2208_v60 }
 0x2fa   : > { %7995 = vmatmul.mubr.msk.bf16.vlgmr.msra.gmra.mrb[8].mxu1 %vm748_vm4, %v1573_v51  ;;  %v8016_v51 = vld [vmem:[%s10153_s2 + $0x6] ss:$8 sm:$0xf]  ;;  %v2112_v42 = vsel %vm752_vm3, %v2100_v23, 0 }
 0x2fb   : > { %1785 = vmatpush1.bf16.msra.mxu1 %v1738_v4  ;;  %1816 = vmatprep.mubr.bf16.mxu1 %v10168_v18  ;;  %v2226_v54 = vrot.slane %v8016_v51, %v8977_v26  ;;  %v2234_v2 = vrot.slane %v8016_v51, %v9005_v38  ;;  %v1998_v4 = vsel %vm752_vm3, %v1985_v52, 0  ;;  %v2222_v6 = vrot.slane %v8016_v51, %v8991_v31  ;;  %v2464_v52 = vpop.permute.xlu0 %2463 }
 0x2fc   : > { %8004 = vmatprep.subr.msk.bf16.mxu1 %vm752_vm3, %v1841_v63  ;;  %v2101_v63 = vrot.slane %v1986_v41, 2  ;;  %v2230_v24 = vrot.slane %v8016_v51, %v9001_v36 }
 0x2fd   : > { %v2240_v9 = vmul.f32 %v2226_v54, %v9307_v57  ;;  %v8026_v54 = vld [vmem:[%s10153_s2 + $0x7] ss:$8 sm:$0xf] }
 0x2fe   : > { %v2241_v45 = vmul.f32 %v2230_v24, %v9334_v39  ;;  %v2482_v24 = vrot.slane %v8026_v54, %v8991_v31 }
 0x2ff   : > { %7998 = vmatmul.mubr.msk.bf16.vlgmr.msra.gmra.mrb[4].mxu0 %vm748_vm4, %v1727_v13  ;;  %v2244_v35 = vpack.c.bf16 %v2240_v9, %v2240_v9  ;;  %v2494_v9 = vrot.slane %v8026_v54, %v9005_v38 }
 0x300   : > { %1858 = vmatpush1.bf16.msra.mxu0 %v1846_v29  ;;  %1889 = vmatprep.mubr.bf16.mxu0 %v10168_v18  ;;  %v2239_v29 = vmul.f32 %v2222_v6, %v9323_v14 }
 0x301   : > { %8007 = vmatprep.subr.msk.bf16.mxu0 %vm752_vm3, %v1984_v27 }
 0x302   : > { %8000 = vmatmul.mubr.msk.bf16.vlgmr.msra.gmra.mrb[4].mxu1 %vm748_vm4, %v1727_v13  ;;  %v9318_v13 = vsel %vm2211_vm10, %v2208_v60, %v2210_v61  ;;  %v2243_v51 = vpack.c.bf16 %v2239_v29, %v2239_v29  ;;  %v2359_v60 = vrot.slane %v2244_v35, 2  ;;  %v2486_v61 = vrot.slane %v8026_v54, %v8977_v26 }
 0x303   : > { %1899 = vmatpush1.bf16.msra.mxu1 %v1852_v43  ;;  %1930 = vmatprep.mubr.bf16.mxu1 %v10168_v18  ;;  %v2242_v27 = vmul.f32 %v2234_v2, %v9318_v13  ;;  %v8714_v43 = vld [vmem:[%s10156_s5 + $0x14] ss:$0 sps:$4 sm:$0xcc]  }
 0x304   : > { %8009 = vmatprep.subr.msk.bf16.mxu1 %vm752_vm3, %v1986_v41  ;;  %v2106_v41 = vsel %vm752_vm3, %v2098_v5, 0  ;;  %v2470_v5 = vpop.permute.xlu0 %2469  ;;  %v2358_v23 = vrot.slane %v2243_v51, 2 }
 0x305   : > { %v2246_v48 = vpack.c.bf16 %v2242_v27, %v2242_v27 }
 0x307   : > { %8003 = vmatmul.mubr.msk.bf16.vlgmr.msra.gmra.mrb[8].mxu0 %vm748_vm4, %v1833_v49  ;;  %v2361_v6 = vrot.slane %v2246_v48, 2 }
 0x308   : > { %2004 = vmatpush1.bf16.msra.mxu0 %v1992_v55  ;;  %2035 = vmatprep.mubr.bf16.mxu0 %v10168_v18  ;;  %v2245_v55 = vpack.c.bf16 %v2241_v45, %v2241_v45  ;;  %v2490_v45 = vrot.slane %v8026_v54, %v9001_v36 }
 0x309   : > { %8012 = vmatprep.subr.msk.bf16.mxu0 %vm752_vm3, %v2099_v53  ;;  %v2093_v53 = vrot.slane %v8714_v43, 2 }
 0x30a   : > { %8005 = vmatmul.mubr.msk.bf16.vlgmr.msra.gmra.mrb[8].mxu1 %vm748_vm4, %v1833_v49  ;;  %v2466_v49 = vpop.permute.xlu1 %2465  ;;  %v2360_v43 = vrot.slane %v2245_v55, 2 }
 0x30b   : > { %2045 = vmatpush1.bf16.msra.mxu1 %v1998_v4  ;;  %2076 = vmatprep.mubr.bf16.mxu1 %v10168_v18  ;;  %v9357_v2 = vsel %vm2471_vm11, %v2464_v52, %v2466_v49 }
 0x30c   : > { %8014 = vmatprep.subr.msk.bf16.mxu1 %vm752_vm3, %v2101_v63  ;;  %v2252_v63 = vsel %vm752_vm3, %v2243_v51, 0  ;;  %v2500_v27 = vmul.f32 %v2486_v61, %v9357_v2 }
 0x30e   : > { %v2468_v4 = vpop.permute.xlu1 %2467  ;;  %v2504_v51 = vpack.c.bf16 %v2500_v27, %v2500_v27 }
 0x30f   : > { %8008 = vmatmul.mubr.msk.bf16.vlgmr.msra.gmra.mrb[4].mxu0 %vm748_vm4, %v1987_v21  ;;  %v9368_v29 = vsel %vm2471_vm11, %v2468_v4, %v2470_v5 }
 0x310   : > { %2118 = vmatpush1.bf16.msra.mxu0 %v2106_v41  ;;  %2149 = vmatprep.mubr.bf16.mxu0 %v10168_v18  ;;  %v2247_v41 = vld [vmem:[%s10156_s5 + $0x18] sm:$0x3] }
 0x311   : > { %8017 = vmatprep.subr.msk.bf16.mxu0 %vm752_vm3, %v2244_v35  ;;  %v9373_v35 = vsel %vm2471_vm11, %v2470_v5, %v2464_v52  ;;  %v2366_v52 = vsel %vm752_vm3, %v2358_v23, 0 }
 0x312   : > { %8010 = vmatmul.mubr.msk.bf16.vlgmr.msra.gmra.mrb[4].mxu1 %vm748_vm4, %v1987_v21  ;;  %v2258_v21 = vsel %vm752_vm3, %v2245_v55, 0  ;;  %v2726_v61 = vpop.permute.xlu1 %2725 }
 0x313   : > { %2159 = vmatpush1.bf16.msra.mxu1 %v2112_v42  ;;  %2190 = vmatprep.mubr.bf16.mxu1 %v10168_v18  ;;  %v2499_v42 = vmul.f32 %v2482_v24, %v9373_v35 }
 0x314   : > { %8019 = vmatprep.subr.msk.bf16.mxu1 %vm752_vm3, %v2246_v48  ;;  %v2502_v48 = vmul.f32 %v2494_v9, %v9368_v29 }
 0x316   : > { %v2506_v55 = vpack.c.bf16 %v2502_v48, %v2502_v48 }
 0x317   : > { %8013 = vmatmul.mubr.msk.bf16.vlgmr.msra.gmra.mrb[8].mxu0 %vm748_vm4, %v2093_v53 }
 0x318   : > { %2264 = vmatpush1.bf16.msra.mxu0 %v2252_v63  ;;  %2295 = vmatprep.mubr.bf16.mxu0 %v10168_v18  ;;  %v2503_v63 = vpack.c.bf16 %v2499_v42, %v2499_v42 }
 0x319   : > { %8022 = vmatprep.subr.msk.bf16.mxu0 %vm752_vm3, %v2359_v60  ;;  %v8715_v60 = vld [vmem:[%s10156_s5 + $0x18] ss:$0 sps:$4 sm:$0xcc]  }
 0x31a   : > { %8015 = vmatmul.mubr.msk.bf16.vlgmr.msra.gmra.mrb[8].mxu1 %vm748_vm4, %v2093_v53  ;;  %v9384_v53 = vsel %vm2471_vm11, %v2466_v49, %v2468_v4  ;;  %v2372_v49 = vsel %vm752_vm3, %v2360_v43, 0  ;;  %v2724_v4 = vpop.permute.xlu0 %2723  ;;  %v2353_v5 = vrot.slane %v8715_v60, 2  ;;  %v2512_v24 = vsel %vm752_vm3, %v2503_v63, 0 }
 0x31b   : > { %2305 = vmatpush1.bf16.msra.mxu1 %v2258_v21  ;;  %2336 = vmatprep.mubr.bf16.mxu1 %v10168_v18  ;;  %v2501_v54 = vmul.f32 %v2490_v45, %v9384_v53  ;;  %v2619_v21 = vrot.slane %v2504_v51, 2  ;;  %v9407_v27 = vsel %vm2731_vm12, %v2724_v4, %v2726_v61  ;;  %v2621_v45 = vrot.slane %v2506_v55, 2 }
 0x31c   : > { %8024 = vmatprep.subr.msk.bf16.mxu1 %vm752_vm3, %v2361_v6  ;;  %v8036_v6 = vld [vmem:[%s10153_s2 + $0x20] ss:$8 sm:$0xf]  ;;  %10171 = vst [vmem:[#allocation2_spill] sm:$0xff] %v9407_v27 }
 0x31d   : > { %v2505_v9 = vpack.c.bf16 %v2501_v54, %v2501_v54  ;;  %v2746_v23 = vrot.slane %v8036_v6, %v8977_v26  ;;  %v2754_v48 = vrot.slane %v8036_v6, %v9005_v38 }
 0x31e   : > { %v2730_v43 = vpop.permute.xlu0 %2729 }
 0x31f   : > { %8018 = vmatmul.mubr.msk.bf16.vlgmr.msra.gmra.mrb[4].mxu0 %vm748_vm4, %v2247_v41  ;;  %v2518_v42 = vsel %vm752_vm3, %v2505_v9, 0  ;;  %v2760_v60 = vmul.f32 %v2746_v23, %v9407_v27 }
 0x320   : > { %2378 = vmatpush1.bf16.msra.mxu0 %v2366_v52  ;;  %2409 = vmatprep.mubr.bf16.mxu0 %v10168_v18  ;;  %v2742_v52 = vrot.slane %v8036_v6, %v8991_v31 }
 0x321   : > { %8027 = vmatprep.subr.msk.bf16.mxu0 %vm752_vm3, %v2504_v51  ;;  %v2618_v51 = vrot.slane %v2503_v63, 2  ;;  %v2620_v63 = vrot.slane %v2505_v9, 2 }
 0x322   : > { %8020 = vmatmul.mubr.msk.bf16.vlgmr.msra.gmra.mrb[4].mxu1 %vm748_vm4, %v2247_v41  ;;  %v2728_v41 = vpop.permute.xlu1 %2727 }
 0x323   : > { %2419 = vmatpush1.bf16.msra.mxu1 %v2372_v49  ;;  %2450 = vmatprep.mubr.bf16.mxu1 %v10168_v18  ;;  %v9418_v54 = vsel %vm2731_vm12, %v2728_v41, %v2730_v43  ;;  %v2507_v49 = vld [vmem:[%s10156_s5 + $0x1c] sm:$0x3] }
 0x324   : > { %8029 = vmatprep.subr.msk.bf16.mxu1 %vm752_vm3, %v2506_v55  ;;  %10172 = vst [vmem:[#allocation3_spill] sm:$0xff] %v9418_v54  ;;  %v9423_v55 = vsel %vm2731_vm12, %v2730_v43, %v2724_v4  ;;  %v2626_v4 = vsel %vm752_vm3, %v2618_v51, 0  ;;  %v8716_v43 = vld [vmem:[%s10156_s5 + $0x1c] ss:$0 sps:$4 sm:$0xcc]  }
 0x325   : > { %10173 = vst [vmem:[#allocation4_spill] sm:$0xff] %v9423_v55  ;;  %v2759_v23 = vmul.f32 %v2742_v52, %v9423_v55  ;;  %v2613_v51 = vrot.slane %v8716_v43, 2  ;;  %v8046_v52 = vld [vmem:[%s10153_s2 + $0x21] ss:$8 sm:$0xf] }
 0x326   : > { %v3002_v0 = vrot.slane %v8046_v52, %v8991_v31 }
 0x327   : > { %8023 = vmatmul.mubr.msk.bf16.vlgmr.msra.gmra.mrb[8].mxu0 %vm748_vm4, %v2353_v5 }
 0x328   : > { %2524 = vmatpush1.bf16.msra.mxu0 %v2512_v24  ;;  %2555 = vmatprep.mubr.bf16.mxu0 %v10168_v18  ;;  %v2764_v24 = vpack.c.bf16 %v2760_v60, %v2760_v60 }
 0x329   : > { %8032 = vmatprep.subr.msk.bf16.mxu0 %vm752_vm3, %v2619_v21  ;;  %v2762_v21 = vmul.f32 %v2754_v48, %v9418_v54  ;;  %v2984_v48 = vpop.permute.xlu0 %2983 }
 0x32a   : > { %8025 = vmatmul.mubr.msk.bf16.vlgmr.msra.gmra.mrb[8].mxu1 %vm748_vm4, %v2353_v5  ;;  %v2750_v5 = vrot.slane %v8036_v6, %v9001_v36 }
 0x32b   : > { %2565 = vmatpush1.bf16.msra.mxu1 %v2518_v42  ;;  %2596 = vmatprep.mubr.bf16.mxu1 %v10168_v18  ;;  %v9434_v42 = vsel %vm2731_vm12, %v2726_v61, %v2728_v41  ;;  %v2766_v9 = vpack.c.bf16 %v2762_v21, %v2762_v21  ;;  %v2632_v61 = vsel %vm752_vm3, %v2620_v63, 0  ;;  %v2763_v41 = vpack.c.bf16 %v2759_v23, %v2759_v23 }
 0x32c   : > { %8034 = vmatprep.subr.msk.bf16.mxu1 %vm752_vm3, %v2621_v45  ;;  %v2761_v6 = vmul.f32 %v2750_v5, %v9434_v42  ;;  %v2986_v45 = vpop.permute.xlu1 %2985  ;;  %v2879_v5 = vrot.slane %v2764_v24, 2 }
 0x32d   : > { %v2772_v63 = vsel %vm752_vm3, %v2763_v41, 0  ;;  %v2994_v21 = vsel %vm2991_vm13, %v2984_v48, %v2986_v45  ;;  %v2881_v43 = vrot.slane %v2766_v9, 2 }
 0x32e   : > { %v2765_v60 = vpack.c.bf16 %v2761_v6, %v2761_v6  ;;  %v3014_v6 = vrot.slane %v8046_v52, %v9005_v38 }
 0x32f   : > { %8028 = vmatmul.mubr.msk.bf16.vlgmr.msra.gmra.mrb[4].mxu0 %vm748_vm4, %v2507_v49 }
 0x330   : > { %2638 = vmatpush1.bf16.msra.mxu0 %v2626_v4  ;;  %2669 = vmatprep.mubr.bf16.mxu0 %v10168_v18  ;;  %v2988_v23 = vpop.permute.xlu1 %2987  ;;  %v2990_v4 = vpop.permute.xlu0 %2989 }
 0x331   : > { %8037 = vmatprep.subr.msk.bf16.mxu0 %vm752_vm3, %v2764_v24  ;;  %v2778_v24 = vsel %vm752_vm3, %v2765_v60, 0  ;;  %v2992_v27 = vsel %vm2991_vm13, %v2988_v23, %v2990_v4 }
 0x332   : > { %8030 = vmatmul.mubr.msk.bf16.vlgmr.msra.gmra.mrb[4].mxu1 %vm748_vm4, %v2507_v49  ;;  %v3006_v49 = vrot.slane %v8046_v52, %v8977_v26 }
 0x333   : > { %2679 = vmatpush1.bf16.msra.mxu1 %v2632_v61  ;;  %2710 = vmatprep.mubr.bf16.mxu1 %v10168_v18  ;;  %v2878_v61 = vrot.slane %v2763_v41, 2  ;;  %v3010_v41 = vrot.slane %v8046_v52, %v9001_v36 }
 0x334   : > { %8039 = vmatprep.subr.msk.bf16.mxu1 %vm752_vm3, %v2766_v9  ;;  %v3020_v54 = vmul.f32 %v3006_v49, %v2994_v21  ;;  %v2767_v9 = vld [vmem:[%s10156_s5 + $0x20] sm:$0x3] }
 0x336   : > { %v3024_v21 = vpack.c.bf16 %v3020_v54, %v3020_v54 }
 0x337   : > { %8033 = vmatmul.mubr.msk.bf16.vlgmr.msra.gmra.mrb[8].mxu0 %vm748_vm4, %v2613_v51 }
 0x338   : > { %2784 = vmatpush1.bf16.msra.mxu0 %v2772_v63  ;;  %2815 = vmatprep.mubr.bf16.mxu0 %v10168_v18  ;;  %v3022_v63 = vmul.f32 %v3014_v6, %v2992_v27  ;;  %v3139_v6 = vrot.slane %v3024_v21, 2 }
 0x339   : > { %8042 = vmatprep.subr.msk.bf16.mxu0 %vm752_vm3, %v2879_v5  ;;  %v2995_v5 = vsel %vm2991_vm13, %v2990_v4, %v2984_v48  ;;  %v8717_v48 = vld [vmem:[%s10156_s5 + $0x20] ss:$0 sps:$4 sm:$0xcc]   ;;  %v10174_v4 = vmov 0  }
 0x33a   : > { %8035 = vmatmul.mubr.msk.bf16.vlgmr.msra.gmra.mrb[8].mxu1 %vm748_vm4, %v2613_v51  ;;  %v2880_v51 = vrot.slane %v2765_v60, 2  ;;  %v3019_v49 = vmul.f32 %v3002_v0, %v2995_v5  ;;  %v3026_v27 = vpack.c.bf16 %v3022_v63, %v3022_v63  ;;  %v3246_v0 = vpop.permute.xlu1 %3245  ;;  %v3244_v60 = vpop.permute.xlu0 %3243 }
 0x33b   : > { %2825 = vmatpush1.bf16.msra.mxu1 %v2778_v24  ;;  %2856 = vmatprep.mubr.bf16.mxu1 %v10168_v18  ;;  %v2993_v24 = vsel %vm2991_vm13, %v2986_v45, %v2988_v23  ;;  %v2886_v18 = vsel %vm752_vm3, %v2878_v61, 0  ;;  %v2873_v23 = vrot.slane %v8717_v48, 2 }
 0x33c   : > { %8044 = vmatprep.subr.msk.bf16.mxu1 %vm752_vm3, %v2881_v43  ;;  %v3021_v52 = vmul.f32 %v3010_v41, %v2993_v24  ;;  %v2892_v54 = vsel %vm752_vm3, %v2880_v51, 0  ;;  %v3023_v45 = vpack.c.bf16 %v3019_v49, %v3019_v49  ;;  %v3141_v63 = vrot.slane %v3026_v27, 2 }
 0x33e   : > { %v3025_v43 = vpack.c.bf16 %v3021_v52, %v3021_v52  ;;  %v3032_v5 = vsel %vm752_vm3, %v3023_v45, 0  ;;  %v3248_v51 = vpop.permute.xlu1 %3247  ;;  %v3250_v41 = vpop.permute.xlu0 %3249  ;;  %v3138_v24 = vrot.slane %v3023_v45, 2 }
 0x33f   : > { %8038 = vmatmul.mubr.msk.bf16.vlgmr.msra.gmra.mrb[4].mxu0 %vm748_vm4, %v2767_v9 }
 0x340   : > { %2898 = vmatpush1.bf16.msra.mxu0 %v2886_v18  ;;  %2929 = vmatprep.mubr.bf16.mxu0 %v10174_v4  ;;  %v8056_v18 = vld [vmem:[%s10153_s2 + $0x22] ss:$8 sm:$0xf]  ;;  %v3146_v55 = vsel %vm752_vm3, %v3138_v24, 0 }
 0x341   : > { %8047 = vmatprep.subr.msk.bf16.mxu0 %vm752_vm3, %v3024_v21  ;;  %v3266_v61 = vrot.slane %v8056_v18, %v8977_v26  ;;  %v3274_v49 = vrot.slane %v8056_v18, %v9005_v38  ;;  %v3038_v21 = vsel %vm752_vm3, %v3025_v43, 0  ;;  %v3262_v48 = vrot.slane %v8056_v18, %v8991_v31 }
 0x342   : > { %8040 = vmatmul.mubr.msk.bf16.vlgmr.msra.gmra.mrb[4].mxu1 %vm748_vm4, %v2767_v9  ;;  %v3254_v9 = vsel %vm3251_vm14, %v3244_v60, %v3246_v0  ;;  %v3270_v45 = vrot.slane %v8056_v18, %v9001_v36 }
 0x343   : > { %2939 = vmatpush1.bf16.msra.mxu1 %v2892_v54  ;;  %2970 = vmatprep.mubr.bf16.mxu1 %v10174_v4  ;;  %v3280_v52 = vmul.f32 %v3266_v61, %v3254_v9  ;;  %v3252_v54 = vsel %vm3251_vm14, %v3248_v51, %v3250_v41 }
 0x344   : > { %8049 = vmatprep.subr.msk.bf16.mxu1 %vm752_vm3, %v3026_v27  ;;  %v3027_v27 = vld [vmem:[%s10156_s5 + $0x24] sm:$0x3] }
 0x345   : > { %v3284_v9 = vpack.c.bf16 %v3280_v52, %v3280_v52 }
 0x347   : > { %8043 = vmatmul.mubr.msk.bf16.vlgmr.msra.gmra.mrb[8].mxu0 %vm748_vm4, %v2873_v23 }
 0x348   : > { %3044 = vmatpush1.bf16.msra.mxu0 %v3032_v5  ;;  %3075 = vmatprep.mubr.bf16.mxu0 %v10174_v4  ;;  %v3282_v5 = vmul.f32 %v3274_v49, %v3252_v54 }
 0x349   : > { %8052 = vmatprep.subr.msk.bf16.mxu0 %vm752_vm3, %v3139_v6  ;;  %v3255_v6 = vsel %vm3251_vm14, %v3250_v41, %v3244_v60  ;;  %v8718_v60 = vld [vmem:[%s10156_s5 + $0x24] ss:$0 sps:$4 sm:$0xcc]   ;;  %v3506_v41 = vpop.permute.xlu1 %3505 }
 0x34a   : > { %8045 = vmatmul.mubr.msk.bf16.vlgmr.msra.gmra.mrb[8].mxu1 %vm748_vm4, %v2873_v23  ;;  %v3140_v23 = vrot.slane %v3025_v43, 2  ;;  %v3279_v61 = vmul.f32 %v3262_v48, %v3255_v6  ;;  %v3286_v43 = vpack.c.bf16 %v3282_v5, %v3282_v5  ;;  %v3133_v49 = vrot.slane %v8718_v60, 2 }
 0x34b   : > { %3085 = vmatpush1.bf16.msra.mxu1 %v3038_v21  ;;  %3116 = vmatprep.mubr.bf16.mxu1 %v10174_v4  ;;  %v3253_v21 = vsel %vm3251_vm14, %v3246_v0, %v3248_v51  ;;  %v3399_v48 = vrot.slane %v3284_v9, 2 }
 0x34c   : > { %8054 = vmatprep.subr.msk.bf16.mxu1 %vm752_vm3, %v3141_v63  ;;  %v3281_v18 = vmul.f32 %v3270_v45, %v3253_v21  ;;  %v3152_v0 = vsel %vm752_vm3, %v3140_v23, 0  ;;  %v3283_v51 = vpack.c.bf16 %v3279_v61, %v3279_v61  ;;  %v3504_v63 = vpop.permute.xlu0 %3503  ;;  %v3401_v45 = vrot.slane %v3286_v43, 2 }
 0x34d   : > { %v3514_v6 = vsel %vm3511_vm15, %v3504_v63, %v3506_v41 }
 0x34e   : > { %v3285_v24 = vpack.c.bf16 %v3281_v18, %v3281_v18  ;;  %v3292_v54 = vsel %vm752_vm3, %v3283_v51, 0 }
 0x34f   : > { %8048 = vmatmul.mubr.msk.bf16.vlgmr.msra.gmra.mrb[4].mxu0 %vm748_vm4, %v3027_v27 }
 0x350   : > { %3158 = vmatpush1.bf16.msra.mxu0 %v3146_v55  ;;  %3189 = vmatprep.mubr.bf16.mxu0 %v10174_v4  ;;  %v8066_v55 = vld [vmem:[%s10153_s2 + $0x23] ss:$8 sm:$0xf]  ;;  %v3510_v23 = vpop.permute.xlu0 %3509  ;;  %v3298_v61 = vsel %vm752_vm3, %v3285_v24, 0 }
 0x351   : > { %8057 = vmatprep.subr.msk.bf16.mxu0 %vm752_vm3, %v3284_v9  ;;  %v3526_v52 = vrot.slane %v8066_v55, %v8977_v26  ;;  %v3534_v5 = vrot.slane %v8066_v55, %v9005_v38  ;;  %v3398_v9 = vrot.slane %v3283_v51, 2  ;;  %v3522_v21 = vrot.slane %v8066_v55, %v8991_v31 }
 0x352   : > { %8050 = vmatmul.mubr.msk.bf16.vlgmr.msra.gmra.mrb[4].mxu1 %vm748_vm4, %v3027_v27  ;;  %v3508_v27 = vpop.permute.xlu1 %3507  ;;  %v3530_v51 = vrot.slane %v8066_v55, %v9001_v36 }
 0x353   : > { %3199 = vmatpush1.bf16.msra.mxu1 %v3152_v0  ;;  %3230 = vmatprep.mubr.bf16.mxu1 %v10174_v4  ;;  %v3540_v60 = vmul.f32 %v3526_v52, %v3514_v6  ;;  %v3512_v18 = vsel %vm3511_vm15, %v3508_v27, %v3510_v23  ;;  %v3515_v0 = vsel %vm3511_vm15, %v3510_v23, %v3504_v63  ;;  %v8719_v63 = vld [vmem:[%s10156_s5 + $0x28] ss:$0 sps:$4 sm:$0xcc]  }
 0x354   : > { %8059 = vmatprep.subr.msk.bf16.mxu1 %vm752_vm3, %v3286_v43  ;;  %v3287_v43 = vld [vmem:[%s10156_s5 + $0x28] sm:$0x3]  ;;  %v3539_v52 = vmul.f32 %v3522_v21, %v3515_v0  ;;  %v3513_v6 = vsel %vm3511_vm15, %v3506_v41, %v3508_v27 }
 0x355   : > { %v3541_v55 = vmul.f32 %v3530_v51, %v3513_v6 }
 0x356   : > { %v3766_v23 = vpop.permute.xlu1 %3765  ;;  %v3543_v27 = vpack.c.bf16 %v3539_v52, %v3539_v52 }
 0x357   : > { %8053 = vmatmul.mubr.msk.bf16.vlgmr.msra.gmra.mrb[8].mxu0 %vm748_vm4, %v3133_v49  ;;  %v3545_v21 = vpack.c.bf16 %v3541_v55, %v3541_v55 }
 0x358   : > { %3304 = vmatpush1.bf16.msra.mxu0 %v3292_v54  ;;  %3335 = vmatprep.mubr.bf16.mxu0 %v10174_v4  ;;  %v3544_v54 = vpack.c.bf16 %v3540_v60, %v3540_v60  ;;  %v3552_v0 = vsel %vm752_vm3, %v3543_v27, 0  ;;  %v3658_v6 = vrot.slane %v3543_v27, 2 }
 0x359   : > { %8062 = vmatprep.subr.msk.bf16.mxu0 %vm752_vm3, %v3399_v48  ;;  %v3542_v48 = vmul.f32 %v3534_v5, %v3512_v18  ;;  %v3393_v5 = vrot.slane %v8719_v63, 2 }
 0x35a   : > { %8055 = vmatmul.mubr.msk.bf16.vlgmr.msra.gmra.mrb[8].mxu1 %vm748_vm4, %v3133_v49  ;;  %v3400_v49 = vrot.slane %v3285_v24, 2  ;;  %v3659_v60 = vrot.slane %v3544_v54, 2 }
 0x35b   : > { %3345 = vmatpush1.bf16.msra.mxu1 %v3298_v61  ;;  %3376 = vmatprep.mubr.bf16.mxu1 %v10174_v4  ;;  %v3406_v61 = vsel %vm752_vm3, %v3398_v9, 0  ;;  %v3546_v24 = vpack.c.bf16 %v3542_v48, %v3542_v48  ;;  %v8076_v9 = vld [vmem:[%s10153_s2 + $0x24] ss:$8 sm:$0xf] }
 0x35c   : > { %8064 = vmatprep.subr.msk.bf16.mxu1 %vm752_vm3, %v3401_v45  ;;  %v3412_v41 = vsel %vm752_vm3, %v3400_v49, 0  ;;  %v3764_v45 = vpop.permute.xlu0 %3763  ;;  %v3786_v18 = vrot.slane %v8076_v9, %v8977_v26  ;;  %v3768_v49 = vpop.permute.xlu1 %3767  ;;  %v3794_v52 = vrot.slane %v8076_v9, %v9005_v38  ;;  %v3790_v27 = vrot.slane %v8076_v9, %v9001_v36 }
 0x35d   : > { %v3661_v48 = vrot.slane %v3546_v24, 2 }
 0x35f   : > { %8058 = vmatmul.mubr.msk.bf16.vlgmr.msra.gmra.mrb[4].mxu0 %vm748_vm4, %v3287_v43 }
 0x360   : > { %3418 = vmatpush1.bf16.msra.mxu0 %v3406_v61  ;;  %3449 = vmatprep.mubr.bf16.mxu0 %v10174_v4  ;;  %v3770_v51 = vpop.permute.xlu0 %3769  ;;  %v3782_v61 = vrot.slane %v8076_v9, %v8991_v31 }
 0x361   : > { %8067 = vmatprep.subr.msk.bf16.mxu0 %vm752_vm3, %v3544_v54  ;;  %v3558_v54 = vsel %vm752_vm3, %v3545_v21, 0  ;;  %v3772_v55 = vsel %vm3771_vm2, %v3768_v49, %v3770_v51 }
 0x362   : > { %8060 = vmatmul.mubr.msk.bf16.vlgmr.msra.gmra.mrb[4].mxu1 %vm748_vm4, %v3287_v43  ;;  %v3774_v43 = vsel %vm3771_vm2, %v3764_v45, %v3766_v23 }
 0x363   : > { %3459 = vmatpush1.bf16.msra.mxu1 %v3412_v41  ;;  %3490 = vmatprep.mubr.bf16.mxu1 %v10174_v4  ;;  %v3800_v63 = vmul.f32 %v3786_v18, %v3774_v43  ;;  %v3775_v41 = vsel %vm3771_vm2, %v3770_v51, %v3764_v45  ;;  %v3773_v43 = vsel %vm3771_vm2, %v3766_v23, %v3768_v49  ;;  %v8720_v45 = vld [vmem:[%s10156_s5 + $0x2c] ss:$0 sps:$4 sm:$0xcc]  }
 0x364   : > { %8069 = vmatprep.subr.msk.bf16.mxu1 %vm752_vm3, %v3546_v24  ;;  %v3547_v24 = vld [vmem:[%s10156_s5 + $0x2c] sm:$0x3]  ;;  %v3799_v18 = vmul.f32 %v3782_v61, %v3775_v41  ;;  %v3801_v9 = vmul.f32 %v3790_v27, %v3773_v43  ;;  %v3653_v49 = vrot.slane %v8720_v45, 2  ;;  %v3807_v41 = vld [vmem:[%s10156_s5 + $0x30] sm:$0x3]  ;;  %v4024_v27 = vpack.c.bf16 %v8902_v17, %v8902_v17 }
 0x365   : > { %v4023_v45 = vpack.c.bf16 %v8897_v12, %v8897_v12 }
 0x366   : > { %v3803_v23 = vpack.c.bf16 %v3799_v18, %v3799_v18  ;;  %v4244_v18 = vpop.permute.xlu0 %4243 }
 0x367   : > { %8063 = vmatmul.mubr.msk.bf16.vlgmr.msra.gmra.mrb[8].mxu0 %vm748_vm4, %v3393_v5  ;;  %v4032_v12 = vsel %vm752_vm3, %v4023_v45, 0 }
 0x368   : > { %3564 = vmatpush1.bf16.msra.mxu0 %v3552_v0  ;;  %3595 = vmatprep.mubr.bf16.mxu0 %v10174_v4  ;;  %v3804_v0 = vpack.c.bf16 %v3800_v63, %v3800_v63 }
 0x369   : > { %8072 = vmatprep.subr.msk.bf16.mxu0 %vm752_vm3, %v3659_v60  ;;  %v3802_v60 = vmul.f32 %v3794_v52, %v3772_v55  ;;  %v3918_v55 = vrot.slane %v3803_v23, 2 }
 0x36a   : > { %8065 = vmatmul.mubr.msk.bf16.vlgmr.msra.gmra.mrb[8].mxu1 %vm748_vm4, %v3393_v5  ;;  %v3660_v5 = vrot.slane %v3545_v21, 2  ;;  %v3919_v52 = vrot.slane %v3804_v0, 2 }
 0x36b   : > { %3605 = vmatpush1.bf16.msra.mxu1 %v3558_v54  ;;  %3636 = vmatprep.mubr.bf16.mxu1 %v10174_v4  ;;  %v3666_v54 = vsel %vm752_vm3, %v3658_v6, 0  ;;  %v3806_v21 = vpack.c.bf16 %v3802_v60, %v3802_v60  ;;  %v3812_v6 = vsel %vm752_vm3, %v3803_v23, 0  ;;  %v8721_v60 = vld [vmem:[%s10156_s5 + $0x30] ss:$0 sps:$4 sm:$0xcc]   ;;  %v4139_v23 = vrot.slane %v4024_v27, 2 }
 0x36c   : > { %8074 = vmatprep.subr.msk.bf16.mxu1 %vm752_vm3, %v3661_v48  ;;  %v3672_v51 = vsel %vm752_vm3, %v3660_v5, 0  ;;  %v3805_v48 = vpack.c.bf16 %v3801_v9, %v3801_v9  ;;  %v3926_v5 = vsel %vm752_vm3, %v3918_v55, 0  ;;  %v3913_v17 = vrot.slane %v8721_v60, 2  ;;  %v8095_v9 = vld [vmem:[%s10153_s2 + $0x26] ss:$8 sm:$0xf] }
 0x36d   : > { %v3921_v61 = vrot.slane %v3806_v21, 2 }
 0x36e   : > { %v3818_v63 = vsel %vm752_vm3, %v3805_v48, 0 }
 0x36f   : > { %8068 = vmatmul.mubr.msk.bf16.vlgmr.msra.gmra.mrb[4].mxu0 %vm748_vm4, %v3547_v24 }
 0x370   : > { %3678 = vmatpush1.bf16.msra.mxu0 %v3666_v54  ;;  %3709 = vmatprep.mubr.bf16.mxu0 %v10174_v4  ;;  %v4026_v54 = vpack.c.bf16 %v8900_v16, %v8900_v16  ;;  %v4266_v16 = vrot.slane %v8095_v9, %v8977_v26 }
 0x371   : > { %8077 = vmatprep.subr.msk.bf16.mxu0 %vm752_vm3, %v3804_v0  ;;  %v4246_v0 = vpop.permute.xlu1 %4245 }
 0x372   : > { %8070 = vmatmul.mubr.msk.bf16.vlgmr.msra.gmra.mrb[4].mxu1 %vm748_vm4, %v3547_v24  ;;  %v3920_v24 = vrot.slane %v3805_v48, 2 }
 0x373   : > { %3719 = vmatpush1.bf16.msra.mxu1 %v3672_v51  ;;  %3750 = vmatprep.mubr.bf16.mxu1 %v10174_v4  ;;  %v4248_v51 = vpop.permute.xlu0 %4247 }
 0x374   : > { %8079 = vmatprep.subr.msk.bf16.mxu1 %vm752_vm3, %v3806_v21  ;;  %v3932_v43 = vsel %vm752_vm3, %v3920_v24, 0  ;;  %v4025_v21 = vpack.c.bf16 %v8909_v22, %v8909_v22  ;;  %v4254_v24 = vsel %vm4251_vm5, %v4244_v18, %v4246_v0 }
 0x375   : > { %v4250_v48 = vpop.permute.xlu1 %4249 }
 0x376   : > { %v4038_v22 = vsel %vm752_vm3, %v4025_v21, 0  ;;  %v4255_v55 = vsel %vm4251_vm5, %v4250_v48, %v4244_v18  ;;  %v8722_v18 = vld [vmem:[%s10156_s5 + $0x34] ss:$0 sps:$4 sm:$0xcc]  }
 0x377   : > { %8073 = vmatmul.mubr.msk.bf16.vlgmr.msra.gmra.mrb[8].mxu0 %vm748_vm4, %v3653_v49 }
 0x378   : > { %3824 = vmatpush1.bf16.msra.mxu0 %v3812_v6  ;;  %3855 = vmatprep.mubr.bf16.mxu0 %v10174_v4  ;;  %v4141_v6 = vrot.slane %v4026_v54, 2 }
 0x379   : > { %8082 = vmatprep.subr.msk.bf16.mxu0 %vm752_vm3, %v3919_v52  ;;  %v4274_v52 = vrot.slane %v8095_v9, %v9005_v38 }
 0x37a   : > { %8075 = vmatmul.mubr.msk.bf16.vlgmr.msra.gmra.mrb[8].mxu1 %vm748_vm4, %v3653_v49  ;;  %v4253_v49 = vsel %vm4251_vm5, %v4246_v0, %v4248_v51  ;;  %v4504_v0 = vpop.permute.xlu0 %4503 }
 0x37b   : > { %3865 = vmatpush1.bf16.msra.mxu1 %v3818_v63  ;;  %3896 = vmatprep.mubr.bf16.mxu1 %v10174_v4  ;;  %v4280_v63 = vmul.f32 %v4266_v16, %v4253_v49  ;;  %v4282_v60 = vmul.f32 %v4274_v52, %v4255_v55  ;;  %v4133_v49 = vrot.slane %v8722_v18, 2 }
 0x37c   : > { %8084 = vmatprep.subr.msk.bf16.mxu1 %vm752_vm3, %v3921_v61  ;;  %v4262_v61 = vrot.slane %v8095_v9, %v8991_v31 }
 0x37f   : > { %8078 = vmatmul.mubr.msk.bf16.vlgmr.msra.gmra.mrb[4].mxu0 %vm748_vm4, %v3807_v41 }
 0x380   : > { %3938 = vmatpush1.bf16.msra.mxu0 %v3926_v5  ;;  %3969 = vmatprep.mubr.bf16.mxu0 %v10174_v4  ;;  %v4027_v5 = vld [vmem:[%s10156_s5 + $0x34] sm:$0x3] }
 0x381   : > { %8086 = vmatprep.subr.msk.bf16.mxu0 %vm752_vm3, %v4024_v27  ;;  %v4270_v27 = vrot.slane %v8095_v9, %v9001_v36 }
 0x382   : > { %8080 = vmatmul.mubr.msk.bf16.vlgmr.msra.gmra.mrb[4].mxu1 %vm748_vm4, %v3807_v41  ;;  %v4138_v41 = vrot.slane %v4023_v45, 2  ;;  %v4252_v45 = vsel %vm4251_vm5, %v4248_v51, %v4250_v48  ;;  %v8105_v48 = vld [vmem:[%s10153_s2 + $0x27] ss:$8 sm:$0xf] }
 0x383   : > { %3979 = vmatpush1.bf16.msra.mxu1 %v3932_v43  ;;  %4010 = vmatprep.mubr.bf16.mxu1 %v10174_v4  ;;  %v4140_v43 = vrot.slane %v4025_v21, 2  ;;  %v4281_v9 = vmul.f32 %v4270_v27, %v4252_v45  ;;  %v4286_v21 = vpack.c.bf16 %v4282_v60, %v4282_v60 }
 0x384   : > { %8088 = vmatprep.subr.msk.bf16.mxu1 %vm752_vm3, %v4026_v54  ;;  %v4279_v54 = vmul.f32 %v4262_v61, %v4254_v24  ;;  %v4146_v16 = vsel %vm752_vm3, %v4138_v41, 0  ;;  %v4526_v61 = vrot.slane %v8105_v48, %v8977_v26 }
 0x385   : > { %v4152_v51 = vsel %vm752_vm3, %v4140_v43, 0  ;;  %v4285_v52 = vpack.c.bf16 %v4281_v9, %v4281_v9  ;;  %v4401_v24 = vrot.slane %v4286_v21, 2  ;;  %v4522_v43 = vrot.slane %v8105_v48, %v8991_v31 }
 0x386   : > { %v4530_v9 = vrot.slane %v8105_v48, %v9001_v36 }
 0x387   : > { %8083 = vmatmul.mubr.msk.bf16.vlgmr.msra.gmra.mrb[8].mxu0 %vm748_vm4, %v3913_v17  ;;  %v4298_v27 = vsel %vm752_vm3, %v4285_v52, 0  ;;  %v4400_v18 = vrot.slane %v4285_v52, 2 }
 0x388   : > { %4044 = vmatpush1.bf16.msra.mxu0 %v4032_v12  ;;  %4075 = vmatprep.mubr.bf16.mxu0 %v10174_v4  ;;  %v4506_v12 = vpop.permute.xlu1 %4505 }
 0x389   : > { %8091 = vmatprep.subr.msk.bf16.mxu0 %vm752_vm3, %v4139_v23  ;;  %v4283_v23 = vpack.c.bf16 %v4279_v54, %v4279_v54  ;;  %v4514_v45 = vsel %vm4511_vm6, %v4504_v0, %v4506_v12 }
 0x38a   : > { %8085 = vmatmul.mubr.msk.bf16.vlgmr.msra.gmra.mrb[8].mxu1 %vm748_vm4, %v3913_v17  ;;  %v4284_v17 = vpack.c.bf16 %v4280_v63, %v4280_v63 }
 0x38b   : > { %4085 = vmatpush1.bf16.msra.mxu1 %v4038_v22  ;;  %4116 = vmatprep.mubr.bf16.mxu1 %v10174_v4  ;;  %v4508_v22 = vpop.permute.xlu0 %4507  ;;  %v4292_v63 = vsel %vm752_vm3, %v4283_v23, 0  ;;  %v4398_v60 = vrot.slane %v4283_v23, 2 }
 0x38c   : > { %8093 = vmatprep.subr.msk.bf16.mxu1 %vm752_vm3, %v4141_v6  ;;  %v4399_v6 = vrot.slane %v4284_v17, 2  ;;  %v4513_v55 = vsel %vm4511_vm6, %v4506_v12, %v4508_v22  ;;  %v4510_v41 = vpop.permute.xlu1 %4509 }
 0x38d   : > { %v4540_v54 = vmul.f32 %v4526_v61, %v4513_v55 }
 0x38f   : > { %8087 = vmatmul.mubr.msk.bf16.vlgmr.msra.gmra.mrb[4].mxu0 %vm748_vm4, %v4027_v5  ;;  %v4544_v23 = vpack.c.bf16 %v4540_v54, %v4540_v54  ;;  %v4764_v12 = vpop.permute.xlu0 %4763 }
 0x390   : > { %4158 = vmatpush1.bf16.msra.mxu0 %v4146_v16  ;;  %4189 = vmatprep.mubr.bf16.mxu0 %v10174_v4  ;;  %v4287_v16 = vld [vmem:[%s10156_s5 + $0x38] sm:$0x3]  ;;  %v4766_v61 = vpop.permute.xlu1 %4765 }
 0x391   : > { %8096 = vmatprep.subr.msk.bf16.mxu0 %vm752_vm3, %v4284_v17  ;;  %v4515_v17 = vsel %vm4511_vm6, %v4510_v41, %v4504_v0  ;;  %v8723_v0 = vld [vmem:[%s10156_s5 + $0x38] ss:$0 sps:$4 sm:$0xcc]  }
 0x392   : > { %8089 = vmatmul.mubr.msk.bf16.vlgmr.msra.gmra.mrb[4].mxu1 %vm748_vm4, %v4027_v5  ;;  %v4534_v5 = vrot.slane %v8105_v48, %v9005_v38  ;;  %v4393_v55 = vrot.slane %v8723_v0, 2 }
 0x393   : > { %4199 = vmatpush1.bf16.msra.mxu1 %v4152_v51  ;;  %4230 = vmatprep.mubr.bf16.mxu1 %v10174_v4  ;;  %v4539_v51 = vmul.f32 %v4522_v43, %v4514_v45 }
 0x394   : > { %8098 = vmatprep.subr.msk.bf16.mxu1 %vm752_vm3, %v4286_v21  ;;  %v4542_v21 = vmul.f32 %v4534_v5, %v4515_v17  ;;  %v4768_v5 = vpop.permute.xlu0 %4767  ;;  %v4770_v17 = vpop.permute.xlu1 %4769 }
 0x395   : > { %v4773_v54 = vsel %vm4771_vm7, %v4766_v61, %v4768_v5 }
 0x396   : > { %v4546_v52 = vpack.c.bf16 %v4542_v21, %v4542_v21 }
 0x397   : > { %8092 = vmatmul.mubr.msk.bf16.vlgmr.msra.gmra.mrb[8].mxu0 %vm748_vm4, %v4133_v49 }
 0x398   : > { %4304 = vmatpush1.bf16.msra.mxu0 %v4292_v63  ;;  %4335 = vmatprep.mubr.bf16.mxu0 %v10174_v4  ;;  %v4543_v63 = vpack.c.bf16 %v4539_v51, %v4539_v51  ;;  %v4661_v45 = vrot.slane %v4546_v52, 2 }
 0x399   : > { %8101 = vmatprep.subr.msk.bf16.mxu0 %vm752_vm3, %v4399_v6  ;;  %v4406_v6 = vsel %vm752_vm3, %v4398_v60, 0 }
 0x39a   : > { %8094 = vmatmul.mubr.msk.bf16.vlgmr.msra.gmra.mrb[8].mxu1 %vm748_vm4, %v4133_v49  ;;  %v4512_v49 = vsel %vm4511_vm6, %v4508_v22, %v4510_v41  ;;  %v4412_v22 = vsel %vm752_vm3, %v4400_v18, 0  ;;  %v8115_v41 = vld [vmem:[%s10153_s2 + $0x40] ss:$8 sm:$0xf]  ;;  %v4552_v43 = vsel %vm752_vm3, %v4543_v63, 0 }
 0x39b   : > { %4345 = vmatpush1.bf16.msra.mxu1 %v4298_v27  ;;  %4376 = vmatprep.mubr.bf16.mxu1 %v10174_v4  ;;  %v4541_v48 = vmul.f32 %v4530_v9, %v4512_v49  ;;  %v4659_v27 = vrot.slane %v4544_v23, 2  ;;  %v4786_v60 = vrot.slane %v8115_v41, %v8977_v26  ;;  %v4658_v9 = vrot.slane %v4543_v63, 2 }
 0x39c   : > { %8103 = vmatprep.subr.msk.bf16.mxu1 %vm752_vm3, %v4401_v24  ;;  %v4782_v21 = vrot.slane %v8115_v41, %v8991_v31  ;;  %v4774_v49 = vsel %vm4771_vm7, %v4764_v12, %v4766_v61  ;;  %v5024_v61 = vpop.permute.xlu0 %5023 }
 0x39d   : > { %v4545_v24 = vpack.c.bf16 %v4541_v48, %v4541_v48  ;;  %v4800_v51 = vmul.f32 %v4786_v60, %v4773_v54  ;;  %v4790_v48 = vrot.slane %v8115_v41, %v9001_v36  ;;  %v5026_v60 = vpop.permute.xlu1 %5025 }
 0x39f   : > { %8097 = vmatmul.mubr.msk.bf16.vlgmr.msra.gmra.mrb[4].mxu0 %vm748_vm4, %v4287_v16  ;;  %v4558_v18 = vsel %vm752_vm3, %v4545_v24, 0  ;;  %v4660_v0 = vrot.slane %v4545_v24, 2  ;;  %v4804_v63 = vpack.c.bf16 %v4800_v51, %v4800_v51 }
 0x3a0   : > { %4418 = vmatpush1.bf16.msra.mxu0 %v4406_v6  ;;  %4449 = vmatprep.mubr.bf16.mxu0 %v10174_v4  ;;  %v4547_v6 = vld [vmem:[%s10156_s5 + $0x3c] sm:$0x3] }
 0x3a1   : > { %8106 = vmatprep.subr.msk.bf16.mxu0 %vm752_vm3, %v4544_v23  ;;  %v4775_v23 = vsel %vm4771_vm7, %v4770_v17, %v4764_v12  ;;  %v8724_v12 = vld [vmem:[%s10156_s5 + $0x3c] ss:$0 sps:$4 sm:$0xcc]  }
 0x3a2   : > { %8099 = vmatmul.mubr.msk.bf16.vlgmr.msra.gmra.mrb[4].mxu1 %vm748_vm4, %v4287_v16  ;;  %v4794_v16 = vrot.slane %v8115_v41, %v9005_v38  ;;  %v4653_v54 = vrot.slane %v8724_v12, 2 }
 0x3a3   : > { %4459 = vmatpush1.bf16.msra.mxu1 %v4412_v22  ;;  %4490 = vmatprep.mubr.bf16.mxu1 %v10174_v4  ;;  %v4799_v22 = vmul.f32 %v4782_v21, %v4774_v49 }
 0x3a4   : > { %8108 = vmatprep.subr.msk.bf16.mxu1 %vm752_vm3, %v4546_v52  ;;  %v4802_v52 = vmul.f32 %v4794_v16, %v4775_v23  ;;  %v5028_v16 = vpop.permute.xlu0 %5027  ;;  %v5030_v23 = vpop.permute.xlu1 %5029 }
 0x3a5   : > { %v5033_v51 = vsel %vm5031_vm8, %v5026_v60, %v5028_v16 }
 0x3a6   : > { %v4806_v24 = vpack.c.bf16 %v4802_v52, %v4802_v52 }
 0x3a7   : > { %8102 = vmatmul.mubr.msk.bf16.vlgmr.msra.gmra.mrb[8].mxu0 %vm748_vm4, %v4393_v55 }
 0x3a8   : > { %4564 = vmatpush1.bf16.msra.mxu0 %v4552_v43  ;;  %4595 = vmatprep.mubr.bf16.mxu0 %v10174_v4  ;;  %v4803_v43 = vpack.c.bf16 %v4799_v22, %v4799_v22  ;;  %v4921_v49 = vrot.slane %v4806_v24, 2 }
 0x3a9   : > { %8111 = vmatprep.subr.msk.bf16.mxu0 %vm752_vm3, %v4659_v27  ;;  %v4666_v27 = vsel %vm752_vm3, %v4658_v9, 0 }
 0x3aa   : > { %8104 = vmatmul.mubr.msk.bf16.vlgmr.msra.gmra.mrb[8].mxu1 %vm748_vm4, %v4393_v55  ;;  %v4772_v55 = vsel %vm4771_vm7, %v4768_v5, %v4770_v17  ;;  %v4672_v5 = vsel %vm752_vm3, %v4660_v0, 0  ;;  %v8125_v17 = vld [vmem:[%s10153_s2 + $0x41] ss:$8 sm:$0xf]  ;;  %v4812_v21 = vsel %vm752_vm3, %v4803_v43, 0 }
 0x3ab   : > { %4605 = vmatpush1.bf16.msra.mxu1 %v4558_v18  ;;  %4636 = vmatprep.mubr.bf16.mxu1 %v10174_v4  ;;  %v4801_v41 = vmul.f32 %v4790_v48, %v4772_v55  ;;  %v4919_v18 = vrot.slane %v4804_v63, 2  ;;  %v5046_v9 = vrot.slane %v8125_v17, %v8977_v26  ;;  %v4918_v48 = vrot.slane %v4803_v43, 2 }
 0x3ac   : > { %8113 = vmatprep.subr.msk.bf16.mxu1 %vm752_vm3, %v4661_v45  ;;  %v5042_v52 = vrot.slane %v8125_v17, %v8991_v31  ;;  %v5034_v55 = vsel %vm5031_vm8, %v5024_v61, %v5026_v60 }
 0x3ad   : > { %v4805_v45 = vpack.c.bf16 %v4801_v41, %v4801_v41  ;;  %v5060_v22 = vmul.f32 %v5046_v9, %v5033_v51  ;;  %v5050_v41 = vrot.slane %v8125_v17, %v9001_v36  ;;  %v8135_v9 = vld [vmem:[%s10153_s2 + $0x42] ss:$8 sm:$0xf] }
 0x3ae   : > { %v5293_v51 = vrot.slane %v8135_v9, %v8977_v26 }
 0x3af   : > { %8107 = vmatmul.mubr.msk.bf16.vlgmr.msra.gmra.mrb[4].mxu0 %vm748_vm4, %v4547_v6  ;;  %v4818_v0 = vsel %vm752_vm3, %v4805_v45, 0  ;;  %v4920_v12 = vrot.slane %v4805_v45, 2  ;;  %v5064_v43 = vpack.c.bf16 %v5060_v22, %v5060_v22 }
 0x3b0   : > { %4678 = vmatpush1.bf16.msra.mxu0 %v4666_v27  ;;  %4709 = vmatprep.mubr.bf16.mxu0 %v10174_v4  ;;  %v4807_v27 = vld [vmem:[%s10156_s5 + $0x40] sm:$0x3]  ;;  %v5307_v22 = vmul.f32 %v5293_v51, %v9077_v8 }
 0x3b1   : > { %8116 = vmatprep.subr.msk.bf16.mxu0 %vm752_vm3, %v4804_v63  ;;  %v5035_v63 = vsel %vm5031_vm8, %v5030_v23, %v5024_v61  ;;  %v8725_v61 = vld [vmem:[%s10156_s5 + $0x40] ss:$0 sps:$4 sm:$0xcc]   ;;  %v4932_v25 = vsel %vm752_vm3, %v4920_v12, 0  ;;  %v5297_v12 = vrot.slane %v8135_v9, %v9001_v36 }
 0x3b2   : > { %8109 = vmatmul.mubr.msk.bf16.vlgmr.msra.gmra.mrb[4].mxu1 %vm748_vm4, %v4547_v6  ;;  %v5054_v6 = vrot.slane %v8125_v17, %v9005_v38 }
 0x3b3   : > { %4719 = vmatpush1.bf16.msra.mxu1 %v4672_v5  ;;  %4750 = vmatprep.mubr.bf16.mxu1 %v10174_v4  ;;  %v5059_v5 = vmul.f32 %v5042_v52, %v5034_v55  ;;  %v5289_v52 = vrot.slane %v8135_v9, %v8991_v31  ;;  %v5067_v55 = vld [vmem:[%s10156_s5 + $0x44] sm:$0x3] }
 0x3b4   : > { %8118 = vmatprep.subr.msk.bf16.mxu1 %vm752_vm3, %v4806_v24  ;;  %v5062_v24 = vmul.f32 %v5054_v6, %v5035_v63  ;;  %v5301_v6 = vrot.slane %v8135_v9, %v9005_v38 }
 0x3b5   : > { %v5063_v45 = vpack.c.bf16 %v5059_v5, %v5059_v5  ;;  %v5311_v5 = vpack.c.bf16 %v5307_v22, %v5307_v22 }
 0x3b6   : > { %v5066_v17 = vpack.c.bf16 %v5062_v24, %v5062_v24  ;;  %v5306_v24 = vmul.f32 %v5289_v52, %v9052_v59 }
 0x3b7   : > { %8112 = vmatmul.mubr.msk.bf16.vlgmr.msra.gmra.mrb[8].mxu0 %vm748_vm4, %v4653_v54  ;;  %v5178_v63 = vrot.slane %v5063_v45, 2 }
 0x3b8   : > { %4824 = vmatpush1.bf16.msra.mxu0 %v4812_v21  ;;  %4855 = vmatprep.mubr.bf16.mxu0 %v10174_v4 }
 0x3b9   : > { %8121 = vmatprep.subr.msk.bf16.mxu0 %vm752_vm3, %v4919_v18  ;;  %v4926_v18 = vsel %vm752_vm3, %v4918_v48, 0  ;;  %v5186_v8 = vsel %vm752_vm3, %v5178_v63, 0 }
 0x3ba   : > { %8114 = vmatmul.mubr.msk.bf16.vlgmr.msra.gmra.mrb[8].mxu1 %vm748_vm4, %v4653_v54  ;;  %v5032_v54 = vsel %vm5031_vm8, %v5028_v16, %v5030_v23  ;;  %v4913_v16 = vrot.slane %v8725_v61, 2  ;;  %v5179_v23 = vrot.slane %v5064_v43, 2 }
 0x3bb   : > { %4865 = vmatpush1.bf16.msra.mxu1 %v4818_v0  ;;  %4896 = vmatprep.mubr.bf16.mxu1 %v10174_v4  ;;  %v5061_v60 = vmul.f32 %v5050_v41, %v5032_v54  ;;  %v5181_v0 = vrot.slane %v5066_v17, 2  ;;  %v5308_v54 = vmul.f32 %v5297_v12, %v9073_v7 }
 0x3bc   : > { %8123 = vmatprep.subr.msk.bf16.mxu1 %vm752_vm3, %v4921_v49  ;;  %v5072_v49 = vsel %vm752_vm3, %v5063_v45, 0  ;;  %v5426_v45 = vrot.slane %v5311_v5, 2 }
 0x3bd   : > { %v5065_v21 = vpack.c.bf16 %v5061_v60, %v5061_v60  ;;  %v8145_v60 = vld [vmem:[%s10153_s2 + $0x43] ss:$8 sm:$0xf] }
 0x3be   : > { %v5536_v51 = vrot.slane %v8145_v60, %v8991_v31 }
 0x3bf   : > { %8117 = vmatmul.mubr.msk.bf16.vlgmr.msra.gmra.mrb[4].mxu0 %vm748_vm4, %v4807_v27  ;;  %v5078_v48 = vsel %vm752_vm3, %v5065_v21, 0  ;;  %v5180_v41 = vrot.slane %v5065_v21, 2 }
 0x3c0   : > { %4938 = vmatpush1.bf16.msra.mxu0 %v4926_v18  ;;  %4969 = vmatprep.mubr.bf16.mxu0 %v10174_v4  ;;  %v5310_v18 = vpack.c.bf16 %v5306_v24, %v5306_v24  ;;  %v5553_v22 = vmul.f32 %v5536_v51, %v8995_v33 }
 0x3c1   : > { %8126 = vmatprep.subr.msk.bf16.mxu0 %vm752_vm3, %v5064_v43  ;;  %v8726_v43 = vld [vmem:[%s10156_s5 + $0x44] ss:$0 sps:$4 sm:$0xcc]   ;;  %v5192_v59 = vsel %vm752_vm3, %v5180_v41, 0 }
 0x3c2   : > { %8119 = vmatmul.mubr.msk.bf16.vlgmr.msra.gmra.mrb[4].mxu1 %vm748_vm4, %v4807_v27  ;;  %v5309_v27 = vmul.f32 %v5301_v6, %v9063_v1  ;;  %v5173_v61 = vrot.slane %v8726_v43, 2  ;;  %v5319_v7 = vsel %vm752_vm3, %v5310_v18, 0  ;;  %v5314_v6 = vld [vmem:[%s10156_s5 + $0x48] sm:$0x3]  ;;  %v5557_v12 = vpack.c.bf16 %v5553_v22, %v5553_v22 }
 0x3c3   : > { %4979 = vmatpush1.bf16.msra.mxu1 %v4932_v25  ;;  %5010 = vmatprep.mubr.bf16.mxu1 %v10174_v4  ;;  %v5540_v25 = vrot.slane %v8145_v60, %v8977_v26 }
 0x3c4   : > { %8128 = vmatprep.subr.msk.bf16.mxu1 %vm752_vm3, %v5066_v17  ;;  %v5313_v1 = vpack.c.bf16 %v5309_v27, %v5309_v27  ;;  %v5312_v17 = vpack.c.bf16 %v5308_v54, %v5308_v54 }
 0x3c6   : > { %v5428_v9 = vrot.slane %v5313_v1, 2  ;;  %v5325_v21 = vsel %vm752_vm3, %v5312_v17, 0  ;;  %v5427_v52 = vrot.slane %v5312_v17, 2  ;;  %v5561_v17 = vld [vmem:[%s10156_s5 + $0x4c] sm:$0x3] }
 0x3c7   : > { %8122 = vmatmul.mubr.msk.bf16.vlgmr.msra.gmra.mrb[8].mxu0 %vm748_vm4, %v4913_v16 }
 0x3c8   : > { %5084 = vmatpush1.bf16.msra.mxu0 %v5072_v49  ;;  %5115 = vmatprep.mubr.bf16.mxu0 %v10174_v4  ;;  %v5425_v49 = vrot.slane %v5310_v18, 2  ;;  %v5439_v33 = vsel %vm752_vm3, %v5427_v52, 0  ;;  %v5672_v18 = vrot.slane %v5557_v12, 2 }
 0x3c9   : > { %8131 = vmatprep.subr.msk.bf16.mxu0 %vm752_vm3, %v5179_v23  ;;  %v5554_v23 = vmul.f32 %v5540_v25, %v9026_v47 }
 0x3ca   : > { %8124 = vmatmul.mubr.msk.bf16.vlgmr.msra.gmra.mrb[8].mxu1 %vm748_vm4, %v4913_v16  ;;  %v5548_v16 = vrot.slane %v8145_v60, %v9005_v38  ;;  %v5433_v47 = vsel %vm752_vm3, %v5425_v49, 0 }
 0x3cb   : > { %5125 = vmatpush1.bf16.msra.mxu1 %v5078_v48  ;;  %5156 = vmatprep.mubr.bf16.mxu1 %v10174_v4  ;;  %v5544_v48 = vrot.slane %v8145_v60, %v9001_v36  ;;  %v5558_v63 = vpack.c.bf16 %v5554_v23, %v5554_v23 }
 0x3cc   : > { %8133 = vmatprep.subr.msk.bf16.mxu1 %vm752_vm3, %v5181_v0  ;;  %v5556_v0 = vmul.f32 %v5548_v16, %v9009_v40 }
 0x3cd   : > { %v5555_v27 = vmul.f32 %v5544_v48, %v9022_v46  ;;  %v5566_v46 = vsel %vm752_vm3, %v5557_v12, 0 }
 0x3ce   : > { %v5560_v40 = vpack.c.bf16 %v5556_v0, %v5556_v0 }
 0x3cf   : > { %8127 = vmatmul.mubr.msk.bf16.vlgmr.msra.gmra.mrb[4].mxu0 %vm748_vm4, %v5067_v55  ;;  %v5559_v24 = vpack.c.bf16 %v5555_v27, %v5555_v27 }
 0x3d0   : > { %5198 = vmatpush1.bf16.msra.mxu0 %v5186_v8  ;;  %5229 = vmatprep.mubr.bf16.mxu0 %v10174_v4  ;;  %v5673_v8 = vrot.slane %v5558_v63, 2 }
 0x3d1   : > { %8136 = vmatprep.subr.msk.bf16.mxu0 %vm752_vm3, %v5311_v5  ;;  %v8155_v5 = vld [vmem:[%s10153_s2 + $0x44] ss:$8 sm:$0xf]  ;;  %v5674_v25 = vrot.slane %v5559_v24, 2 }
 0x3d2   : > { %8129 = vmatmul.mubr.msk.bf16.vlgmr.msra.gmra.mrb[4].mxu1 %vm748_vm4, %v5067_v55  ;;  %v8727_v55 = vld [vmem:[%s10156_s5 + $0x48] ss:$0 sps:$4 sm:$0xcc]   ;;  %v5787_v43 = vrot.slane %v8155_v5, %v8977_v26  ;;  %v5795_v54 = vrot.slane %v8155_v5, %v9005_v38 }
 0x3d3   : > { %5239 = vmatpush1.bf16.msra.mxu1 %v5192_v59  ;;  %5270 = vmatprep.mubr.bf16.mxu1 %v10174_v4  ;;  %v5420_v41 = vrot.slane %v8727_v55, 2  ;;  %v5572_v59 = vsel %vm752_vm3, %v5559_v24, 0 }
 0x3d4   : > { %8138 = vmatprep.subr.msk.bf16.mxu1 %vm752_vm3, %v5313_v1  ;;  %v5675_v1 = vrot.slane %v5560_v40, 2  ;;  %v5801_v60 = vmul.f32 %v5787_v43, %v9140_v62  ;;  %v5680_v62 = vsel %vm752_vm3, %v5672_v18, 0  ;;  %v8729_v43 = vld [vmem:[%s10156_s5 + $0x50] ss:$0 sps:$4 sm:$0xcc]  }
 0x3d7   : > { %8132 = vmatmul.mubr.msk.bf16.vlgmr.msra.gmra.mrb[8].mxu0 %vm748_vm4, %v5173_v61 }
 0x3d8   : > { %5331 = vmatpush1.bf16.msra.mxu0 %v5319_v7  ;;  %5362 = vmatprep.mubr.bf16.mxu0 %v10174_v4  ;;  %v5791_v7 = vrot.slane %v8155_v5, %v9001_v36 }
 0x3d9   : > { %8141 = vmatprep.subr.msk.bf16.mxu0 %vm752_vm3, %v5426_v45  ;;  %v5803_v45 = vmul.f32 %v5795_v54, %v9130_v56  ;;  %v5914_v54 = vrot.slane %v8729_v43, 2 }
 0x3da   : > { %8134 = vmatmul.mubr.msk.bf16.vlgmr.msra.gmra.mrb[8].mxu1 %vm748_vm4, %v5173_v61  ;;  %v5783_v61 = vrot.slane %v8155_v5, %v8991_v31  ;;  %v5802_v56 = vmul.f32 %v5791_v7, %v9121_v50 }
 0x3db   : > { %5372 = vmatpush1.bf16.msra.mxu1 %v5325_v21  ;;  %5403 = vmatprep.mubr.bf16.mxu1 %v10174_v4  ;;  %v8728_v21 = vld [vmem:[%s10156_s5 + $0x4c] ss:$0 sps:$4 sm:$0xcc]   ;;  %v5807_v51 = vpack.c.bf16 %v5803_v45, %v5803_v45 }
 0x3dc   : > { %8143 = vmatprep.subr.msk.bf16.mxu1 %vm752_vm3, %v5428_v9  ;;  %v5800_v16 = vmul.f32 %v5783_v61, %v9109_v37  ;;  %v5805_v9 = vpack.c.bf16 %v5801_v60, %v5801_v60  ;;  %v5686_v37 = vsel %vm752_vm3, %v5674_v25, 0  ;;  %v5667_v49 = vrot.slane %v8728_v21, 2 }
 0x3dd   : > { %v5806_v0 = vpack.c.bf16 %v5802_v56, %v5802_v56 }
 0x3de   : > { %v5804_v23 = vpack.c.bf16 %v5800_v16, %v5800_v16  ;;  %v5920_v48 = vrot.slane %v5805_v9, 2 }
 0x3df   : > { %8137 = vmatmul.mubr.msk.bf16.vlgmr.msra.gmra.mrb[4].mxu0 %vm748_vm4, %v5314_v6 }
 0x3e0   : > { %5445 = vmatpush1.bf16.msra.mxu0 %v5433_v47  ;;  %5476 = vmatprep.mubr.bf16.mxu0 %v10174_v4  ;;  %v5813_v50 = vsel %vm752_vm3, %v5804_v23, 0  ;;  %v5819_v47 = vsel %vm752_vm3, %v5806_v0, 0  ;;  %v5919_v55 = vrot.slane %v5804_v23, 2 }
 0x3e1   : > { %8146 = vmatprep.subr.msk.bf16.mxu0 %vm752_vm3, %v5558_v63  ;;  %v5922_v63 = vrot.slane %v5807_v51, 2 }
 0x3e2   : > { %8139 = vmatmul.mubr.msk.bf16.vlgmr.msra.gmra.mrb[4].mxu1 %vm748_vm4, %v5314_v6  ;;  %v8165_v6 = vld [vmem:[%s10153_s2 + $0x45] ss:$8 sm:$0xf] }
 0x3e3   : > { %5486 = vmatpush1.bf16.msra.mxu1 %v5439_v33  ;;  %5517 = vmatprep.mubr.bf16.mxu1 %v10174_v4  ;;  %v6034_v52 = vrot.slane %v8165_v6, %v8977_v26  ;;  %v6042_v22 = vrot.slane %v8165_v6, %v9005_v38  ;;  %v5808_v33 = vld [vmem:[%s10156_s5 + $0x50] sm:$0x3]  ;;  %v6038_v24 = vrot.slane %v8165_v6, %v9001_v36 }
 0x3e4   : > { %8148 = vmatprep.subr.msk.bf16.mxu1 %vm752_vm3, %v5560_v40  ;;  %v6030_v40 = vrot.slane %v8165_v6, %v8991_v31 }
 0x3e5   : > { %v6048_v27 = vmul.f32 %v6034_v52, %v9184_v44  ;;  %v6050_v12 = vmul.f32 %v6042_v22, %v9173_v32  ;;  %v5927_v44 = vsel %vm752_vm3, %v5919_v55, 0  ;;  %v8185_v52 = vld [vmem:[%s10153_s2 + $0x47] ss:$8 sm:$0xf] }
 0x3e6   : > { %v6047_v5 = vmul.f32 %v6030_v40, %v9157_v15  ;;  %v6536_v55 = vrot.slane %v8185_v52, %v9005_v38 }
 0x3e7   : > { %8142 = vmatmul.mubr.msk.bf16.vlgmr.msra.gmra.mrb[8].mxu0 %vm748_vm4, %v5420_v41  ;;  %v6054_v32 = vpack.c.bf16 %v6050_v12, %v6050_v12 }
 0x3e8   : > { %5578 = vmatpush1.bf16.msra.mxu0 %v5566_v46  ;;  %5609 = vmatprep.mubr.bf16.mxu0 %v10174_v4  ;;  %v6049_v46 = vmul.f32 %v6038_v24, %v9168_v30  ;;  %v6544_v24 = vmul.f32 %v6536_v55, %v9273_v11 }
 0x3e9   : > { %8151 = vmatprep.subr.msk.bf16.mxu0 %vm752_vm3, %v5673_v8  ;;  %v6052_v8 = vpack.c.bf16 %v6048_v27, %v6048_v27 }
 0x3ea   : > { %8144 = vmatmul.mubr.msk.bf16.vlgmr.msra.gmra.mrb[8].mxu1 %vm748_vm4, %v5420_v41  ;;  %v5921_v41 = vrot.slane %v5806_v0, 2  ;;  %v6053_v18 = vpack.c.bf16 %v6049_v46, %v6049_v46  ;;  %v6548_v11 = vpack.c.bf16 %v6544_v24, %v6544_v24 }
 0x3eb   : > { %5619 = vmatpush1.bf16.msra.mxu1 %v5572_v59  ;;  %5650 = vmatprep.mubr.bf16.mxu1 %v10174_v4  ;;  %v8175_v59 = vld [vmem:[%s10153_s2 + $0x46] ss:$8 sm:$0xf]  ;;  %v6167_v61 = vrot.slane %v6052_v8, 2 }
 0x3ec   : > { %8153 = vmatprep.subr.msk.bf16.mxu1 %vm752_vm3, %v5675_v1  ;;  %v5933_v15 = vsel %vm752_vm3, %v5921_v41, 0  ;;  %v6051_v1 = vpack.c.bf16 %v6047_v5, %v6047_v5  ;;  %v6281_v60 = vrot.slane %v8175_v59, %v8977_v26  ;;  %v6289_v25 = vrot.slane %v8175_v59, %v9005_v38  ;;  %v6302_v41 = vld [vmem:[%s10156_s5 + $0x58] sm:$0x3] }
 0x3ed   : > { %v6066_v45 = vsel %vm752_vm3, %v6053_v18, 0  ;;  %v6277_v16 = vrot.slane %v8175_v59, %v8991_v31  ;;  %v6285_v56 = vrot.slane %v8175_v59, %v9001_v36 }
 0x3ee   : > { %v6060_v30 = vsel %vm752_vm3, %v6051_v1, 0  ;;  %v6166_v7 = vrot.slane %v6051_v1, 2  ;;  %v6297_v21 = vmul.f32 %v6289_v25, %v9223_v20 }
 0x3ef   : > { %8147 = vmatmul.mubr.msk.bf16.vlgmr.msra.gmra.mrb[4].mxu0 %vm748_vm4, %v5561_v17  ;;  %v6296_v6 = vmul.f32 %v6285_v56, %v9218_v19 }
 0x3f0   : > { %5692 = vmatpush1.bf16.msra.mxu0 %v5680_v62  ;;  %5723 = vmatprep.mubr.bf16.mxu0 %v10174_v4  ;;  %v6055_v62 = vld [vmem:[%s10156_s5 + $0x54] sm:$0x3]  ;;  %v6301_v20 = vpack.c.bf16 %v6297_v21, %v6297_v21 }
 0x3f1   : > { %8156 = vmatprep.subr.msk.bf16.mxu0 %vm752_vm3, %v5805_v9  ;;  %v6295_v9 = vmul.f32 %v6281_v60, %v9234_v34  ;;  %v6174_v34 = vsel %vm752_vm3, %v6166_v7, 0  ;;  %v6663_v60 = vrot.slane %v6548_v11, 2 }
 0x3f2   : > { %8149 = vmatmul.mubr.msk.bf16.vlgmr.msra.gmra.mrb[4].mxu1 %vm748_vm4, %v5561_v17  ;;  %v6169_v17 = vrot.slane %v6054_v32, 2 }
 0x3f3   : > { %5733 = vmatpush1.bf16.msra.mxu1 %v5686_v37  ;;  %5764 = vmatprep.mubr.bf16.mxu1 %v10174_v4  ;;  %v6294_v37 = vmul.f32 %v6277_v16, %v9207_v3  ;;  %v6299_v23 = vpack.c.bf16 %v6295_v9, %v6295_v9  ;;  %v6549_v16 = vld [vmem:[%s10156_s5 + $0x5c] sm:$0x3] }
 0x3f4   : > { %8158 = vmatprep.subr.msk.bf16.mxu1 %vm752_vm3, %v5807_v51  ;;  %v6168_v51 = vrot.slane %v6053_v18, 2 }
 0x3f5   : > { %v6298_v0 = vpack.c.bf16 %v6294_v37, %v6294_v37  ;;  %v6414_v22 = vrot.slane %v6299_v23, 2  ;;  %v8732_v37 = vld [vmem:[%s10156_s5 + $0x5c] ss:$0 sps:$4 sm:$0xcc]  }
 0x3f6   : > { %v6180_v3 = vsel %vm752_vm3, %v6168_v51, 0 }
 0x3f7   : > { %8152 = vmatmul.mubr.msk.bf16.vlgmr.msra.gmra.mrb[8].mxu0 %vm748_vm4, %v5667_v49  ;;  %v6307_v19 = vsel %vm752_vm3, %v6298_v0, 0  ;;  %v6413_v27 = vrot.slane %v6298_v0, 2 }
 0x3f8   : > { %5825 = vmatpush1.bf16.msra.mxu0 %v5813_v50  ;;  %5856 = vmatprep.mubr.bf16.mxu0 %v10174_v4  ;;  %v6300_v50 = vpack.c.bf16 %v6296_v6, %v6296_v6 }
 0x3f9   : > { %8161 = vmatprep.subr.msk.bf16.mxu0 %vm752_vm3, %v5920_v48 }
 0x3fa   : > { %8154 = vmatmul.mubr.msk.bf16.vlgmr.msra.gmra.mrb[8].mxu1 %vm748_vm4, %v5667_v49  ;;  %v8730_v49 = vld [vmem:[%s10156_s5 + $0x54] ss:$0 sps:$4 sm:$0xcc]   ;;  %v6313_v40 = vsel %vm752_vm3, %v6300_v50, 0  ;;  %v6415_v5 = vrot.slane %v6300_v50, 2 }
 0x3fb   : > { %5866 = vmatpush1.bf16.msra.mxu1 %v5819_v47  ;;  %5897 = vmatprep.mubr.bf16.mxu1 %v10174_v4  ;;  %v6161_v48 = vrot.slane %v8730_v49, 2  ;;  %v6416_v47 = vrot.slane %v6301_v20, 2  ;;  %v6655_v49 = vrot.slane %v8732_v37, 2  ;;  %v7290_v37 = vld [vmem:[%s10156_s5 + $0x68] sm:$0x3] }
 0x3fc   : > { %8163 = vmatprep.subr.msk.bf16.mxu1 %vm752_vm3, %v5922_v63  ;;  %v6528_v63 = vrot.slane %v8185_v52, %v8977_v26 }
 0x3fe   : > { %v6542_v12 = vmul.f32 %v6528_v63, %v9284_v28  ;;  %v6421_v28 = vsel %vm752_vm3, %v6413_v27, 0 }
 0x3ff   : > { %8157 = vmatmul.mubr.msk.bf16.vlgmr.msra.gmra.mrb[4].mxu0 %vm748_vm4, %v5808_v33 }
 0x400   : > { %5939 = vmatpush1.bf16.msra.mxu0 %v5927_v44  ;;  %5970 = vmatprep.mubr.bf16.mxu0 %v10174_v4  ;;  %v6546_v43 = vpack.c.bf16 %v6542_v12, %v6542_v12 }
 0x401   : > { %8166 = vmatprep.subr.msk.bf16.mxu0 %vm752_vm3, %v6052_v8  ;;  %v6532_v8 = vrot.slane %v8185_v52, %v9001_v36 }
 0x402   : > { %8159 = vmatmul.mubr.msk.bf16.vlgmr.msra.gmra.mrb[4].mxu1 %vm748_vm4, %v5808_v33  ;;  %v6524_v33 = vrot.slane %v8185_v52, %v8991_v31  ;;  %v6661_v18 = vrot.slane %v6546_v43, 2 }
 0x403   : > { %5980 = vmatpush1.bf16.msra.mxu1 %v5933_v15  ;;  %6011 = vmatprep.mubr.bf16.mxu1 %v10174_v4  ;;  %v6543_v46 = vmul.f32 %v6532_v8, %v9268_v10 }
 0x404   : > { %8168 = vmatprep.subr.msk.bf16.mxu1 %vm752_vm3, %v6054_v32  ;;  %v6541_v44 = vmul.f32 %v6524_v33, %v9257_v58  ;;  %v8731_v32 = vld [vmem:[%s10156_s5 + $0x58] ss:$0 sps:$4 sm:$0xcc]   ;;  %v6427_v58 = vsel %vm752_vm3, %v6415_v5, 0 }
 0x405   : > { %v6408_v1 = vrot.slane %v8731_v32, 2  ;;  %v6547_v59 = vpack.c.bf16 %v6543_v46, %v6543_v46 }
 0x406   : > { %v6545_v15 = vpack.c.bf16 %v6541_v44, %v6541_v44  ;;  %v8215_v44 = vld [vmem:[%s10153_s2 + $0x62] ss:$8 sm:$0xf] }
 0x407   : > { %8162 = vmatmul.mubr.msk.bf16.vlgmr.msra.gmra.mrb[8].mxu0 %vm748_vm4, %v5914_v54  ;;  %v7269_v32 = vrot.slane %v8215_v44, %v8977_v26  ;;  %v7277_v46 = vrot.slane %v8215_v44, %v9005_v38 }
 0x408   : > { %6072 = vmatpush1.bf16.msra.mxu0 %v6060_v30  ;;  %6103 = vmatprep.mubr.bf16.mxu0 %v10174_v4  ;;  %v6554_v10 = vsel %vm752_vm3, %v6545_v15, 0  ;;  %v6660_v25 = vrot.slane %v6545_v15, 2 }
 0x409   : > { %8171 = vmatprep.subr.msk.bf16.mxu0 %vm752_vm3, %v6167_v61 }
 0x40a   : > { %8164 = vmatmul.mubr.msk.bf16.vlgmr.msra.gmra.mrb[8].mxu1 %vm748_vm4, %v5914_v54  ;;  %v8195_v54 = vld [vmem:[%s10153_s2 + $0x60] ss:$8 sm:$0xf] }
 0x40b   : > { %6113 = vmatpush1.bf16.msra.mxu1 %v6066_v45  ;;  %6144 = vmatprep.mubr.bf16.mxu1 %v10174_v4  ;;  %v6775_v61 = vrot.slane %v8195_v54, %v8977_v26  ;;  %v6783_v30 = vrot.slane %v8195_v54, %v9005_v38  ;;  %v6771_v45 = vrot.slane %v8195_v54, %v8991_v31 }
 0x40c   : > { %8173 = vmatprep.subr.msk.bf16.mxu1 %vm752_vm3, %v6169_v17  ;;  %v6560_v17 = vsel %vm752_vm3, %v6547_v59, 0  ;;  %v6779_v21 = vrot.slane %v8195_v54, %v9001_v36  ;;  %v7043_v54 = vld [vmem:[%s10156_s5 + $0x64] sm:$0x3] }
 0x40d   : > { %v6789_v7 = vmul.f32 %v6775_v61, %v9334_v39  ;;  %v6791_v9 = vmul.f32 %v6783_v30, %v9323_v14  ;;  %v6788_v51 = vmul.f32 %v6771_v45, %v9307_v57  ;;  %v6668_v39 = vsel %vm752_vm3, %v6660_v25, 0  ;;  %v10177_v25 = vld [vmem:[#allocation3_spill] sm:$0xff] }
 0x40e   : > { %v7273_v61 = vrot.slane %v8215_v44, %v9001_v36 }
 0x40f   : > { %8167 = vmatmul.mubr.msk.bf16.vlgmr.msra.gmra.mrb[4].mxu0 %vm748_vm4, %v6055_v62  ;;  %v6793_v56 = vpack.c.bf16 %v6789_v7, %v6789_v7  ;;  %v6795_v14 = vpack.c.bf16 %v6791_v9, %v6791_v9 }
 0x410   : > { %6186 = vmatpush1.bf16.msra.mxu0 %v6174_v34  ;;  %6217 = vmatprep.mubr.bf16.mxu0 %v10174_v4  ;;  %v6792_v34 = vpack.c.bf16 %v6788_v51, %v6788_v51  ;;  %v7284_v45 = vmul.f32 %v7273_v61, %v10177_v25 }
 0x411   : > { %8176 = vmatprep.subr.msk.bf16.mxu0 %vm752_vm3, %v6299_v23  ;;  %v6790_v23 = vmul.f32 %v6779_v21, %v9318_v13 }
 0x412   : > { %8169 = vmatmul.mubr.msk.bf16.vlgmr.msra.gmra.mrb[4].mxu1 %vm748_vm4, %v6055_v62  ;;  %v6662_v62 = vrot.slane %v6547_v59, 2  ;;  %v6801_v13 = vsel %vm752_vm3, %v6792_v34, 0  ;;  %v10175_v59 = vld [vmem:[#allocation4_spill] sm:$0xff]  ;;  %v7288_v9 = vpack.c.bf16 %v7284_v45, %v7284_v45  ;;  %v7534_v45 = vld [vmem:[%s10159_s8] sm:$0xff] }
 0x413   : > { %6227 = vmatpush1.bf16.msra.mxu1 %v6180_v3  ;;  %6258 = vmatprep.mubr.bf16.mxu1 %v10174_v4  ;;  %v6794_v6 = vpack.c.bf16 %v6790_v23, %v6790_v23  ;;  %v6908_v3 = vrot.slane %v6793_v56, 2 }
 0x414   : > { %8178 = vmatprep.subr.msk.bf16.mxu1 %vm752_vm3, %v6301_v20  ;;  %v6674_v57 = vsel %vm752_vm3, %v6662_v62, 0  ;;  %v8205_v20 = vld [vmem:[%s10153_s2 + $0x61] ss:$8 sm:$0xf] }
 0x415   : > { %v7022_v0 = vrot.slane %v8205_v20, %v8977_v26  ;;  %v7030_v52 = vrot.slane %v8205_v20, %v9005_v38  ;;  %v6807_v50 = vsel %vm752_vm3, %v6794_v6, 0  ;;  %v7018_v63 = vrot.slane %v8205_v20, %v8991_v31 }
 0x416   : > { %v7026_v27 = vrot.slane %v8205_v20, %v9001_v36  ;;  %v7283_v26 = vmul.f32 %v7269_v32, %v9434_v42  ;;  %v7285_v38 = vmul.f32 %v7277_v46, %v10175_v59  ;;  %v8734_v42 = vld [vmem:[%s10156_s5 + $0x64] ss:$0 sps:$4 sm:$0xcc]  }
 0x417   : > { %8172 = vmatmul.mubr.msk.bf16.vlgmr.msra.gmra.mrb[8].mxu0 %vm748_vm4, %v6161_v48  ;;  %v7038_v55 = vmul.f32 %v7030_v52, %v9373_v35  ;;  %v7035_v33 = vmul.f32 %v7018_v63, %v9357_v2 }
 0x418   : > { %6319 = vmatpush1.bf16.msra.mxu0 %v6307_v19  ;;  %6350 = vmatprep.mubr.bf16.mxu0 %v10174_v4  ;;  %v7036_v19 = vmul.f32 %v7022_v0, %v9384_v53  ;;  %v7037_v24 = vmul.f32 %v7026_v27, %v9368_v29  ;;  %v7287_v30 = vpack.c.bf16 %v7283_v26, %v7283_v26 }
 0x419   : > { %8181 = vmatprep.subr.msk.bf16.mxu0 %vm752_vm3, %v6414_v22  ;;  %v6907_v22 = vrot.slane %v6792_v34, 2  ;;  %v7042_v35 = vpack.c.bf16 %v7038_v55, %v7038_v55  ;;  %v7039_v5 = vpack.c.bf16 %v7035_v33, %v7035_v33  ;;  %v10178_v34 = vmov 0.0   ;;  %v7527_v55 = vpop.permute.xlu0 %7526 }
 0x41a   : > { %8174 = vmatmul.mubr.msk.bf16.vlgmr.msra.gmra.mrb[8].mxu1 %vm748_vm4, %v6161_v48  ;;  %v6910_v48 = vrot.slane %v6795_v14, 2  ;;  %v7040_v12 = vpack.c.bf16 %v7036_v19, %v7036_v19  ;;  %v7402_v62 = vrot.slane %v7287_v30, 2 }
 0x41b   : > { %6360 = vmatpush1.bf16.msra.mxu1 %v6313_v40  ;;  %6391 = vmatprep.mubr.bf16.mxu1 %v10174_v4  ;;  %v6909_v40 = vrot.slane %v6794_v6, 2  ;;  %v6915_v53 = vsel %vm752_vm3, %v6907_v22, 0  ;;  %v7048_v29 = vsel %vm752_vm3, %v7039_v5, 0  ;;  %v7154_v15 = vrot.slane %v7039_v5, 2 }
 0x41c   : > { %8183 = vmatprep.subr.msk.bf16.mxu1 %vm752_vm3, %v6416_v47  ;;  %v6796_v47 = vld [vmem:[%s10156_s5 + $0x60] sm:$0x3] }
 0x41d   : > { %v6921_v2 = vsel %vm752_vm3, %v6909_v40, 0 }
 0x41f   : > { %8177 = vmatmul.mubr.msk.bf16.vlgmr.msra.gmra.mrb[4].mxu0 %vm748_vm4, %v6302_v41 }
 0x420   : > { %6433 = vmatpush1.bf16.msra.mxu0 %v6421_v28  ;;  %6464 = vmatprep.mubr.bf16.mxu0 %v10174_v4  ;;  %v7155_v28 = vrot.slane %v7040_v12, 2 }
 0x421   : > { %8186 = vmatprep.subr.msk.bf16.mxu0 %vm752_vm3, %v6546_v43  ;;  %v7041_v43 = vpack.c.bf16 %v7037_v24, %v7037_v24 }
 0x422   : > { %8179 = vmatmul.mubr.msk.bf16.vlgmr.msra.gmra.mrb[4].mxu1 %vm748_vm4, %v6302_v41  ;;  %v8733_v41 = vld [vmem:[%s10156_s5 + $0x60] ss:$0 sps:$4 sm:$0xcc]  }
 0x423   : > { %6474 = vmatpush1.bf16.msra.mxu1 %v6427_v58  ;;  %6505 = vmatprep.mubr.bf16.mxu1 %v10174_v4  ;;  %v6902_v8 = vrot.slane %v8733_v41, 2  ;;  %v7054_v58 = vsel %vm752_vm3, %v7041_v43, 0 }
 0x424   : > { %8188 = vmatprep.subr.msk.bf16.mxu1 %vm752_vm3, %v6548_v11  ;;  %v7157_v11 = vrot.slane %v7042_v35, 2 }
 0x427   : > { %8182 = vmatmul.mubr.msk.bf16.vlgmr.msra.gmra.mrb[8].mxu0 %vm748_vm4, %v6408_v1 }
 0x428   : > { %6566 = vmatpush1.bf16.msra.mxu0 %v6554_v10  ;;  %6597 = vmatprep.mubr.bf16.mxu0 %v10174_v4  ;;  %v10176_v10 = vld [vmem:[#allocation2_spill] sm:$0xff] }
 0x429   : > { %8191 = vmatprep.subr.msk.bf16.mxu0 %vm752_vm3, %v6661_v18  ;;  %v7156_v18 = vrot.slane %v7041_v43, 2 }
 0x42a   : > { %8184 = vmatmul.mubr.msk.bf16.vlgmr.msra.gmra.mrb[8].mxu1 %vm748_vm4, %v6408_v1  ;;  %v7265_v1 = vrot.slane %v8215_v44, %v8991_v31  ;;  %v7162_v31 = vsel %vm752_vm3, %v7154_v15, 0 }
 0x42b   : > { %6607 = vmatpush1.bf16.msra.mxu1 %v6560_v17  ;;  %6638 = vmatprep.mubr.bf16.mxu1 %v10174_v4  ;;  %v7289_v17 = vpack.c.bf16 %v7285_v38, %v7285_v38  ;;  %v7168_v36 = vsel %vm752_vm3, %v7156_v18, 0 }
 0x42c   : > { %8193 = vmatprep.subr.msk.bf16.mxu1 %vm752_vm3, %v6663_v60  ;;  %v7282_v60 = vmul.f32 %v7265_v1, %v10176_v10 }
 0x42d   : > { %v7404_v51 = vrot.slane %v7289_v17, 2 }
 0x42e   : > { %v7286_v7 = vpack.c.bf16 %v7282_v60, %v7282_v60 }
 0x42f   : > { %8187 = vmatmul.mubr.msk.bf16.vlgmr.msra.gmra.mrb[4].mxu0 %vm748_vm4, %v6549_v16 }
 0x430   : > { %6680 = vmatpush1.bf16.msra.mxu0 %v6668_v39  ;;  %6711 = vmatprep.mubr.bf16.mxu0 %v10174_v4  ;;  %v7295_v21 = vsel %vm752_vm3, %v7286_v7, 0  ;;  %v7401_v39 = vrot.slane %v7286_v7, 2 }
 0x431   : > { %8196 = vmatprep.subr.msk.bf16.mxu0 %vm752_vm3, %v6793_v56  ;;  %v7301_v56 = vsel %vm752_vm3, %v7288_v9, 0 }
 0x432   : > { %8189 = vmatmul.mubr.msk.bf16.vlgmr.msra.gmra.mrb[4].mxu1 %vm748_vm4, %v6549_v16  ;;  %v7149_v16 = vrot.slane %v8734_v42, 2  ;;  %v7409_v23 = vsel %vm752_vm3, %v7401_v39, 0 }
 0x433   : > { %6721 = vmatpush1.bf16.msra.mxu1 %v6674_v57  ;;  %6752 = vmatprep.mubr.bf16.mxu1 %v10174_v4  ;;  %v8735_v57 = vld [vmem:[%s10156_s5 + $0x68] ss:$0 sps:$4 sm:$0xcc]  }
 0x434   : > { %8198 = vmatprep.subr.msk.bf16.mxu1 %vm752_vm3, %v6795_v14  ;;  %v7403_v14 = vrot.slane %v7288_v9, 2  ;;  %v7396_v20 = vrot.slane %v8735_v57, 2  ;;  %v7873_v9 = vld [vmem:[%s10162_s11] sm:$0xff] }
 0x437   : > { %8192 = vmatmul.mubr.msk.bf16.vlgmr.msra.gmra.mrb[8].mxu0 %vm748_vm4, %v6655_v49 }
 0x438   : > { %6813 = vmatpush1.bf16.msra.mxu0 %v6801_v13  ;;  %6844 = vmatprep.mubr.bf16.mxu0 %v10174_v4 }
 0x439   : > { %8201 = vmatprep.subr.msk.bf16.mxu0 %vm752_vm3, %v6908_v3 }
 0x43a   : > { %8194 = vmatmul.mubr.msk.bf16.vlgmr.msra.gmra.mrb[8].mxu1 %vm748_vm4, %v6655_v49  ;;  %v7415_v49 = vsel %vm752_vm3, %v7403_v14, 0 }
 0x43b   : > { %6854 = vmatpush1.bf16.msra.mxu1 %v6807_v50  ;;  %6885 = vmatprep.mubr.bf16.mxu1 %v10174_v4 }
 0x43c   : > { %8203 = vmatprep.subr.msk.bf16.mxu1 %vm752_vm3, %v6910_v48 }
 0x43f   : > { %8197 = vmatmul.mubr.msk.bf16.vlgmr.msra.gmra.mrb[4].mxu0 %vm748_vm4, %v6796_v47 }
 0x440   : > { %6927 = vmatpush1.bf16.msra.mxu0 %v6915_v53  ;;  %6958 = vmatprep.mubr.bf16.mxu0 %v10174_v4 }
 0x441   : > { %8206 = vmatprep.subr.msk.bf16.mxu0 %vm752_vm3, %v7040_v12 }
 0x442   : > { %8199 = vmatmul.mubr.msk.bf16.vlgmr.msra.gmra.mrb[4].mxu1 %vm748_vm4, %v6796_v47 }
 0x443   : > { %6968 = vmatpush1.bf16.msra.mxu1 %v6921_v2  ;;  %6999 = vmatprep.mubr.bf16.mxu1 %v10174_v4 }
 0x444   : > { %8208 = vmatprep.subr.msk.bf16.mxu1 %vm752_vm3, %v7042_v35 }
 0x447   : > { %8202 = vmatmul.mubr.msk.bf16.vlgmr.msra.gmra.mrb[8].mxu0 %vm748_vm4, %v6902_v8 }
 0x448   : > { %7060 = vmatpush1.bf16.msra.mxu0 %v7048_v29  ;;  %7091 = vmatprep.mubr.bf16.mxu0 %v10174_v4 }
 0x449   : > { %8211 = vmatprep.subr.msk.bf16.mxu0 %vm752_vm3, %v7155_v28 }
 0x44a   : > { %8204 = vmatmul.mubr.msk.bf16.vlgmr.msra.gmra.mrb[8].mxu1 %vm748_vm4, %v6902_v8 }
 0x44b   : > { %7101 = vmatpush1.bf16.msra.mxu1 %v7054_v58  ;;  %7132 = vmatprep.mubr.bf16.mxu1 %v10174_v4 }
 0x44c   : > { %8213 = vmatprep.subr.msk.bf16.mxu1 %vm752_vm3, %v7157_v11 }
 0x44f   : > { %8207 = vmatmul.mubr.msk.bf16.vlgmr.msra.gmra.mrb[4].mxu0 %vm748_vm4, %v7043_v54 }
 0x450   : > { %7174 = vmatpush1.bf16.msra.mxu0 %v7162_v31  ;;  %7205 = vmatprep.mubr.bf16.mxu0 %v10174_v4 }
 0x451   : > { %8216 = vmatprep.subr.msk.bf16.mxu0 %vm752_vm3, %v7287_v30  ;;  %v8756_v30 = vld [vmem:[%s10152_s1] sm:$0xff] }
 0x452   : > { %8209 = vmatmul.mubr.msk.bf16.vlgmr.msra.gmra.mrb[4].mxu1 %vm748_vm4, %v7043_v54 }
 0x453   : > { %7215 = vmatpush1.bf16.msra.mxu1 %v7168_v36  ;;  %7246 = vmatprep.mubr.bf16.mxu1 %v10174_v4 }
 0x454   : > { %8218 = vmatprep.subr.msk.bf16.mxu1 %vm752_vm3, %v7289_v17 }
 0x457   : > { %8212 = vmatmul.mubr.msk.bf16.vlgmr.msra.gmra.mrb[8].mxu0 %vm748_vm4, %v7149_v16 }
 0x458   : > { %7307 = vmatpush1.bf16.msra.mxu0 %v7295_v21  ;;  %7338 = vmatprep.mubr.bf16.mxu0 %v10174_v4  ;;  %v7770_v21 = vld [vmem:[%s10161_s10] sm:$0xff] }
 0x459   : > { %8221 = vmatprep.subr.msk.bf16.mxu0 %vm752_vm3, %v7402_v62  ;;  %v7533_v62 = vld [vmem:[%s10158_s7] sm:$0xff] }
 0x45a   : > { %8214 = vmatmul.mubr.msk.bf16.vlgmr.msra.gmra.mrb[8].mxu1 %vm748_vm4, %v7149_v16 }
 0x45b   : > { %7348 = vmatpush1.bf16.msra.mxu1 %v7301_v56  ;;  %7379 = vmatprep.mubr.bf16.mxu1 %v10174_v4 }
 0x45c   : > { %8223 = vmatprep.subr.msk.bf16.mxu1 %vm752_vm3, %v7404_v51  ;;  %vm7518_vm3 = vcmask 1043456  }
 0x45f   : > { %8217 = vmatmul.mubr.msk.bf16.vlgmr.msra.gmra.mrb[4].mxu0 %vm748_vm4, %v7290_v37 }
 0x460   : > { %7421 = vmatpush1.bf16.msra.mxu0 %v7409_v23  ;;  %7452 = vmatprep.mubr.bf16.mxu0 %v10174_v4 }
 0x461   : > { %8253 = vmatprep.subr.mxu0 %v10178_v34 }
 0x462   : > { %8219 = vmatmul.mubr.msk.bf16.vlgmr.msra.gmra.mrb[4].mxu1 %vm748_vm4, %v7290_v37 }
 0x463   : > { %7462 = vmatpush1.bf16.msra.mxu1 %v7415_v49  ;;  %7493 = vmatprep.mubr.bf16.mxu1 %v10174_v4 }
 0x464   : > { %8258 = vmatprep.subr.mxu1 %v10178_v34 }
 0x467   : > { %8222 = vmatmul.mubr.msk.bf16.vlgmr.msra.gmra.mrb[8].mxu0 %vm748_vm4, %v7396_v20 }
 0x468   : > { %8255 = vmatprep.mubr.msk.f32.mxu0 %vm8770_vm0, %v10178_v34 }
 0x46a   : > { %8224 = vmatmul.mubr.msk.bf16.vlgmr.msra.gmra.mrb[8].mxu1 %vm748_vm4, %v7396_v20 }
 0x46b   : > { %8260 = vmatprep.mubr.msk.f32.mxu1 %vm8770_vm0, %v10178_v34 }
 0x532   : > { %v7340_v6 = vpop.f32.mrb[4].mxu0 }
 0x533   : > { %v7342_v3 = vpop.f32.mrb[5].mxu0 }
 0x534   : > { %v7344_v0 = vpop.f32.mrb[6].mxu0 }
 0x535   : > { %v7345_v13 = vpop.f32.mrb[7].mxu0  ;;  %v7381_v48 = vpop.f32.mrb[4].mxu1 }
 0x536   : > { %v7383_v52 = vpop.f32.mrb[5].mxu1 }
 0x537   : > { %v7385_v50 = vpop.f32.mrb[6].mxu1 }
 0x538   : > { %v7386_v22 = vpop.f32.mrb[7].mxu1 }
 0x53a   : > { %v7454_v63 = vpop.f32.mrb[8].mxu0 }
 0x53b   : > { %v7510_v19 = vrot.slane %v7454_v63, 4  ;;  %v7456_v47 = vpop.f32.mrb[9].mxu0 }
 0x53c   : > { %v7511_v40 = vrot.slane %v7456_v47, 4  ;;  %v7458_v27 = vpop.f32.mrb[10].mxu0 }
 0x53d   : > { %v7519_v33 = vsel %vm7518_vm3, %v7340_v6, %v7510_v19  ;;  %v7459_v12 = vpop.f32.mrb[11].mxu0  ;;  %v7495_v53 = vpop.f32.mrb[8].mxu1 }
 0x53e   : > { %v7529_v41 = vadd.f32 %v7527_v55, %v7519_v33  ;;  %v7520_v35 = vsel %vm7518_vm3, %v7342_v3, %v7511_v40  ;;  %v7512_v24 = vrot.slane %v7495_v53, 4  ;;  %v7497_v2 = vpop.f32.mrb[9].mxu1 }
 0x53f   : > { %v7530_v5 = vadd.f32 %v7527_v55, %v7520_v35  ;;  %v7513_v8 = vrot.slane %v7497_v2, 4  ;;  %v7499_v44 = vpop.f32.mrb[10].mxu1 }
 0x540   : > { %v7521_v43 = vsel %vm7518_vm3, %v7381_v48, %v7512_v24  ;;  %v7500_v28 = vpop.f32.mrb[11].mxu1  ;;  %v7540_v32 = vmul.f32 %v7529_v41, %v7529_v41 }
 0x541   : > { %v7531_v29 = vadd.f32 %v7527_v55, %v7521_v43  ;;  %v7522_v11 = vsel %vm7518_vm3, %v7383_v52, %v7513_v8  ;;  %v7535_v46 = vadd.f32 %v7530_v5, %v7529_v41  ;;  %v7541_v58 = vmul.f32 %v7530_v5, %v7530_v5 }
 0x542   : > { %v7532_v15 = vadd.f32 %v7527_v55, %v7522_v11 }
 0x543   : > { %v7536_v1 = vadd.f32 %v7535_v46, %v7531_v29  ;;  %v7542_v26 = vmul.f32 %v7531_v29, %v7531_v29  ;;  %v7544_v54 = vadd.f32 %v7541_v58, %v7540_v32 }
 0x544   : > { %v7543_v59 = vmul.f32 %v7532_v15, %v7532_v15 }
 0x545   : > { %v7537_v38 = vadd.f32 %v7536_v1, %v7532_v15  ;;  %v7545_v18 = vadd.f32 %v7544_v54, %v7542_v26 }
 0x547   : > { %7538 = vadd.xlane.f32.xlu1 %v7537_v38  ;;  %v7546_v61 = vadd.f32 %v7545_v18, %v7543_v59 }
 0x549   : > { %7547 = vadd.xlane.f32.xlu0 %v7546_v61 }
 0x5d4   : > { %v7539_v10 = vpop.xlane.xlu1 %7538 }
 0x5d5   : > { %8254 = vmatpush3.msra.mxu0 %v7539_v10 }
 0x5d6   : > { %v7548_v60 = vpop.xlane.xlu0 %7547  ;;  %8256 = vmatmul.mubr.msk.f32.vlgmr.msra.gmra.mrb[2].mxu0 %vm436_vm1, %v8756_v30 }
 0x5d7   : > { %8259 = vmatpush3.msra.mxu1 %v7548_v60  ;;  %7823 = vmatprep.mubr.bf16.mxu0 %v10174_v4 }
 0x5d8   : > { %8261 = vmatmul.mubr.msk.f32.vlgmr.msra.gmra.mrb[2].mxu1 %vm436_vm1, %v8756_v30 }
 0x5d9   : > { %7864 = vmatprep.mubr.bf16.mxu1 %v10174_v4 }
 0x6a9   : > { %v7615_v31 = vpop.f32.mrb[2].mxu0 }
 0x6aa   : > { %v7689_v42 = vmul.f32 %v7615_v31, %v7615_v31  ;;  %7693 = vperm.xlu0 %8707, %v7615_v31   ;;  %v8257_v17 = vpop.f32.mrb[3].mxu0 }
 0x6ab   : > { %v7685_v25 = vpop.f32.mrb[2].mxu1 }
 0x6ac   : > { %v7690_v36 = vsub.f32 %v7685_v25, %v7689_v42  ;;  %v8262_v7 = vpop.f32.mrb[3].mxu1 }
 0x6ae   : > { %v7700_v16 = vadd.f32 1e-05, %v7690_v36  ;;  %7722 = vperm.xlu0 %8707, %v7534_v45  }
 0x6b0   : > { %8746 = vrsqrt.f32 %v7700_v16 }
 0x6b2   : > { %7876 = vperm.xlu0 %8707, %v7873_v9  }
 0x6ba   : > { %v8747_v4 = vpop.eup %8746 }
 0x6bb   : > { %7704 = vperm.xlu1 %8708, %v8747_v4  }
 0x6bf   : > { %7713 = vperm.xlu1 %8708, %v7533_v62   ;;  %v7765_v62 = vld [vmem:[%s10160_s9] sm:$0xf] }
 0x6c3   : > { %7773 = vperm.xlu1 %8708, %v7770_v21  }
 0x729   : > { %v7694_v51 = vpop.permute.xlu0 %7693 }
 0x72a   : > { %v7696_v39 = vsub.f32 %v7529_v41, %v7694_v51  ;;  %v7697_v37 = vsub.f32 %v7530_v5, %v7694_v51  ;;  %v7698_v14 = vsub.f32 %v7531_v29, %v7694_v51  ;;  %v7699_v23 = vsub.f32 %v7532_v15, %v7694_v51 }
 0x72d   : > { %v7723_v52 = vpop.permute.xlu0 %7722 }
 0x731   : > { %v7877_v21 = vpop.permute.xlu0 %7876 }
 0x73a   : > { %v7705_v56 = vpop.permute.xlu1 %7704 }
 0x73b   : > { %v7707_v57 = vmul.f32 %v7705_v56, %v7696_v39  ;;  %v7708_v34 = vmul.f32 %v7705_v56, %v7697_v37  ;;  %v7709_v49 = vmul.f32 %v7705_v56, %v7698_v14  ;;  %v7710_v20 = vmul.f32 %v7705_v56, %v7699_v23 }
 0x73e   : > { %v7714_v6 = vpop.permute.xlu1 %7713 }
 0x73f   : > { %v7716_v3 = vmul.f32 %v7714_v6, %v7707_v57  ;;  %v7717_v0 = vmul.f32 %v7714_v6, %v7708_v34  ;;  %v7718_v13 = vmul.f32 %v7714_v6, %v7709_v49  ;;  %v7719_v48 = vmul.f32 %v7714_v6, %v7710_v20 }
 0x741   : > { %v7725_v50 = vadd.f32 %v7723_v52, %v7716_v3  ;;  %v7726_v22 = vadd.f32 %v7723_v52, %v7717_v0  ;;  %v7727_v63 = vadd.f32 %v7723_v52, %v7718_v13  ;;  %v7728_v19 = vadd.f32 %v7723_v52, %v7719_v48 }
 0x742   : > { %v7774_v51 = vpop.permute.xlu1 %7773 }
 0x743   : > { %v7734_v47 = vmul.f32 0.044715, %v7726_v22  ;;  %v7736_v55 = vmul.f32 0.044715, %v7728_v19  ;;  %v7733_v40 = vmul.f32 0.044715, %v7725_v50 }
 0x744   : > { %v7735_v27 = vmul.f32 0.044715, %v7727_v63  ;;  %v7730_v1 = vmul.f32 0.5, %v7726_v22  ;;  %v7732_v59 = vmul.f32 0.5, %v7728_v19  ;;  %v7729_v10 = vmul.f32 0.5, %v7725_v50 }
 0x745   : > { %v7738_v33 = vmul.f32 %v7734_v47, %v7726_v22  ;;  %v7740_v12 = vmul.f32 %v7736_v55, %v7728_v19  ;;  %v7737_v53 = vmul.f32 %v7733_v40, %v7725_v50  ;;  %v7731_v31 = vmul.f32 0.5, %v7727_v63  ;;  %v8759_v55 = vld [vmem:[%s8872_s26 + $0x8] sm:$0xff] }
 0x746   : > { %v7739_v41 = vmul.f32 %v7735_v27, %v7727_v63  ;;  %v8760_v27 = vld [vmem:[%s8872_s26 + $0x18] sm:$0xff] }
 0x747   : > { %v7742_v35 = vmul.f32 %v7738_v33, %v7726_v22  ;;  %v7744_v24 = vmul.f32 %v7740_v12, %v7728_v19  ;;  %v7741_v2 = vmul.f32 %v7737_v53, %v7725_v50 }
 0x748   : > { %v7743_v5 = vmul.f32 %v7739_v41, %v7727_v63 }
 0x749   : > { %v7746_v8 = vadd.f32 %v7742_v35, %v7726_v22  ;;  %v7748_v44 = vadd.f32 %v7744_v24, %v7728_v19  ;;  %v7745_v43 = vadd.f32 %v7741_v2, %v7725_v50  ;;  %v8757_v50 = vld [vmem:[%s8872_s26] sm:$0xff]  ;;  %v8758_v19 = vld [vmem:[%s8872_s26 + $0x10] sm:$0xff] }
 0x74a   : > { %v7747_v28 = vadd.f32 %v7743_v5, %v7727_v63 }
 0x74b   : > { %v7750_v32 = vmul.f32 0.7978846, %v7746_v8  ;;  %v7752_v29 = vmul.f32 0.7978846, %v7748_v44  ;;  %v7749_v11 = vmul.f32 0.7978846, %v7745_v43 }
 0x74c   : > { %v7751_v46 = vmul.f32 0.7978846, %v7747_v28 }
 0x74d   : > { %8748 = vtanh.f32 %v7750_v32 }
 0x74e   : > { %8750 = vtanh.f32 %v7752_v29 }
 0x74f   : > { %8752 = vtanh.f32 %v7749_v11 }
 0x750   : > { %8754 = vtanh.f32 %v7751_v46 }
 0x757   : > { %v8749_v58 = vpop.eup %8748 }
 0x758   : > { %v8751_v15 = vpop.eup %8750  ;;  %v7758_v26 = vadd.f32 1.0, %v8749_v58 }
 0x759   : > { %v8753_v54 = vpop.eup %8752  ;;  %v7760_v38 = vadd.f32 1.0, %v8751_v15 }
 0x75a   : > { %v8755_v18 = vpop.eup %8754  ;;  %v7762_v61 = vmul.f32 %v7758_v26, %v7730_v1  ;;  %v7757_v60 = vadd.f32 1.0, %v8753_v54 }
 0x75b   : > { %v7764_v30 = vmul.f32 %v7760_v38, %v7732_v59  ;;  %v7759_v42 = vadd.f32 1.0, %v8755_v18 }
 0x75c   : > { %v7767_v17 = vpack.c.bf16 %v7762_v61, %v7762_v61  ;;  %v7761_v25 = vmul.f32 %v7757_v60, %v7729_v10 }
 0x75d   : > { %v7769_v45 = vpack.c.bf16 %v7764_v30, %v7764_v30  ;;  %v7763_v36 = vmul.f32 %v7759_v42, %v7731_v31 }
 0x75e   : > { %8227 = vmatprep.subr.msk.bf16.mxu0 %vm7518_vm3, %v7767_v17  ;;  %v7766_v7 = vpack.c.bf16 %v7761_v25, %v7761_v25 }
 0x75f   : > { %8229 = vmatprep.subr.msk.bf16.mxu1 %vm7518_vm3, %v7769_v45  ;;  %v7768_v16 = vpack.c.bf16 %v7763_v36, %v7763_v36 }
 0x760   : > { %v7780_v9 = vsel %vm7518_vm3, %v7766_v7, 0 }
 0x761   : > { %7792 = vmatpush1.bf16.msra.mxu0 %v7780_v9  ;;  %v7786_v4 = vsel %vm7518_vm3, %v7768_v16, 0 }
 0x762   : > { %7833 = vmatpush1.bf16.msra.mxu1 %v7786_v4 }
 0x764   : > { %8228 = vmatmul.mubr.msk.bf16.vlgmr.msra.gmra.mrb[12].mxu0 %vm436_vm1, %v7765_v62 }
 0x765   : > { %8230 = vmatmul.mubr.msk.bf16.vlgmr.msra.gmra.mrb[12].mxu1 %vm436_vm1, %v7765_v62 }
 0x837   : > { %v7825_v56 = vpop.f32.mrb[12].mxu0 }
 0x838   : > { %v7826_v39 = vadd.f32 %v7825_v56, %v7774_v51  ;;  %v7866_v37 = vpop.f32.mrb[12].mxu1  ;;  %v7827_v14 = vpop.f32.mrb[13].mxu0 }
 0x839   : > { %v7867_v23 = vadd.f32 %v7866_v37, %v7774_v51  ;;  %v7828_v57 = vadd.f32 %v7827_v14, %v7774_v51  ;;  %v7868_v34 = vpop.f32.mrb[13].mxu1  ;;  %v7829_v49 = vpop.f32.mrb[14].mxu0 }
 0x83a   : > { %v7879_v20 = vmul.f32 %v7877_v21, %v7826_v39  ;;  %v7869_v6 = vadd.f32 %v7868_v34, %v7774_v51  ;;  %v7870_v3 = vpop.f32.mrb[14].mxu1  ;;  %v7830_v0 = vpop.f32.mrb[15].mxu0 }
 0x83b   : > { %v7881_v13 = vmul.f32 %v7877_v21, %v7867_v23  ;;  %v7880_v48 = vmul.f32 %v7877_v21, %v7828_v57  ;;  %v7871_v52 = vpop.f32.mrb[15].mxu1 }
 0x83c   : > { %v7883_v22 = vadd.f32 %v8757_v50, %v7879_v20  ;;  %v7882_v63 = vmul.f32 %v7877_v21, %v7869_v6 }
 0x83d   : > { %v7885_v47 = vadd.f32 %v8758_v19, %v7881_v13  ;;  %v7884_v40 = vadd.f32 %v8759_v55, %v7880_v48 }
 0x83e   : > { %7887 = vst [vmem:[%s413_s30] sm:$0xff] %v7883_v22  ;;  %v7886_v33 = vadd.f32 %v8760_v27, %v7882_v63 }
 0x83f   : > { %7889 = vst [vmem:[%s413_s30 + $0x10] sm:$0xff] %v7885_v47  ;;  %7888 = vst [vmem:[%s413_s30 + $0x8] sm:$0xff] %v7884_v40 }
 0x840   : > { %7890 = vst [vmem:[%s413_s30 + $0x18] sm:$0xff] %v7886_v33 }
 0x841 PF: > { %s22_s21 = sadd.s32 1, %s8767_s21  }
 0x842   : > { %p19_p4 = scmp.ge.s32.totalorder %s22_s21, 4  }
 0x844   :  { %21 = sbr.rel (!%p19_p4) target bundleno = 1 (0x1), region = 123 }

</bundles_post_ra>
